<compile_context>
chip_gen: v5e
topology: v5e:2x2
jax: 0.10.0
libtpu: 0.0.40
codegen_flags: <defaults>
</compile_context>

<pallas_src>
import functools

import numpy as np

import jax
import jax.numpy as jnp
from jax import lax
from jax.experimental import pallas as pl
from jax.experimental.pallas import tpu as pltpu


# ------------------------------- helpers ------------------------------------

def _round_up(x, m):
    return (x + m - 1) // m * m


def _im2col(x_nhwc, kh, kw, stride, pad):
    """(N,H,W,C) -> (N,Ho,Wo,kh*kw*C) patches, tap-major (kh,kw,cin) order."""
    N, H, W, C = x_nhwc.shape
    xp = jnp.pad(x_nhwc, ((0, 0), (pad, pad), (pad, pad), (0, 0)))
    Ho = (H + 2 * pad - kh) // stride + 1
    Wo = (W + 2 * pad - kw) // stride + 1
    cols = []
    for di in range(kh):
        for dj in range(kw):
            cols.append(xp[:, di:di + stride * Ho:stride,
                           dj:dj + stride * Wo:stride, :])
    return jnp.concatenate(cols, axis=-1), Ho, Wo


def _weights_as_gemm(w_oihw, b, k_pad=None, n_pad=None):
    """OIHW conv weights -> (k_pad, n_pad) bf16 GEMM matrix + (1, n_pad) f32 bias.
    Rows are tap-major, channel-minor: row = (kh*KW + kw)*Cin + cin."""
    Cout, Cin, KH, KW = w_oihw.shape
    K = KH * KW * Cin
    k_pad = K if k_pad is None else k_pad
    n_pad = Cout if n_pad is None else n_pad
    w_mat = jnp.transpose(w_oihw, (2, 3, 1, 0)).reshape(K, Cout)
    w_mat = jnp.pad(w_mat, ((0, k_pad - K), (0, n_pad - Cout)))
    b_row = jnp.pad(b.reshape(1, Cout).astype(jnp.float32),
                    ((0, 0), (0, n_pad - Cout)))
    return w_mat.astype(jnp.bfloat16), b_row


def _build_gather_matrix(h_in, w_in, groups, kh, kw, stride, pad):
    """0/1 selection matrix mapping the flat conv1 activation of a batch group
    to conv2's shifted-window taps.  Row (t*G + g)*HWo + m has a single 1 at
    the conv1 position that tap t of output position m in sample g reads
    (all-zero row when the tap falls in the spatial zero-padding).  Built once
    on the host; becomes a jit-time constant."""
    h_out = (h_in + 2 * pad - kh) // stride + 1
    w_out = (w_in + 2 * pad - kw) // stride + 1
    hw_in, hw_out = h_in * w_in, h_out * w_out
    sel = np.zeros((kh * kw * groups * hw_out, groups * hw_in), np.float32)
    for ti in range(kh):
        for tj in range(kw):
            t = ti * kw + tj
            for g in range(groups):
                for oi in range(h_out):
                    ii = oi * stride + ti - pad
                    if not 0 <= ii < h_in:
                        continue
                    for oj in range(w_out):
                        jj = oj * stride + tj - pad
                        if 0 <= jj < w_in:
                            row = (t * groups + g) * hw_out + oi * w_out + oj
                            col = g * hw_in + ii * w_in + jj
                            sel[row, col] = 1.0
    return sel, h_out, w_out


# ----------------------------- Pallas kernel ---------------------------------

def _fused_encoder_kernel(p1_ref, w1_ref, b1_ref, s_ref, w2_ref, b2_ref,
                          pool_ref, o_ref, *, c1, hw2_g, n_taps, inv_hw2):
    """conv1 GEMM+ReLU -> in-VMEM patch gather -> conv2 GEMM+ReLU -> global
    average pool, for one batch group.  Only the pooled block goes to HBM."""
    # conv1: (G*HW1, K1p) @ (K1p, C1) + bias -> ReLU (f32 acc / f32 epilogue).
    a1 = jnp.dot(p1_ref[...], w1_ref[...], preferred_element_type=jnp.float32)
    a1 = jnp.maximum(a1 + b1_ref[...], 0.0).astype(jnp.bfloat16)

    # conv2 patch extraction as a 0/1 selection matmul on the resident conv1
    # activation; rows of `gathered` are ordered (tap, sample, out-position).
    gathered = jnp.dot(s_ref[...], a1, preferred_element_type=jnp.float32)
    gathered = gathered.astype(jnp.bfloat16)

    # conv2 = sum over the 9 taps of (G*HW2, C1) @ (C1, C2p) partial GEMMs.
    w2 = w2_ref[...]
    acc2 = jnp.dot(gathered[0:hw2_g, :], w2[0:c1, :],
                   preferred_element_type=jnp.float32)
    for t in range(1, n_taps):
        acc2 = acc2 + jnp.dot(gathered[t * hw2_g:(t + 1) * hw2_g, :],
                              w2[t * c1:(t + 1) * c1, :],
                              preferred_element_type=jnp.float32)
    acc2 = jnp.maximum(acc2 + b2_ref[...], 0.0)

    # Fused global average pool as a small matmul: (G, G*HW2) @ (G*HW2, C2p).
    pooled = jnp.dot(pool_ref[...], acc2, preferred_element_type=jnp.float32)
    o_ref[...] = (pooled * inv_hw2).astype(o_ref.dtype)


# ------------------------------- JAX glue ------------------------------------

_GROUP = 8        # batch samples per grid step -> lane/sublane-dense (8, 128) out


def _encode(x_nchw, params):
    """NCHW image batch -> (B, feat_dim) embedding via one fused pallas_call."""
    x = jnp.transpose(x_nchw, (0, 2, 3, 1)).astype(jnp.float32)   # NCHW -> NHWC
    N, _, _, Cin = x.shape
    w1, b1, w2, b2 = params["w1"], params["b1"], params["w2"], params["b2"]
    C1, C2 = w1.shape[0], w2.shape[0]
    assert w1.shape[1] == Cin and w2.shape[1] == C1

    # conv1 im2col in the wrapper.  K1 rounded only to a multiple of 16 for
    # bf16 sublane alignment (NOT to 128) so the streamed slab stays small.
    patches1, Ho1, Wo1 = _im2col(x, 3, 3, stride=2, pad=1)
    HW1 = Ho1 * Wo1
    K1 = 9 * Cin
    K1p = _round_up(K1, 16)

    G = _GROUP
    Npad = _round_up(N, G)       # padded samples are computed and sliced off
    p1 = patches1.astype(jnp.bfloat16).reshape(N, HW1, K1)
    p1 = jnp.pad(p1, ((0, Npad - N), (0, 0), (0, K1p - K1)))
    p1 = p1.reshape(Npad * HW1, K1p)

    # conv2 geometry + host-built gather / pooling operators (jit constants).
    sel_np, Ho2, Wo2 = _build_gather_matrix(Ho1, Wo1, G, 3, 3, stride=2, pad=1)
    HW2 = Ho2 * Wo2
    s_big = jnp.asarray(sel_np, dtype=jnp.bfloat16)        # (9*G*HW2, G*HW1)
    pool_np = np.zeros((G, G * HW2), np.float32)
    for g in range(G):
        pool_np[g, g * HW2:(g + 1) * HW2] = 1.0
    pool = jnp.asarray(pool_np)                            # (G, G*HW2)

    C2p = _round_up(C2, 128)                               # lane-dense output
    w1m, b1r = _weights_as_gemm(w1, b1, k_pad=K1p)         # (K1p, C1), (1, C1)
    w2m, b2r = _weights_as_gemm(w2, b2, n_pad=C2p)         # (9*C1, C2p), (1, C2p)

    kernel = functools.partial(_fused_encoder_kernel, c1=C1, hw2_g=G * HW2,
                               n_taps=9, inv_hw2=1.0 / HW2)
    out = pl.pallas_call(
        kernel,
        out_shape=jax.ShapeDtypeStruct((Npad, C2p), jnp.float32),
        grid=(Npad // G,),
        in_specs=[
            # streamed per batch group
            pl.BlockSpec((G * HW1, K1p), lambda i: (i, 0)),
            # small operands resident for the whole grid
            pl.BlockSpec((K1p, C1), lambda i: (0, 0)),
            pl.BlockSpec((1, C1), lambda i: (0, 0)),
            pl.BlockSpec(s_big.shape, lambda i: (0, 0)),
            pl.BlockSpec((9 * C1, C2p), lambda i: (0, 0)),
            pl.BlockSpec((1, C2p), lambda i: (0, 0)),
            pl.BlockSpec((G, G * HW2), lambda i: (0, 0)),
        ],
        out_specs=pl.BlockSpec((G, C2p), lambda i: (i, 0)),
        compiler_params=pltpu.CompilerParams(
            # Each step writes its own output block (nothing revisited), so the
            # batch axis is truly parallel -> 2-TC split on v7x, harmless on
            # single-TC v5e/v6e.
            dimension_semantics=("parallel",),
            # Footprint ~4 MiB; 32 MiB fits every generation's scoped VMEM.
            vmem_limit_bytes=32 * 1024 * 1024),
    )(p1, w1m, b1r, s_big, w2m, b2r, pool)
    return out[:N, :C2]


def init_params(key, in_ch=3, mid_ch=16, out_ch=32):
    k1, k2, k3, k4 = jax.random.split(key, 4)
    return {
        "w1": jax.random.normal(k1, (mid_ch, in_ch, 3, 3), jnp.float32) * 0.1,
        "b1": jax.random.normal(k2, (mid_ch,), jnp.float32) * 0.01,
        "w2": jax.random.normal(k3, (out_ch, mid_ch, 3, 3), jnp.float32) * 0.1,
        "b2": jax.random.normal(k4, (out_ch,), jnp.float32) * 0.01,
    }


@jax.jit
def image_encoder(x_nchw, params):
    """forward(x): NCHW image batch -> (B, feat_dim) embedding."""
    return _encode(x_nchw, params)


def _reference_forward(x_nchw, params):
    """Pure-JAX reference (f32 everywhere) for correctness checking."""
    x = jnp.transpose(x_nchw, (0, 2, 3, 1))

    def conv(x, w, b):
        w_hwio = jnp.transpose(w, (2, 3, 1, 0))
        y = lax.conv_general_dilated(
            x, w_hwio, window_strides=(2, 2), padding=[(1, 1), (1, 1)],
            dimension_numbers=("NHWC", "HWIO", "NHWC"))
        return jnp.maximum(y + b, 0.0)

    x = conv(x, params["w1"], params["b1"])
    x = conv(x, params["w2"], params["b2"])
    return jnp.mean(x, axis=(1, 2))


# --------------------------------- driver ------------------------------------

if __name__ == "__main__":
    key = jax.random.PRNGKey(0)
    kp, kx = jax.random.split(key)
    params = init_params(kp)
    x = jax.random.normal(kx, (2, 3, 16, 16), jnp.float32)   # NCHW like PyTorch

    emb = image_encoder(x, params)
    jax.block_until_ready(emb)
    assert emb.shape == (2, 32) and emb.dtype == jnp.float32

    ref = _reference_forward(x, params)
    max_err = float(jnp.max(jnp.abs(emb - ref)))
    assert jnp.allclose(emb, ref, rtol=5e-2, atol=5e-2), max_err

    print("KERNEL_OK")
</pallas_src>

<mosaic_0001>
module attributes {stable_mosaic.version = 11 : i64} {
  func.func @_fused_encoder_kernel(%arg0: i32, %arg1: memref<512x32xbf16, #tpu.memory_space<vmem>>, %arg2: memref<32x16xbf16, #tpu.memory_space<vmem>>, %arg3: memref<1x16xf32, #tpu.memory_space<vmem>>, %arg4: memref<1152x512xbf16, #tpu.memory_space<vmem>>, %arg5: memref<144x128xbf16, #tpu.memory_space<vmem>>, %arg6: memref<1x128xf32, #tpu.memory_space<vmem>>, %arg7: memref<8x128xf32, #tpu.memory_space<vmem>>, %arg8: memref<8x128xf32, #tpu.memory_space<vmem>>) attributes {dimension_semantics = [#tpu.dimension_semantics<parallel>], iteration_bounds = array<i64: 1>, scalar_prefetch = 0 : i64, scratch_operands = 0 : i64, tpu.core_type = #tpu.core_type<tc>, window_params = [{transform_indices = @transform_0, window_bounds = array<i64: 512, 32>}, {pipeline_mode = #tpu.pipeline_mode<synchronous>, transform_indices = @transform_1, window_bounds = array<i64: 32, 16>}, {pipeline_mode = #tpu.pipeline_mode<synchronous>, transform_indices = @transform_2, window_bounds = array<i64: 1, 16>}, {pipeline_mode = #tpu.pipeline_mode<synchronous>, transform_indices = @transform_3, window_bounds = array<i64: 1152, 512>}, {pipeline_mode = #tpu.pipeline_mode<synchronous>, transform_indices = @transform_4, window_bounds = array<i64: 144, 128>}, {pipeline_mode = #tpu.pipeline_mode<synchronous>, transform_indices = @transform_5, window_bounds = array<i64: 1, 128>}, {pipeline_mode = #tpu.pipeline_mode<synchronous>, transform_indices = @transform_6, window_bounds = array<i64: 8, 128>}, {transform_indices = @transform_7, window_bounds = array<i64: 8, 128>}]} {
    %c0 = arith.constant 0 : index
    %c0_0 = arith.constant 0 : index
    %0 = vector.load %arg1[%c0, %c0_0] : memref<512x32xbf16, #tpu.memory_space<vmem>>, vector<512x32xbf16>
    %c0_1 = arith.constant 0 : index
    %c0_2 = arith.constant 0 : index
    %1 = vector.load %arg2[%c0_1, %c0_2] : memref<32x16xbf16, #tpu.memory_space<vmem>>, vector<32x16xbf16>
    %cst = arith.constant dense<0.000000e+00> : vector<512x16xf32>
    %2 = tpu.matmul %0, %1, %cst {dimension_numbers = #tpu.dot_dimension_numbers<[1], [0], [0], [1], [0, 0, 1, 1], [], []>} : vector<512x32xbf16>, vector<32x16xbf16>, vector<512x16xf32> -> vector<512x16xf32>
    %c0_3 = arith.constant 0 : index
    %c0_4 = arith.constant 0 : index
    %3 = vector.load %arg3[%c0_3, %c0_4] : memref<1x16xf32, #tpu.memory_space<vmem>>, vector<1x16xf32>
    %4 = vector.broadcast %3 : vector<1x16xf32> to vector<512x16xf32>
    %5 = arith.addf %2, %4 : vector<512x16xf32>
    %cst_5 = arith.constant 0.000000e+00 : f32
    %6 = vector.broadcast %cst_5 : f32 to vector<512x16xf32>
    %7 = arith.maximumf %5, %6 : vector<512x16xf32>
    %8 = arith.truncf %7 : vector<512x16xf32> to vector<512x16xbf16>
    %c0_6 = arith.constant 0 : index
    %c0_7 = arith.constant 0 : index
    %9 = vector.load %arg4[%c0_6, %c0_7] : memref<1152x512xbf16, #tpu.memory_space<vmem>>, vector<1152x512xbf16>
    %cst_8 = arith.constant dense<0.000000e+00> : vector<1152x16xf32>
    %10 = tpu.matmul %9, %8, %cst_8 {dimension_numbers = #tpu.dot_dimension_numbers<[1], [0], [0], [1], [0, 0, 1, 1], [], []>} : vector<1152x512xbf16>, vector<512x16xbf16>, vector<1152x16xf32> -> vector<1152x16xf32>
    %11 = arith.truncf %10 : vector<1152x16xf32> to vector<1152x16xbf16>
    %c0_9 = arith.constant 0 : index
    %c0_10 = arith.constant 0 : index
    %12 = vector.load %arg5[%c0_9, %c0_10] : memref<144x128xbf16, #tpu.memory_space<vmem>>, vector<144x128xbf16>
    %13 = vector.extract_strided_slice %11 {offsets = [0, 0], sizes = [128, 16], strides = [1, 1]} : vector<1152x16xbf16> to vector<128x16xbf16>
    %14 = vector.extract_strided_slice %12 {offsets = [0, 0], sizes = [16, 128], strides = [1, 1]} : vector<144x128xbf16> to vector<16x128xbf16>
    %cst_11 = arith.constant dense<0.000000e+00> : vector<128x128xf32>
    %15 = tpu.matmul %13, %14, %cst_11 {dimension_numbers = #tpu.dot_dimension_numbers<[1], [0], [0], [1], [0, 0, 1, 1], [], []>} : vector<128x16xbf16>, vector<16x128xbf16>, vector<128x128xf32> -> vector<128x128xf32>
    %16 = vector.extract_strided_slice %11 {offsets = [128, 0], sizes = [128, 16], strides = [1, 1]} : vector<1152x16xbf16> to vector<128x16xbf16>
    %17 = vector.extract_strided_slice %12 {offsets = [16, 0], sizes = [16, 128], strides = [1, 1]} : vector<144x128xbf16> to vector<16x128xbf16>
    %cst_12 = arith.constant dense<0.000000e+00> : vector<128x128xf32>
    %18 = tpu.matmul %16, %17, %cst_12 {dimension_numbers = #tpu.dot_dimension_numbers<[1], [0], [0], [1], [0, 0, 1, 1], [], []>} : vector<128x16xbf16>, vector<16x128xbf16>, vector<128x128xf32> -> vector<128x128xf32>
    %19 = arith.addf %15, %18 : vector<128x128xf32>
    %20 = vector.extract_strided_slice %11 {offsets = [256, 0], sizes = [128, 16], strides = [1, 1]} : vector<1152x16xbf16> to vector<128x16xbf16>
    %21 = vector.extract_strided_slice %12 {offsets = [32, 0], sizes = [16, 128], strides = [1, 1]} : vector<144x128xbf16> to vector<16x128xbf16>
    %cst_13 = arith.constant dense<0.000000e+00> : vector<128x128xf32>
    %22 = tpu.matmul %20, %21, %cst_13 {dimension_numbers = #tpu.dot_dimension_numbers<[1], [0], [0], [1], [0, 0, 1, 1], [], []>} : vector<128x16xbf16>, vector<16x128xbf16>, vector<128x128xf32> -> vector<128x128xf32>
    %23 = arith.addf %19, %22 : vector<128x128xf32>
    %24 = vector.extract_strided_slice %11 {offsets = [384, 0], sizes = [128, 16], strides = [1, 1]} : vector<1152x16xbf16> to vector<128x16xbf16>
    %25 = vector.extract_strided_slice %12 {offsets = [48, 0], sizes = [16, 128], strides = [1, 1]} : vector<144x128xbf16> to vector<16x128xbf16>
    %cst_14 = arith.constant dense<0.000000e+00> : vector<128x128xf32>
    %26 = tpu.matmul %24, %25, %cst_14 {dimension_numbers = #tpu.dot_dimension_numbers<[1], [0], [0], [1], [0, 0, 1, 1], [], []>} : vector<128x16xbf16>, vector<16x128xbf16>, vector<128x128xf32> -> vector<128x128xf32>
    %27 = arith.addf %23, %26 : vector<128x128xf32>
    %28 = vector.extract_strided_slice %11 {offsets = [512, 0], sizes = [128, 16], strides = [1, 1]} : vector<1152x16xbf16> to vector<128x16xbf16>
    %29 = vector.extract_strided_slice %12 {offsets = [64, 0], sizes = [16, 128], strides = [1, 1]} : vector<144x128xbf16> to vector<16x128xbf16>
    %cst_15 = arith.constant dense<0.000000e+00> : vector<128x128xf32>
    %30 = tpu.matmul %28, %29, %cst_15 {dimension_numbers = #tpu.dot_dimension_numbers<[1], [0], [0], [1], [0, 0, 1, 1], [], []>} : vector<128x16xbf16>, vector<16x128xbf16>, vector<128x128xf32> -> vector<128x128xf32>
    %31 = arith.addf %27, %30 : vector<128x128xf32>
    %32 = vector.extract_strided_slice %11 {offsets = [640, 0], sizes = [128, 16], strides = [1, 1]} : vector<1152x16xbf16> to vector<128x16xbf16>
    %33 = vector.extract_strided_slice %12 {offsets = [80, 0], sizes = [16, 128], strides = [1, 1]} : vector<144x128xbf16> to vector<16x128xbf16>
    %cst_16 = arith.constant dense<0.000000e+00> : vector<128x128xf32>
    %34 = tpu.matmul %32, %33, %cst_16 {dimension_numbers = #tpu.dot_dimension_numbers<[1], [0], [0], [1], [0, 0, 1, 1], [], []>} : vector<128x16xbf16>, vector<16x128xbf16>, vector<128x128xf32> -> vector<128x128xf32>
    %35 = arith.addf %31, %34 : vector<128x128xf32>
    %36 = vector.extract_strided_slice %11 {offsets = [768, 0], sizes = [128, 16], strides = [1, 1]} : vector<1152x16xbf16> to vector<128x16xbf16>
    %37 = vector.extract_strided_slice %12 {offsets = [96, 0], sizes = [16, 128], strides = [1, 1]} : vector<144x128xbf16> to vector<16x128xbf16>
    %cst_17 = arith.constant dense<0.000000e+00> : vector<128x128xf32>
    %38 = tpu.matmul %36, %37, %cst_17 {dimension_numbers = #tpu.dot_dimension_numbers<[1], [0], [0], [1], [0, 0, 1, 1], [], []>} : vector<128x16xbf16>, vector<16x128xbf16>, vector<128x128xf32> -> vector<128x128xf32>
    %39 = arith.addf %35, %38 : vector<128x128xf32>
    %40 = vector.extract_strided_slice %11 {offsets = [896, 0], sizes = [128, 16], strides = [1, 1]} : vector<1152x16xbf16> to vector<128x16xbf16>
    %41 = vector.extract_strided_slice %12 {offsets = [112, 0], sizes = [16, 128], strides = [1, 1]} : vector<144x128xbf16> to vector<16x128xbf16>
    %cst_18 = arith.constant dense<0.000000e+00> : vector<128x128xf32>
    %42 = tpu.matmul %40, %41, %cst_18 {dimension_numbers = #tpu.dot_dimension_numbers<[1], [0], [0], [1], [0, 0, 1, 1], [], []>} : vector<128x16xbf16>, vector<16x128xbf16>, vector<128x128xf32> -> vector<128x128xf32>
    %43 = arith.addf %39, %42 : vector<128x128xf32>
    %44 = vector.extract_strided_slice %11 {offsets = [1024, 0], sizes = [128, 16], strides = [1, 1]} : vector<1152x16xbf16> to vector<128x16xbf16>
    %45 = vector.extract_strided_slice %12 {offsets = [128, 0], sizes = [16, 128], strides = [1, 1]} : vector<144x128xbf16> to vector<16x128xbf16>
    %cst_19 = arith.constant dense<0.000000e+00> : vector<128x128xf32>
    %46 = tpu.matmul %44, %45, %cst_19 {dimension_numbers = #tpu.dot_dimension_numbers<[1], [0], [0], [1], [0, 0, 1, 1], [], []>} : vector<128x16xbf16>, vector<16x128xbf16>, vector<128x128xf32> -> vector<128x128xf32>
    %47 = arith.addf %43, %46 : vector<128x128xf32>
    %c0_20 = arith.constant 0 : index
    %c0_21 = arith.constant 0 : index
    %48 = vector.load %arg6[%c0_20, %c0_21] : memref<1x128xf32, #tpu.memory_space<vmem>>, vector<1x128xf32>
    %49 = vector.broadcast %48 : vector<1x128xf32> to vector<128x128xf32>
    %50 = arith.addf %47, %49 : vector<128x128xf32>
    %cst_22 = arith.constant 0.000000e+00 : f32
    %51 = vector.broadcast %cst_22 : f32 to vector<128x128xf32>
    %52 = arith.maximumf %50, %51 : vector<128x128xf32>
    %c0_23 = arith.constant 0 : index
    %c0_24 = arith.constant 0 : index
    %53 = vector.load %arg7[%c0_23, %c0_24] : memref<8x128xf32, #tpu.memory_space<vmem>>, vector<8x128xf32>
    %cst_25 = arith.constant dense<0.000000e+00> : vector<8x128xf32>
    %54 = tpu.matmul %53, %52, %cst_25 {dimension_numbers = #tpu.dot_dimension_numbers<[1], [0], [0], [1], [0, 0, 1, 1], [], []>} : vector<8x128xf32>, vector<128x128xf32>, vector<8x128xf32> -> vector<8x128xf32>
    %cst_26 = arith.constant 6.250000e-02 : f32
    %55 = vector.broadcast %cst_26 : f32 to vector<8x128xf32>
    %56 = arith.mulf %54, %55 : vector<8x128xf32>
    %c0_27 = arith.constant 0 : index
    %c0_28 = arith.constant 0 : index
    %57 = vector.load %arg8[%c0_27, %c0_28] : memref<8x128xf32, #tpu.memory_space<vmem>>, vector<8x128xf32>
    tpu.vector_store %arg8[%c0_27, %c0_28], %56 {strides = array<i32>} : memref<8x128xf32, #tpu.memory_space<vmem>>, vector<8x128xf32>,
    return
  }
  func.func @transform_0(%arg0: i32) -> (i32, i32) {
    %c0_i32 = arith.constant 0 : i32
    %c0_i32_0 = arith.constant 0 : i32
    return %arg0, %c0_i32 : i32, i32
  }
  func.func @transform_1(%arg0: i32) -> (i32, i32) {
    %c0_i32 = arith.constant 0 : i32
    %c0_i32_0 = arith.constant 0 : i32
    %c0_i32_1 = arith.constant 0 : i32
    return %c0_i32, %c0_i32_0 : i32, i32
  }
  func.func @transform_2(%arg0: i32) -> (i32, i32) {
    %c0_i32 = arith.constant 0 : i32
    %c0_i32_0 = arith.constant 0 : i32
    %c0_i32_1 = arith.constant 0 : i32
    return %c0_i32, %c0_i32_0 : i32, i32
  }
  func.func @transform_3(%arg0: i32) -> (i32, i32) {
    %c0_i32 = arith.constant 0 : i32
    %c0_i32_0 = arith.constant 0 : i32
    %c0_i32_1 = arith.constant 0 : i32
    return %c0_i32, %c0_i32_0 : i32, i32
  }
  func.func @transform_4(%arg0: i32) -> (i32, i32) {
    %c0_i32 = arith.constant 0 : i32
    %c0_i32_0 = arith.constant 0 : i32
    %c0_i32_1 = arith.constant 0 : i32
    return %c0_i32, %c0_i32_0 : i32, i32
  }
  func.func @transform_5(%arg0: i32) -> (i32, i32) {
    %c0_i32 = arith.constant 0 : i32
    %c0_i32_0 = arith.constant 0 : i32
    %c0_i32_1 = arith.constant 0 : i32
    return %c0_i32, %c0_i32_0 : i32, i32
  }
  func.func @transform_6(%arg0: i32) -> (i32, i32) {
    %c0_i32 = arith.constant 0 : i32
    %c0_i32_0 = arith.constant 0 : i32
    %c0_i32_1 = arith.constant 0 : i32
    return %c0_i32, %c0_i32_0 : i32, i32
  }
  func.func @transform_7(%arg0: i32) -> (i32, i32) {
    %c0_i32 = arith.constant 0 : i32
    %c0_i32_0 = arith.constant 0 : i32
    return %arg0, %c0_i32 : i32, i32
  }
}

</mosaic_0001>

<bundles_post_ra>
// kernel: image_encoder.1
= control target key start
LH: loop header
LB: loop body
LE: loop exit
PB: predicated region body
PF: predicated region fallthrough
CT: control target
= control target key end

     0   :  { %12 = vsyncpa [#allocation3], 0  ;;  %s9272_s0 = inlined_call_operand.vmem [shape: bf16[512,32], index: 0, kind: input, shape index: {}]   ;;  %s9273_s1 = inlined_call_operand.vmem [shape: bf16[32,16], index: 1, kind: input, shape index: {}]   ;;  %s9274_s2 = inlined_call_operand.hbm [shape: f32[1,16], index: 2, kind: input, shape index: {}]   ;;  %s9275_s3 = inlined_call_operand.hbm [shape: bf16[1152,512], index: 3, kind: input, shape index: {}]   ;;  %s9276_s4 = inlined_call_operand.vmem [shape: bf16[144,128], index: 4, kind: input, shape index: {}]   ;;  %s9277_s5 = inlined_call_operand.vmem [shape: f32[1,128], index: 5, kind: input, shape index: {}]   ;;  %s9278_s6 = inlined_call_operand.hbm [shape: f32[8,128], index: 6, kind: input, shape index: {}]   ;;  %s9279_s7 = inlined_call_operand.vmem [shape: f32[8,128], index: 7, kind: output, shape index: {}]  }
   0x1   :  { %13 = vsyncpa [#allocation5], 0  ;;  %s33_s26 = sshll.u32 %s9275_s3, 4  ;;  %s7137_s27 = smov [#allocation4]   ;;  %s34_s26 = int_to_ptr.hbm [resolvable:$true] %s33_s26 }
   0x2   :  { %s35_s28 = sshll.u32 %s7137_s27, 4  ;;  %s23_s8 = sshll.u32 %s9274_s2, 4  ;;  %s36_s28 = int_to_ptr.vmem [resolvable:$true] %s35_s28  ;;  %s24_s8 = int_to_ptr.hbm [resolvable:$true] %s23_s8 }
   0x3   :  { %s7138_s9 = smov 256   ;;  %s7139_s10 = smov 16  }
   0x4   :  { %41 = dma.hbm_to_vmem [thread:$0]  %s34_s26, 36864, %s36_s28, [#allocation5], %s7138_s9, %s7138_s9, %s7139_s10  }
   0x5   :  { %s7140_s11 = smov [#allocation2]   ;;  %s51_s15 = sshll.u32 %s9278_s6, 4  ;;  %s52_s15 = int_to_ptr.hbm [resolvable:$true] %s51_s15 }
   0x6   :  { %s25_s12 = sshll.u32 %s7140_s11, 4  ;;  %s7141_s3 = smov [#allocation6]   ;;  %s26_s12 = int_to_ptr.vmem [resolvable:$true] %s25_s12 }
   0x7   :  { %28 = dma.hbm_to_vmem [thread:$0]  %s24_s8, 16, %s26_s12, [#allocation3]  }
   0x8   :  { %s53_s16 = sshll.u32 %s7141_s3, 4  ;;  %s54_s16 = int_to_ptr.vmem [resolvable:$true] %s53_s16 }
   0x9   :  { %56 = dma.hbm_to_vmem [thread:$0]  %s52_s15, 128, %s54_s16, [#allocation5]  }
   0xa   :  { %7133 = dma.done.wait [#allocation3], 16  }
   0xb   :  { %7134 = vsyncadd [#allocation3], 4294967280 }
   0xc   :  { %7135 = dma.done.wait [#allocation5], 36992  }
   0xd   :  { %7136 = vsyncadd [#allocation5], 4294930304  ;;  %v6752_v0 = vld [vmem:[%s9273_s1 + $0x8] sm:$0xff]  ;;  %v6751_v1 = vld [vmem:[%s9273_s1] sm:$0xff]  ;;  %vm314_vm0 = vcmask 261120   ;;  %vm4088_vm1 = vcmask 130048  }
   0xe   :  { %417 = vmatpush.bf16.msra.mxu0 %v6752_v0  ;;  %7051 = vmatpush.bf16.msra.mxu3 %v6752_v0  ;;  %v6719_v2 = vld [vmem:[%s9272_s0] sm:$0xff]  ;;  %v6720_v3 = vld [vmem:[%s9272_s0 + $0x8] sm:$0xff]  ;;  %v6721_v4 = vld [vmem:[%s9272_s0 + $0x10] sm:$0xff] }
   0xf   :  { %7050 = vmatpush.bf16.msra.mxu2 %v6752_v0  ;;  %v6722_v5 = vld [vmem:[%s9272_s0 + $0x18] sm:$0xff]  ;;  %v6723_v6 = vld [vmem:[%s9272_s0 + $0x20] sm:$0xff]  ;;  %v6724_v7 = vld [vmem:[%s9272_s0 + $0x28] sm:$0xff] }
  0x10   :  { %v6725_v8 = vld [vmem:[%s9272_s0 + $0x30] sm:$0xff]  ;;  %v6726_v9 = vld [vmem:[%s9272_s0 + $0x38] sm:$0xff]  ;;  %v6727_v10 = vld [vmem:[%s9272_s0 + $0x40] sm:$0xff] }
  0x11   :  { %v7232_v12 = vld [vmem:[#allocation2] ss:$0 sm:$0xff]  ;;  %v6728_v19 = vld [vmem:[%s9272_s0 + $0x48] sm:$0xff]  ;;  %v6729_v27 = vld [vmem:[%s9272_s0 + $0x50] sm:$0xff] }
  0x12   :  { %418 = vmatpush.bf16.msra.mxu0 %v6751_v1  ;;  %7053 = vmatpush.bf16.msra.mxu3 %v6751_v1  ;;  %v6730_v35 = vld [vmem:[%s9272_s0 + $0x58] sm:$0xff]  ;;  %v6748_v42 = vld [vmem:[%s9272_s0 + $0xe8] sm:$0xff]  ;;  %v6731_v44 = vld [vmem:[%s9272_s0 + $0x60] sm:$0xff] }
  0x13   :  { %7052 = vmatpush.bf16.msra.mxu2 %v6751_v1  ;;  %v6749_v47 = vld [vmem:[%s9272_s0 + $0xf0] sm:$0xff]  ;;  %v6732_v48 = vld [vmem:[%s9272_s0 + $0x68] sm:$0xff]  ;;  %v6750_v51 = vld [vmem:[%s9272_s0 + $0xf8] sm:$0xff] }
  0x14   :  { %v6733_v52 = vld [vmem:[%s9272_s0 + $0x70] sm:$0xff]  ;;  %v6734_v55 = vld [vmem:[%s9272_s0 + $0x78] sm:$0xff] }
  0x15   :  { %5427 = vmatmul.msk.bf16.vlgmr.msra.gmra.mxu0 %vm314_vm0, %v6719_v2  ;;  %5456 = vmatmul.msk.bf16.vlgmr.msra.gmra.mxu3 %vm314_vm0, %v6748_v42 }
  0x25   :  { %5428 = vmatmul.msk.bf16.gmra.mxu0 %vm314_vm0, %v6720_v3  ;;  %5457 = vmatmul.msk.bf16.gmra.mxu3 %vm314_vm0, %v6749_v47 }
  0x35   :  { %5429 = vmatmul.msk.bf16.gmra.mxu0 %vm314_vm0, %v6721_v4  ;;  %5458 = vmatmul.msk.bf16.gmra.mxu3 %vm314_vm0, %v6750_v51 }
  0x45   :  { %5430 = vmatmul.msk.bf16.gmra.mxu0 %vm314_vm0, %v6722_v5  ;;  %v6735_v5 = vld [vmem:[%s9272_s0 + $0x80] sm:$0xff] }
  0x55   :  { %5431 = vmatmul.msk.bf16.gmra.mxu0 %vm314_vm0, %v6723_v6 }
  0x65   :  { %5432 = vmatmul.msk.bf16.gmra.mxu0 %vm314_vm0, %v6724_v7 }
  0x75   :  { %5433 = vmatmul.msk.bf16.gmra.mxu0 %vm314_vm0, %v6725_v8 }
  0x85   :  { %5434 = vmatmul.msk.bf16.gmra.mxu0 %vm314_vm0, %v6726_v9 }
  0x92   :  { %v420_v11 = vpop.f32.mrf.mxu0 }
  0x93   :  { %v421_v13 = vadd.f32 %v7232_v12, %v420_v11 }
  0x95   :  { %5435 = vmatmul.msk.bf16.gmra.mxu0 %vm314_vm0, %v6727_v10  ;;  %v580_v16 = vmax.f32 %v421_v13, 0.0 }
  0x9a   :  { %v422_v14 = vpop.f32.mrf.mxu0 }
  0x9b   :  { %v423_v15 = vadd.f32 %v7232_v12, %v422_v14 }
  0x9d   :  { %v581_v17 = vmax.f32 %v423_v15, 0.0 }
  0x9f   :  { %v7237_v18 = vpack.c.bf16 %v581_v17, %v580_v16 }
  0xa2   :  { %v425_v20 = vpop.f32.mrf.mxu0 }
  0xa3   :  { %v426_v21 = vadd.f32 %v7232_v12, %v425_v20 }
  0xa5   :  { %5436 = vmatmul.msk.bf16.gmra.mxu0 %vm314_vm0, %v6728_v19  ;;  %v582_v24 = vmax.f32 %v426_v21, 0.0 }
  0xaa   :  { %v427_v22 = vpop.f32.mrf.mxu0 }
  0xab   :  { %v428_v23 = vadd.f32 %v7232_v12, %v427_v22 }
  0xad   :  { %v583_v25 = vmax.f32 %v428_v23, 0.0 }
  0xaf   :  { %v7245_v26 = vpack.c.bf16 %v583_v25, %v582_v24  ;;  %v6736_v24 = vld [vmem:[%s9272_s0 + $0x88] sm:$0xff] }
  0xb2   :  { %v430_v28 = vpop.f32.mrf.mxu0 }
  0xb3   :  { %v431_v29 = vadd.f32 %v7232_v12, %v430_v28  ;;  %v5461_v28 = vld [vmem:[#allocation4] sm:$0xf] }
  0xb5   :  { %5437 = vmatmul.msk.bf16.gmra.mxu0 %vm314_vm0, %v6729_v27  ;;  %v584_v32 = vmax.f32 %v431_v29, 0.0  ;;  %v6755_v29 = vld [vmem:[#allocation4 + $0xc] sm:$0xf0] }
  0xba   :  { %v432_v30 = vpop.f32.mrf.mxu0 }
  0xbb   :  { %v433_v31 = vadd.f32 %v7232_v12, %v432_v30 }
  0xbd   :  { %v585_v33 = vmax.f32 %v433_v31, 0.0 }
  0xbf   :  { %v7253_v34 = vpack.c.bf16 %v585_v33, %v584_v32  ;;  %v5462_v32 = vor.u32 %v6755_v29, %v5461_v28 }
  0xc2   :  { %v435_v36 = vpop.f32.mrf.mxu0 }
  0xc3   :  { %v436_v37 = vadd.f32 %v7232_v12, %v435_v36 }
  0xc5   :  { %5438 = vmatmul.msk.bf16.gmra.mxu0 %vm314_vm0, %v6730_v35  ;;  %v586_v40 = vmax.f32 %v436_v37, 0.0 }
  0xca   :  { %v437_v38 = vpop.f32.mrf.mxu0 }
  0xcb   :  { %v438_v39 = vadd.f32 %v7232_v12, %v437_v38  ;;  %v5477_v38 = vld [vmem:[#allocation4 + $0x20] sm:$0xf] }
  0xcd   :  { %v587_v41 = vmax.f32 %v438_v39, 0.0  ;;  %v6759_v39 = vld [vmem:[#allocation4 + $0x2c] sm:$0xf0] }
  0xce   :  { %v5478_v42 = vor.u32 %v6759_v39, %v5477_v38  ;;  %v5557_v39 = vld [vmem:[#allocation4 + $0xc0] sm:$0xf] }
  0xcf   :  { %v647_v43 = vpack.c.bf16 %v587_v41, %v586_v40 }
  0xd2   :  { %v440_v45 = vpop.f32.mrf.mxu0 }
  0xd3   :  { %v441_v10 = vadd.f32 %v7232_v12, %v440_v45  ;;  %v6738_v45 = vld [vmem:[%s9272_s0 + $0x98] sm:$0xff] }
  0xd5   :  { %5439 = vmatmul.msk.bf16.gmra.mxu0 %vm314_vm0, %v6731_v44  ;;  %v588_v15 = vmax.f32 %v441_v10, 0.0 }
  0xda   :  { %v442_v46 = vpop.f32.mrf.mxu0 }
  0xdb   :  { %v443_v7 = vadd.f32 %v7232_v12, %v442_v46 }
  0xdd   :  { %v589_v13 = vmax.f32 %v443_v7, 0.0 }
  0xdf   :  { %v648_v20 = vpack.c.bf16 %v589_v13, %v588_v15  ;;  %v5541_v13 = vld [vmem:[#allocation4 + $0xa0] sm:$0xf] }
  0xe2   :  { %v445_v49 = vpop.f32.mrf.mxu0 }
  0xe3   :  { %v446_v3 = vadd.f32 %v7232_v12, %v445_v49  ;;  %v6763_v49 = vld [vmem:[#allocation4 + $0x4c] sm:$0xf0] }
  0xe5   :  { %5440 = vmatmul.msk.bf16.gmra.mxu0 %vm314_vm0, %v6732_v48  ;;  %v590_v11 = vmax.f32 %v446_v3, 0.0  ;;  %v5493_v48 = vld [vmem:[#allocation4 + $0x40] sm:$0xf] }
  0xe6   :  { %v5525_v3 = vld [vmem:[#allocation4 + $0x80] sm:$0xf] }
  0xea   :  { %v447_v50 = vpop.f32.mrf.mxu0 }
  0xeb   :  { %v448_v0 = vadd.f32 %v7232_v12, %v447_v50 }
  0xed   :  { %v591_v8 = vmax.f32 %v448_v0, 0.0  ;;  %v6740_v0 = vld [vmem:[%s9272_s0 + $0xa8] sm:$0xff] }
  0xef   :  { %v649_v14 = vpack.c.bf16 %v591_v8, %v590_v11  ;;  %v6746_v8 = vld [vmem:[%s9272_s0 + $0xd8] sm:$0xff] }
  0xf0   :  { %5454 = vmatmul.msk.bf16.vlgmr.msra.gmra.mxu2 %vm314_vm0, %v6746_v8  ;;  %v5589_v8 = vld [vmem:[#allocation4 + $0x100] sm:$0xf] }
  0xf2   :  { %v450_v53 = vpop.f32.mrf.mxu0 }
  0xf3   :  { %v451_v61 = vadd.f32 %v7232_v12, %v450_v53 }
  0xf5   :  { %5441 = vmatmul.msk.bf16.gmra.mxu0 %vm314_vm0, %v6733_v52  ;;  %v592_v4 = vmax.f32 %v451_v61, 0.0  ;;  %v5494_v52 = vor.u32 %v6763_v49, %v5493_v48 }
  0xfa   :  { %v452_v54 = vpop.f32.mrf.mxu0 }
  0xfb   :  { %v453_v59 = vadd.f32 %v7232_v12, %v452_v54 }
  0xfd   :  { %v593_v1 = vmax.f32 %v453_v59, 0.0  ;;  %v5509_v59 = vld [vmem:[#allocation4 + $0x60] sm:$0xf] }
  0xff   :  { %v650_v9 = vpack.c.bf16 %v593_v1, %v592_v4  ;;  %v6771_v4 = vld [vmem:[#allocation4 + $0x8c] sm:$0xf0] }
 0x102   :  { %v455_v56 = vpop.f32.mrf.mxu0 }
 0x103   :  { %v456_v57 = vadd.f32 %v7232_v12, %v455_v56  ;;  %v6739_v56 = vld [vmem:[%s9272_s0 + $0xa0] sm:$0xff] }
 0x105   :  { %5442 = vmatmul.msk.bf16.gmra.mxu0 %vm314_vm0, %v6734_v55  ;;  %v594_v62 = vmax.f32 %v456_v57, 0.0 }
 0x10a   :  { %v457_v58 = vpop.f32.mrf.mxu0 }
 0x10b   :  { %v458_v60 = vadd.f32 %v7232_v12, %v457_v58  ;;  %v565_v58 = vpop.f32.mrf.mxu3 }
 0x10d   :  { %v595_v63 = vmax.f32 %v458_v60, 0.0  ;;  %v6767_v60 = vld [vmem:[#allocation4 + $0x6c] sm:$0xf0] }
 0x10f   :  { %v651_v2 = vpack.c.bf16 %v595_v63, %v594_v62  ;;  %v5510_v62 = vor.u32 %v6767_v60, %v5509_v59 }
 0x111   :  { %2404 = vmatpush.bf16.msra.mxu1 %v651_v2 }
 0x112   :  { %v460_v6 = vpop.f32.mrf.mxu0 }
 0x113   :  { %v461_v16 = vadd.f32 %v7232_v12, %v460_v6  ;;  %v567_v63 = vpop.f32.mrf.mxu3  ;;  %v5526_v6 = vor.u32 %v6771_v4, %v5525_v3  ;;  %v5573_v3 = vld [vmem:[#allocation4 + $0xe0] sm:$0xf]  ;;  %v6783_v4 = vld [vmem:[#allocation4 + $0xec] sm:$0xf0] }
 0x115   :  { %5443 = vmatmul.msk.bf16.gmra.mxu0 %vm314_vm0, %v6735_v5  ;;  %2405 = vmatpush.bf16.msra.mxu1 %v650_v9  ;;  %v596_v21 = vmax.f32 %v461_v16, 0.0  ;;  %v6741_v9 = vld [vmem:[%s9272_s0 + $0xb0] sm:$0xff] }
 0x119   :  { %2406 = vmatpush.bf16.msra.mxu1 %v649_v14  ;;  %v6775_v14 = vld [vmem:[#allocation4 + $0xac] sm:$0xf0] }
 0x11a   :  { %v462_v17 = vpop.f32.mrf.mxu0  ;;  %v5542_v16 = vor.u32 %v6775_v14, %v5541_v13 }
 0x11b   :  { %v463_v19 = vadd.f32 %v7232_v12, %v462_v17  ;;  %v570_v2 = vpop.f32.mrf.mxu3 }
 0x11d   :  { %v597_v22 = vmax.f32 %v463_v19, 0.0  ;;  %2407 = vmatpush.bf16.msra.mxu1 %v648_v20  ;;  %v6747_v20 = vld [vmem:[%s9272_s0 + $0xe0] sm:$0xff] }
 0x11e   :  { %5455 = vmatmul.msk.bf16.gmra.mxu2 %vm314_vm0, %v6747_v20  ;;  %v6757_v20 = vld [vmem:[#allocation4 + $0x24] sm:$0xf] }
 0x11f   :  { %v7303_v23 = vpack.c.bf16 %v597_v22, %v596_v21  ;;  %v571_v22 = vadd.f32 %v7232_v12, %v570_v2 }
 0x121   :  { %2408 = vmatpush.bf16.msra.mxu1 %v647_v43 }
 0x122   :  { %v465_v25 = vpop.f32.mrf.mxu0 }
 0x123   :  { %v466_v27 = vadd.f32 %v7232_v12, %v465_v25  ;;  %v572_v7 = vpop.f32.mrf.mxu3  ;;  %v6742_v25 = vld [vmem:[%s9272_s0 + $0xb8] sm:$0xff] }
 0x125   :  { %5444 = vmatmul.msk.bf16.gmra.mxu0 %vm314_vm0, %v6736_v24  ;;  %2409 = vmatpush.bf16.msra.mxu1 %v7253_v34  ;;  %v598_v33 = vmax.f32 %v466_v27, 0.0  ;;  %v6737_v34 = vld [vmem:[%s9272_s0 + $0x90] sm:$0xff]  ;;  %v573_v24 = vadd.f32 %v7232_v12, %v572_v7  ;;  %v5574_v7 = vor.u32 %v6783_v4, %v5573_v3 }
 0x126   :  { %v5543_v3 = vld [vmem:[#allocation4 + $0xb0] sm:$0xf0] }
 0x129   :  { %2410 = vmatpush.bf16.msra.mxu1 %v7245_v26 }
 0x12a   :  { %v467_v30 = vpop.f32.mrf.mxu0 }
 0x12b   :  { %v468_v31 = vadd.f32 %v7232_v12, %v467_v30  ;;  %v575_v11 = vpop.f32.mrf.mxu3  ;;  %v640_v30 = vmax.f32 %v571_v22, 0.0 }
 0x12c   :  { %v576_v17 = vadd.f32 %v7232_v12, %v575_v11  ;;  %v5463_v11 = vld [vmem:[#allocation4 + $0x10] sm:$0xf0] }
 0x12d   :  { %v599_v35 = vmax.f32 %v468_v31, 0.0  ;;  %2411 = vmatpush.bf16.msra.mxu1 %v7237_v18  ;;  %v641_v31 = vmax.f32 %v573_v24, 0.0 }
 0x12e   :  { %v642_v27 = vmax.f32 %v576_v17, 0.0  ;;  %v5605_v17 = vld [vmem:[#allocation4 + $0x120] sm:$0xf] }
 0x12f   :  { %v7314_v36 = vpack.c.bf16 %v599_v35, %v598_v33  ;;  %v568_v33 = vadd.f32 %v7232_v12, %v567_v63 }
 0x130   :  { %2412 = vmatmul.bf16.vlgmr.msra.gmra.mxu1 %v5462_v32  ;;  %v566_v32 = vadd.f32 %v7232_v12, %v565_v58 }
 0x132   :  { %v470_v37 = vpop.f32.mrf.mxu0 }
 0x133   :  { %v471_v26 = vadd.f32 %v7232_v12, %v470_v37  ;;  %v577_v19 = vpop.f32.mrf.mxu3  ;;  %v638_v37 = vmax.f32 %v566_v32, 0.0  ;;  %v5495_v32 = vld [vmem:[#allocation4 + $0x50] sm:$0xf0] }
 0x134   :  { %v578_v21 = vadd.f32 %v7232_v12, %v577_v19  ;;  %v6791_v19 = vld [vmem:[#allocation4 + $0x12c] sm:$0xf0] }
 0x135   :  { %5445 = vmatmul.msk.bf16.gmra.mxu0 %vm314_vm0, %v6737_v34  ;;  %v600_v43 = vmax.f32 %v471_v26, 0.0  ;;  %v674_v34 = vpack.c.bf16 %v641_v31, %v640_v30  ;;  %v639_v26 = vmax.f32 %v568_v33, 0.0  ;;  %v5606_v24 = vor.u32 %v6791_v19, %v5605_v17  ;;  %v6795_v30 = vld [vmem:[#allocation4 + $0x14c] sm:$0xf0]  ;;  %v6761_v31 = vld [vmem:[#allocation4 + $0x44] sm:$0xf] }
 0x136   :  { %v643_v28 = vmax.f32 %v578_v21, 0.0  ;;  %v5479_v21 = vld [vmem:[#allocation4 + $0x30] sm:$0xf0]  ;;  %v6777_v17 = vld [vmem:[#allocation4 + $0xc4] sm:$0xf] }
 0x137   :  { %v673_v48 = vpack.c.bf16 %v639_v26, %v638_v37  ;;  %v5559_v19 = vld [vmem:[#allocation4 + $0xd0] sm:$0xf0] }
 0x138   :  { %v675_v35 = vpack.c.bf16 %v643_v28, %v642_v27 }
 0x13a   :  { %v472_v40 = vpop.f32.mrf.mxu0  ;;  %3511 = vmatpush.bf16.msrb.mxu0 %v675_v35 }
 0x13b   :  { %v473_v41 = vadd.f32 %v7232_v12, %v472_v40  ;;  %v6779_v40 = vld [vmem:[#allocation4 + $0xcc] sm:$0xf0] }
 0x13d   :  { %v601_v18 = vmax.f32 %v473_v41, 0.0 }
 0x13e   :  { %3512 = vmatpush.bf16.msrb.mxu0 %v674_v34  ;;  %v5498_v34 = vor.u32 %v6761_v31, %v5495_v32 }
 0x13f   :  { %v7322_v44 = vpack.c.bf16 %v601_v18, %v600_v43  ;;  %v5558_v18 = vor.u32 %v6779_v40, %v5557_v39  ;;  %v5637_v39 = vld [vmem:[#allocation4 + $0x160] sm:$0xf]  ;;  %v6799_v40 = vld [vmem:[#allocation4 + $0x16c] sm:$0xf0] }
 0x140   :  { %2417 = vmatmul.bf16.gmra.mxu1 %v5478_v42 }
 0x142   :  { %v475_v46 = vpop.f32.mrf.mxu0  ;;  %3513 = vmatpush.bf16.msrb.mxu0 %v673_v48 }
 0x143   :  { %v476_v47 = vadd.f32 %v7232_v12, %v475_v46 }
 0x145   :  { %5446 = vmatmul.msk.bf16.gmra.mxu0 %vm314_vm0, %v6738_v45  ;;  %v602_v53 = vmax.f32 %v476_v47, 0.0 }
 0x14a   :  { %v477_v50 = vpop.f32.mrf.mxu0 }
 0x14b   :  { %v478_v51 = vadd.f32 %v7232_v12, %v477_v50 }
 0x14d   :  { %v603_v54 = vmax.f32 %v478_v51, 0.0 }
 0x14f   :  { %v7330_v55 = vpack.c.bf16 %v603_v54, %v602_v53  ;;  %v6743_v54 = vld [vmem:[%s9272_s0 + $0xc0] sm:$0xff] }
 0x150   :  { %2422 = vmatmul.bf16.gmra.mxu1 %v5494_v52 }
 0x152   :  { %v7335_v57 = vpop.f32.mrf.mxu0 }
 0x155   :  { %5447 = vmatmul.msk.bf16.gmra.mxu0 %vm314_vm0, %v6739_v56 }
 0x15a   :  { %v7338_v61 = vpop.f32.mrf.mxu0 }
 0x15b   :  { %v483_v58 = vadd.f32 %v7232_v12, %v7338_v61 }
 0x160   :  { %2427 = vmatmul.bf16.gmra.mxu1 %v5510_v62  ;;  %v481_v62 = vadd.f32 %v7232_v12, %v7335_v57  ;;  %v6744_v57 = vld [vmem:[%s9272_s0 + $0xc8] sm:$0xff] }
 0x162   :  { %v485_v1 = vpop.f32.mrf.mxu0  ;;  %v604_v2 = vmax.f32 %v481_v62, 0.0 }
 0x163   :  { %v486_v52 = vadd.f32 %v7232_v12, %v485_v1 }
 0x165   :  { %5448 = vmatmul.msk.bf16.gmra.mxu0 %vm314_vm0, %v6740_v0  ;;  %v606_v63 = vmax.f32 %v486_v52, 0.0  ;;  %v605_v0 = vmax.f32 %v483_v58, 0.0  ;;  %v5527_v52 = vld [vmem:[#allocation4 + $0x90] sm:$0xf0] }
 0x16a   :  { %v487_v5 = vpop.f32.mrf.mxu0 }
 0x16b   :  { %v488_v49 = vadd.f32 %v7232_v12, %v487_v5 }
 0x16d   :  { %v607_v59 = vmax.f32 %v488_v49, 0.0  ;;  %v5653_v49 = vld [vmem:[#allocation4 + $0x180] sm:$0xf] }
 0x16f   :  { %v657_v1 = vpack.c.bf16 %v607_v59, %v606_v63 }
 0x170   :  { %2432 = vmatmul.bf16.gmra.mxu1 %v5526_v6  ;;  %v656_v6 = vpack.c.bf16 %v605_v0, %v604_v2  ;;  %v5669_v0 = vld [vmem:[#allocation4 + $0x1a0] sm:$0xf]  ;;  %v6773_v2 = vld [vmem:[#allocation4 + $0xa4] sm:$0xf] }
 0x172   :  { %v490_v10 = vpop.f32.mrf.mxu0 }
 0x173   :  { %v491_v45 = vadd.f32 %v7232_v12, %v490_v10  ;;  %v6753_v10 = vld [vmem:[#allocation4 + $0x4] sm:$0xf]  ;;  %v555_v62 = vpop.f32.mrf.mxu2 }
 0x175   :  { %5449 = vmatmul.msk.bf16.gmra.mxu0 %vm314_vm0, %v6741_v9  ;;  %v608_v53 = vmax.f32 %v491_v45, 0.0  ;;  %v6787_v9 = vld [vmem:[#allocation4 + $0x10c] sm:$0xf0] }
 0x176   :  { %v5590_v14 = vor.u32 %v6787_v9, %v5589_v8 }
 0x17a   :  { %v492_v15 = vpop.f32.mrf.mxu0 }
 0x17b   :  { %v493_v42 = vadd.f32 %v7232_v12, %v492_v15 }
 0x17d   :  { %v609_v50 = vmax.f32 %v493_v42, 0.0  ;;  %v5511_v42 = vld [vmem:[#allocation4 + $0x70] sm:$0xf0] }
 0x17f   :  { %v658_v60 = vpack.c.bf16 %v609_v50, %v608_v53  ;;  %v6803_v50 = vld [vmem:[#allocation4 + $0x18c] sm:$0xf0] }
 0x180   :  { %2437 = vmatmul.bf16.gmra.mxu1 %v5542_v16 }
 0x182   :  { %v495_v29 = vpop.f32.mrf.mxu0 }
 0x183   :  { %v496_v38 = vadd.f32 %v7232_v12, %v495_v29  ;;  %v5621_v29 = vld [vmem:[#allocation4 + $0x140] sm:$0xf] }
 0x184   :  { %v5622_v35 = vor.u32 %v6795_v30, %v5621_v29  ;;  %v5562_v30 = vor.u32 %v6777_v17, %v5559_v19 }
 0x185   :  { %5450 = vmatmul.msk.bf16.gmra.mxu0 %vm314_vm0, %v6742_v25  ;;  %v610_v46 = vmax.f32 %v496_v38, 0.0 }
 0x18a   :  { %v497_v41 = vpop.f32.mrf.mxu0 }
 0x18b   :  { %v498_v43 = vadd.f32 %v7232_v12, %v497_v41  ;;  %v6765_v41 = vld [vmem:[#allocation4 + $0x64] sm:$0xf] }
 0x18c   :  { %v5514_v45 = vor.u32 %v6765_v41, %v5511_v42 }
 0x18d   :  { %v611_v47 = vmax.f32 %v498_v43, 0.0 }
 0x18f   :  { %v659_v51 = vpack.c.bf16 %v611_v47, %v610_v46 }
 0x190   :  { %2442 = vmatmul.bf16.gmra.mxu1 %v5558_v18  ;;  %v5638_v18 = vor.u32 %v6799_v40, %v5637_v39 }
 0x191   :  { %2773 = vmatpush.bf16.msrb.mxu2 %v659_v51  ;;  %v6769_v51 = vld [vmem:[#allocation4 + $0x84] sm:$0xf] }
 0x192   :  { %v7375_v56 = vpop.f32.mrf.mxu0  ;;  %v5530_v58 = vor.u32 %v6769_v51, %v5527_v52 }
 0x195   :  { %5451 = vmatmul.msk.bf16.gmra.mxu0 %vm314_vm0, %v6743_v54  ;;  %2774 = vmatpush.bf16.msrb.mxu2 %v658_v60  ;;  %v5654_v54 = vor.u32 %v6803_v50, %v5653_v49 }
 0x199   :  { %2775 = vmatpush.bf16.msrb.mxu2 %v657_v1  ;;  %v6807_v1 = vld [vmem:[#allocation4 + $0x1ac] sm:$0xf0] }
 0x19a   :  { %v7382_v5 = vpop.f32.mrf.mxu0 }
 0x19d   :  { %2776 = vmatpush.bf16.msrb.mxu2 %v656_v6  ;;  %v557_v6 = vpop.f32.mrf.mxu2 }
 0x1a0   :  { %2447 = vmatmul.bf16.gmra.mxu1 %v5574_v7  ;;  %v5670_v7 = vor.u32 %v6807_v1, %v5669_v0  ;;  %v556_v0 = vadd.f32 %v7232_v12, %v555_v62  ;;  %v558_v1 = vadd.f32 %v7232_v12, %v557_v6  ;;  %v6815_v62 = vld [vmem:[#allocation4 + $0x1ec] sm:$0xf0]  ;;  %v6781_v6 = vld [vmem:[#allocation4 + $0xe4] sm:$0xf] }
 0x1a1   :  { %2777 = vmatpush.bf16.msrb.mxu2 %v7330_v55  ;;  %v5466_v55 = vor.u32 %v6753_v10, %v5463_v11 }
 0x1a2   :  { %v7388_v61 = vpop.f32.mrf.mxu0 }
 0x1a5   :  { %5452 = vmatmul.msk.bf16.gmra.mxu0 %vm314_vm0, %v6744_v57  ;;  %2778 = vmatpush.bf16.msrb.mxu2 %v7322_v44  ;;  %v6745_v44 = vld [vmem:[%s9272_s0 + $0xd0] sm:$0xff]  ;;  %v5546_v57 = vor.u32 %v6773_v2, %v5543_v3  ;;  %v560_v10 = vpop.f32.mrf.mxu2 }
 0x1a6   :  { %v561_v39 = vadd.f32 %v7232_v12, %v560_v10  ;;  %v635_v10 = vmax.f32 %v558_v1, 0.0 }
 0x1a8   :  { %v636_v50 = vmax.f32 %v561_v39, 0.0 }
 0x1a9   :  { %2779 = vmatpush.bf16.msrb.mxu2 %v7314_v36 }
 0x1aa   :  { %v7393_v13 = vpop.f32.mrf.mxu0 }
 0x1ad   :  { %v7395_v15 = vpop.f32.mrf.mxu1  ;;  %2780 = vmatpush.bf16.msrb.mxu2 %v7303_v23  ;;  %v5482_v23 = vor.u32 %v6757_v20, %v5479_v21  ;;  %v562_v31 = vpop.f32.mrf.mxu2 }
 0x1ae   :  { %v563_v40 = vadd.f32 %v7232_v12, %v562_v31 }
 0x1b0   :  { %2452 = vmatmul.bf16.gmra.mxu1 %v5590_v14  ;;  %2781 = vmatmul.bf16.vlgmr.msrb.gmra.mxu2 %v5466_v55  ;;  %v5685_v14 = vld [vmem:[#allocation4 + $0x1c0] sm:$0xf]  ;;  %v637_v51 = vmax.f32 %v563_v40, 0.0 }
 0x1b2   :  { %v7401_v16 = vpop.f32.mrf.mxu0  ;;  %v672_v3 = vpack.c.bf16 %v637_v51, %v636_v50  ;;  %v5717_v51 = vld [vmem:[#allocation4 + $0x200] sm:$0xf] }
 0x1b4   :  { %3514 = vmatpush.bf16.msrb.mxu0 %v672_v3 }
 0x1b5   :  { %5453 = vmatmul.msk.bf16.gmra.mxu0 %vm314_vm0, %v6745_v44  ;;  %v7404_v36 = vpop.f32.mrf.mxu1  ;;  %v6811_v44 = vld [vmem:[#allocation4 + $0x1cc] sm:$0xf0] }
 0x1b6   :  { %v5686_v29 = vor.u32 %v6811_v44, %v5685_v14  ;;  %v5701_v14 = vld [vmem:[#allocation4 + $0x1e0] sm:$0xf] }
 0x1ba   :  { %v7406_v22 = vpop.f32.mrf.mxu0 }
 0x1bb   :  { %v513_v17 = vadd.f32 %v7232_v12, %v7406_v22  ;;  %v506_v22 = vadd.f32 %v7232_v12, %v7388_v61  ;;  %v6819_v61 = vld [vmem:[#allocation4 + $0x20c] sm:$0xf0] }
 0x1bc   :  { %v5718_v1 = vor.u32 %v6819_v61, %v5717_v51  ;;  %v6827_v51 = vld [vmem:[#allocation4 + $0x24c] sm:$0xf0]  ;;  %v6793_v61 = vld [vmem:[#allocation4 + $0x144] sm:$0xf] }
 0x1bd   :  { %v7408_v25 = vpop.f32.mrf.mxu1  ;;  %v617_v31 = vmax.f32 %v513_v17, 0.0  ;;  %v5485_v17 = vld [vmem:[#allocation4 + $0x28] sm:$0xf] }
 0x1c0   :  { %2457 = vmatmul.bf16.gmra.mxu1 %v5606_v24  ;;  %2786 = vmatmul.bf16.gmra.mxu2 %v5482_v23 }
 0x1c2   :  { %v7410_v27 = vpop.f32.mrf.mxu0 }
 0x1c5   :  { %v7412_v28 = vpop.f32.mrf.mxu1 }
 0x1ca   :  { %v7414_v33 = vpop.f32.mrf.mxu0 }
 0x1cd   :  { %v7416_v37 = vpop.f32.mrf.mxu1 }
 0x1d0   :  { %2462 = vmatmul.bf16.gmra.mxu1 %v5622_v35  ;;  %2791 = vmatmul.bf16.gmra.mxu2 %v5498_v34 }
 0x1d2   :  { %v7418_v26 = vpop.f32.mrf.mxu0 }
 0x1d5   :  { %v7420_v38 = vpop.f32.mrf.mxu1 }
 0x1da   :  { %v7422_v43 = vpop.f32.mrf.mxu0 }
 0x1dd   :  { %v7424_v46 = vpop.f32.mrf.mxu1 }
 0x1e0   :  { %2467 = vmatmul.bf16.gmra.mxu1 %v5638_v18  ;;  %2796 = vmatmul.bf16.gmra.mxu2 %v5514_v45 }
 0x1e2   :  { %v525_v47 = vpop.f32.mrf.mxu0 }
 0x1e3   :  { %v526_v45 = vadd.f32 %v7232_v12, %v525_v47 }
 0x1e5   :  { %v7426_v48 = vpop.f32.mrf.mxu1  ;;  %v622_v2 = vmax.f32 %v526_v45, 0.0 }
 0x1ea   :  { %v527_v53 = vpop.f32.mrf.mxu0 }
 0x1eb   :  { %v528_v41 = vadd.f32 %v7232_v12, %v527_v53  ;;  %v521_v53 = vadd.f32 %v7232_v12, %v7418_v26  ;;  %v516_v26 = vadd.f32 %v7232_v12, %v7410_v27  ;;  %v508_v27 = vadd.f32 %v7232_v12, %v7393_v13 }
 0x1ed   :  { %v7428_v59 = vpop.f32.mrf.mxu1  ;;  %v615_v40 = vmax.f32 %v508_v27, 0.0 }
 0x1f0   :  { %2472 = vmatmul.bf16.gmra.mxu1 %v5654_v54  ;;  %2801 = vmatmul.bf16.gmra.mxu2 %v5530_v58  ;;  %v523_v54 = vadd.f32 %v7232_v12, %v7422_v43  ;;  %v623_v58 = vmax.f32 %v528_v41, 0.0  ;;  %v620_v43 = vmax.f32 %v521_v53, 0.0  ;;  %v5469_v53 = vld [vmem:[#allocation4 + $0x8] sm:$0xf] }
 0x1f2   :  { %v530_v60 = vpop.f32.mrf.mxu0 }
 0x1f3   :  { %v531_v23 = vadd.f32 %v7232_v12, %v530_v60 }
 0x1f5   :  { %v7430_v63 = vpop.f32.mrf.mxu1  ;;  %v624_v49 = vmax.f32 %v531_v23, 0.0  ;;  %v511_v23 = vadd.f32 %v7232_v12, %v7401_v16  ;;  %v503_v16 = vadd.f32 %v7232_v12, %v7382_v5  ;;  %v6756_v5 = vld [vmem:[#allocation4 + $0x14] sm:$0xf0] }
 0x1f7   :  { %v613_v45 = vmax.f32 %v503_v16, 0.0 }
 0x1fa   :  { %v532_v4 = vpop.f32.mrf.mxu0 }
 0x1fb   :  { %v533_v21 = vadd.f32 %v7232_v12, %v532_v4  ;;  %v518_v4 = vadd.f32 %v7232_v12, %v7414_v33 }
 0x1fd   :  { %v7432_v8 = vpop.f32.mrf.mxu1  ;;  %v625_v42 = vmax.f32 %v533_v21, 0.0  ;;  %v619_v33 = vmax.f32 %v518_v4, 0.0 }
 0x1ff   :  { %v666_v60 = vpack.c.bf16 %v625_v42, %v624_v49  ;;  %v501_v42 = vadd.f32 %v7232_v12, %v7375_v56  ;;  %v5470_v56 = vor.u32 %v6756_v5, %v5469_v53 }
 0x200   :  { %2477 = vmatmul.bf16.gmra.mxu1 %v5670_v7  ;;  %2806 = vmatmul.bf16.gmra.mxu2 %v5546_v57  ;;  %v621_v7 = vmax.f32 %v523_v54, 0.0  ;;  %v665_v57 = vpack.c.bf16 %v623_v58, %v622_v2  ;;  %v6785_v54 = vld [vmem:[#allocation4 + $0x104] sm:$0xf]  ;;  %v5591_v58 = vld [vmem:[#allocation4 + $0x110] sm:$0xf0] }
 0x201   :  { %v612_v50 = vmax.f32 %v501_v42, 0.0  ;;  %v5594_v2 = vor.u32 %v6785_v54, %v5591_v58  ;;  %v5623_v54 = vld [vmem:[#allocation4 + $0x150] sm:$0xf0]  ;;  %v5501_v58 = vld [vmem:[#allocation4 + $0x48] sm:$0xf] }
 0x202   :  { %v535_v9 = vpop.f32.mrf.mxu0  ;;  %v664_v19 = vpack.c.bf16 %v621_v7, %v620_v43 }
 0x203   :  { %v536_v55 = vadd.f32 %v7232_v12, %v535_v9  ;;  %v634_v9 = vmax.f32 %v556_v0, 0.0  ;;  %v660_v0 = vpack.c.bf16 %v613_v45, %v612_v50  ;;  %v5471_v45 = vld [vmem:[#allocation4 + $0x18] sm:$0xf0]  ;;  %v5749_v50 = vld [vmem:[#allocation4 + $0x240] sm:$0xf] }
 0x204   :  { %v5750_v5 = vor.u32 %v6827_v51, %v5749_v50 }
 0x205   :  { %v7434_v11 = vpop.f32.mrf.mxu1  ;;  %v626_v32 = vmax.f32 %v536_v55, 0.0  ;;  %v5575_v55 = vld [vmem:[#allocation4 + $0xf0] sm:$0xf0] }
 0x206   :  { %v5578_v21 = vor.u32 %v6781_v6, %v5575_v55  ;;  %v5607_v6 = vld [vmem:[#allocation4 + $0x130] sm:$0xf0] }
 0x20a   :  { %v537_v20 = vpop.f32.mrf.mxu0 }
 0x20b   :  { %v538_v24 = vadd.f32 %v7232_v12, %v537_v20  ;;  %v5702_v20 = vor.u32 %v6815_v62, %v5701_v14  ;;  %v6789_v62 = vld [vmem:[#allocation4 + $0x124] sm:$0xf] }
 0x20c   :  { %v5610_v27 = vor.u32 %v6789_v62, %v5607_v6  ;;  %v6797_v62 = vld [vmem:[#allocation4 + $0x164] sm:$0xf]  ;;  %v5639_v6 = vld [vmem:[#allocation4 + $0x170] sm:$0xf0] }
 0x20d   :  { %v627_v35 = vmax.f32 %v538_v24, 0.0  ;;  %v7440_v34 = vpop.f32.mrf.mxu1  ;;  %v671_v24 = vpack.c.bf16 %v635_v10, %v634_v9  ;;  %v5733_v9 = vld [vmem:[#allocation4 + $0x220] sm:$0xf] }
 0x20f   :  { %v667_v18 = vpack.c.bf16 %v627_v35, %v626_v32  ;;  %3515 = vmatpush.bf16.msrb.mxu0 %v671_v24  ;;  %v616_v35 = vmax.f32 %v511_v23, 0.0 }
 0x210   :  { %2482 = vmatmul.bf16.gmra.mxu1 %v5686_v29  ;;  %2811 = vmatmul.bf16.gmra.mxu2 %v5562_v30  ;;  %v618_v29 = vmax.f32 %v516_v26, 0.0  ;;  %v6823_v26 = vld [vmem:[#allocation4 + $0x22c] sm:$0xf0] }
 0x211   :  { %3142 = vmatpush.bf16.msrb.mxu3 %v667_v18  ;;  %v662_v41 = vpack.c.bf16 %v617_v31, %v616_v35  ;;  %v614_v18 = vmax.f32 %v506_v22, 0.0 }
 0x212   :  { %v7446_v52 = vpop.f32.mrf.mxu0  ;;  %v663_v32 = vpack.c.bf16 %v619_v33, %v618_v29  ;;  %v6760_v33 = vld [vmem:[#allocation4 + $0x34] sm:$0xf0]  ;;  %v5734_v29 = vor.u32 %v6823_v26, %v5733_v9  ;;  %v5487_v9 = vld [vmem:[#allocation4 + $0x38] sm:$0xf0]  ;;  %v6831_v26 = vld [vmem:[#allocation4 + $0x26c] sm:$0xf0] }
 0x213   :  { %v661_v49 = vpack.c.bf16 %v615_v40, %v614_v18  ;;  %v541_v24 = vadd.f32 %v7232_v12, %v7446_v52 }
 0x215   :  { %v7454_v47 = vpop.f32.mrf.mxu1  ;;  %3143 = vmatpush.bf16.msrb.mxu3 %v666_v60  ;;  %v628_v40 = vmax.f32 %v541_v24, 0.0 }
 0x219   :  { %3144 = vmatpush.bf16.msrb.mxu3 %v665_v57 }
 0x21a   :  { %v7460_v44 = vpop.f32.mrf.mxu0 }
 0x21b   :  { %v543_v23 = vadd.f32 %v7232_v12, %v7460_v44  ;;  %v6754_v44 = vld [vmem:[#allocation4 + $0xc] sm:$0xf] }
 0x21d   :  { %v7466_v30 = vpop.f32.mrf.mxu1  ;;  %3145 = vmatpush.bf16.msrb.mxu3 %v664_v19 }
 0x220   :  { %2487 = vmatmul.bf16.gmra.mxu1 %v5702_v20  ;;  %2816 = vmatmul.bf16.gmra.mxu2 %v5578_v21 }
 0x221   :  { %3146 = vmatpush.bf16.msrb.mxu3 %v663_v32 }
 0x222   :  { %v545_v39 = vpop.f32.mrf.mxu0 }
 0x223   :  { %v546_v10 = vadd.f32 %v7232_v12, %v545_v39  ;;  %v5486_v39 = vor.u32 %v6760_v33, %v5485_v17  ;;  %v6768_v17 = vld [vmem:[#allocation4 + $0x74] sm:$0xf0] }
 0x225   :  { %v7476_v13 = vpop.f32.mrf.mxu1  ;;  %3147 = vmatpush.bf16.msrb.mxu3 %v662_v41  ;;  %v630_v31 = vmax.f32 %v546_v10, 0.0  ;;  %v629_v41 = vmax.f32 %v543_v23, 0.0 }
 0x229   :  { %3148 = vmatpush.bf16.msrb.mxu3 %v661_v49  ;;  %v5474_v49 = vor.u32 %v6754_v44, %v5471_v45 }
 0x22a   :  { %v547_v60 = vpop.f32.mrf.mxu0 }
 0x22b   :  { %v548_v14 = vadd.f32 %v7232_v12, %v547_v60  ;;  %v6764_v60 = vld [vmem:[#allocation4 + $0x54] sm:$0xf0] }
 0x22d   :  { %v7478_v3 = vpop.f32.mrf.mxu1  ;;  %3149 = vmatpush.bf16.msrb.mxu3 %v660_v0  ;;  %v631_v32 = vmax.f32 %v548_v14, 0.0  ;;  %v5626_v0 = vor.u32 %v6793_v61, %v5623_v54  ;;  %v5765_v14 = vld [vmem:[#allocation4 + $0x260] sm:$0xf]  ;;  %v7043_v54 = vld [vmem:[%s9276_s4 + $0x10] sm:$0xff] }
 0x22e   :  { %v7041_v61 = vld [vmem:[%s9276_s4] sm:$0xff] }
 0x22f   :  { %v669_v42 = vpack.c.bf16 %v631_v32, %v630_v31  ;;  %v6762_v31 = vld [vmem:[#allocation4 + $0x4c] sm:$0xf]  ;;  %v5503_v32 = vld [vmem:[#allocation4 + $0x58] sm:$0xf0]  ;;  %4239 = vmatpush.bf16.msra.mxu2 %v7041_v61 }
 0x230   :  { %2492 = vmatmul.bf16.gmra.mxu1 %v5718_v1  ;;  %2821 = vmatmul.bf16.gmra.mxu2 %v5594_v2  ;;  %v5502_v2 = vor.u32 %v6764_v60, %v5501_v58  ;;  %v7042_v60 = vld [vmem:[%s9276_s4 + $0x8] sm:$0xff] }
 0x231   :  { %3150 = vmatmul.bf16.vlgmr.msrb.gmra.mxu3 %v5470_v56  ;;  %4120 = vmatpush.bf16.msrb.mxu1 %v7042_v60 }
 0x232   :  { %v550_v4 = vpop.f32.mrf.mxu0  ;;  %4358 = vmatpush.bf16.msra.mxu3 %v7043_v54 }
 0x233   :  { %v7480_v7 = vpop.f32.mrf.mxu2  ;;  %v551_v43 = vadd.f32 %v7232_v12, %v550_v4 }
 0x235   :  { %v7482_v57 = vpop.f32.mrf.mxu1  ;;  %v632_v19 = vmax.f32 %v551_v43, 0.0  ;;  %v6758_v43 = vld [vmem:[#allocation4 + $0x2c] sm:$0xf] }
 0x236   :  { %v5490_v10 = vor.u32 %v6758_v43, %v5487_v9  ;;  %v5797_v9 = vld [vmem:[#allocation4 + $0x2a0] sm:$0xf] }
 0x23a   :  { %v552_v55 = vpop.f32.mrf.mxu0 }
 0x23b   :  { %v553_v20 = vadd.f32 %v7232_v12, %v552_v55  ;;  %v7488_v21 = vpop.f32.mrf.mxu2  ;;  %v668_v12 = vpack.c.bf16 %v629_v41, %v628_v40  ;;  %v5517_v55 = vld [vmem:[#allocation4 + $0x68] sm:$0xf]  ;;  %v6801_v40 = vld [vmem:[#allocation4 + $0x184] sm:$0xf]  ;;  %v5655_v41 = vld [vmem:[#allocation4 + $0x190] sm:$0xf0] }
 0x23c   :  { %v5518_v23 = vor.u32 %v6768_v17, %v5517_v55 }
 0x23d   :  { %v633_v22 = vmax.f32 %v553_v20, 0.0  ;;  %v7494_v35 = vpop.f32.mrf.mxu1  ;;  %v5642_v20 = vor.u32 %v6797_v62, %v5639_v6  ;;  %v5549_v62 = vld [vmem:[#allocation4 + $0xa8] sm:$0xf]  ;;  %v6776_v6 = vld [vmem:[#allocation4 + $0xb4] sm:$0xf0] }
 0x23f   :  { %v670_v16 = vpack.c.bf16 %v633_v22, %v632_v19  ;;  %v5766_v19 = vor.u32 %v6831_v26, %v5765_v14  ;;  %v5506_v22 = vor.u32 %v6762_v31, %v5503_v32  ;;  %v6805_v14 = vld [vmem:[#allocation4 + $0x1a4] sm:$0xf]  ;;  %v5671_v26 = vld [vmem:[#allocation4 + $0x1b0] sm:$0xf0] }
 0x240   :  { %2497 = vmatmul.bf16.gmra.mxu1 %v5734_v29  ;;  %2826 = vmatmul.bf16.gmra.mxu2 %v5610_v27 }
 0x241   :  { %3155 = vmatmul.bf16.gmra.mxu3 %v5486_v39  ;;  %3516 = vmatpush.bf16.msrb.mxu0 %v670_v16  ;;  %v5781_v39 = vld [vmem:[#allocation4 + $0x280] sm:$0xf]  ;;  %v6835_v16 = vld [vmem:[#allocation4 + $0x28c] sm:$0xf0] }
 0x242   :  { %v5782_v45 = vor.u32 %v6835_v16, %v5781_v39  ;;  %v5535_v39 = vld [vmem:[#allocation4 + $0x98] sm:$0xf0] }
 0x243   :  { %v7496_v52 = vpop.f32.mrf.mxu2 }
 0x245   :  { %v7498_v18 = vpop.f32.mrf.mxu1  ;;  %3517 = vmatpush.bf16.msrb.mxu0 %v669_v42  ;;  %v5533_v42 = vld [vmem:[#allocation4 + $0x88] sm:$0xf] }
 0x249   :  { %3518 = vmatpush.bf16.msrb.mxu0 %v668_v12  ;;  %v6772_v12 = vld [vmem:[#allocation4 + $0x94] sm:$0xf0] }
 0x24a   :  { %v5534_v51 = vor.u32 %v6772_v12, %v5533_v42  ;;  %v6809_v42 = vld [vmem:[#allocation4 + $0x1c4] sm:$0xf]  ;;  %v5687_v12 = vld [vmem:[#allocation4 + $0x1d0] sm:$0xf0] }
 0x24b   :  { %v7500_v53 = vpop.f32.mrf.mxu2  ;;  %v5690_v54 = vor.u32 %v6809_v42, %v5687_v12 }
 0x24c   :  { %3519 = vmatmul.bf16.vlgmr.msrb.gmra.mxu0 %v5474_v49  ;;  %v5658_v49 = vor.u32 %v6801_v40, %v5655_v41  ;;  %v5813_v40 = vld [vmem:[#allocation4 + $0x2c0] sm:$0xf]  ;;  %v6843_v41 = vld [vmem:[#allocation4 + $0x2cc] sm:$0xf0] }
 0x24d   :  { %v7502_v1 = vpop.f32.mrf.mxu1  ;;  %v5814_v61 = vor.u32 %v6843_v41, %v5813_v40 }
 0x250   :  { %2502 = vmatmul.bf16.gmra.mxu1 %v5750_v5  ;;  %2831 = vmatmul.bf16.gmra.mxu2 %v5626_v0  ;;  %v6766_v0 = vld [vmem:[#allocation4 + $0x6c] sm:$0xf] }
 0x251   :  { %3160 = vmatmul.bf16.gmra.mxu3 %v5502_v2  ;;  %v5519_v2 = vld [vmem:[#allocation4 + $0x78] sm:$0xf0] }
 0x252   :  { %v5522_v43 = vor.u32 %v6766_v0, %v5519_v2 }
 0x253   :  { %v7504_v56 = vpop.f32.mrf.mxu2 }
 0x255   :  { %v7506_v4 = vpop.f32.mrf.mxu1 }
 0x25b   :  { %v7508_v33 = vpop.f32.mrf.mxu2 }
 0x25c   :  { %3524 = vmatmul.bf16.gmra.mxu0 %v5490_v10  ;;  %v6839_v10 = vld [vmem:[#allocation4 + $0x2ac] sm:$0xf0] }
 0x25d   :  { %v7510_v24 = vpop.f32.mrf.mxu1  ;;  %v5798_v17 = vor.u32 %v6839_v10, %v5797_v9  ;;  %v6774_v9 = vld [vmem:[#allocation4 + $0xac] sm:$0xf]  ;;  %v5551_v10 = vld [vmem:[#allocation4 + $0xb8] sm:$0xf0] }
 0x260   :  { %2507 = vmatmul.bf16.gmra.mxu1 %v5766_v19  ;;  %2836 = vmatmul.bf16.gmra.mxu2 %v5642_v20  ;;  %v5674_v19 = vor.u32 %v6805_v14, %v5671_v26  ;;  %v5554_v14 = vor.u32 %v6774_v9, %v5551_v10  ;;  %v5829_v26 = vld [vmem:[#allocation4 + $0x2e0] sm:$0xf]  ;;  %v6817_v9 = vld [vmem:[#allocation4 + $0x204] sm:$0xf]  ;;  %v5719_v10 = vld [vmem:[#allocation4 + $0x210] sm:$0xf0] }
 0x261   :  { %3165 = vmatmul.bf16.gmra.mxu3 %v5518_v23  ;;  %v5550_v23 = vor.u32 %v6776_v6, %v5549_v62  ;;  %v6847_v62 = vld [vmem:[#allocation4 + $0x2ec] sm:$0xf0]  ;;  %v6813_v6 = vld [vmem:[#allocation4 + $0x1e4] sm:$0xf] }
 0x263   :  { %v7512_v29 = vpop.f32.mrf.mxu2 }
 0x265   :  { %v7514_v27 = vpop.f32.mrf.mxu1 }
 0x26b   :  { %v7516_v44 = vpop.f32.mrf.mxu2 }
 0x26c   :  { %3529 = vmatmul.bf16.gmra.mxu0 %v5506_v22  ;;  %v6770_v22 = vld [vmem:[#allocation4 + $0x8c] sm:$0xf] }
 0x26d   :  { %v7518_v50 = vpop.f32.mrf.mxu1  ;;  %v5538_v16 = vor.u32 %v6770_v22, %v5535_v39  ;;  %v5830_v39 = vor.u32 %v6847_v62, %v5829_v26  ;;  %v6788_v26 = vld [vmem:[#allocation4 + $0x114] sm:$0xf0] }
 0x270   :  { %2512 = vmatmul.bf16.gmra.mxu1 %v5782_v45  ;;  %2841 = vmatmul.bf16.gmra.mxu2 %v5658_v49  ;;  %v5565_v45 = vld [vmem:[#allocation4 + $0xc8] sm:$0xf]  ;;  %v6780_v49 = vld [vmem:[#allocation4 + $0xd4] sm:$0xf0] }
 0x271   :  { %3170 = vmatmul.bf16.gmra.mxu3 %v5534_v51  ;;  %v5566_v0 = vor.u32 %v6780_v49, %v5565_v45  ;;  %v6778_v45 = vld [vmem:[#allocation4 + $0xcc] sm:$0xf]  ;;  %v5567_v49 = vld [vmem:[#allocation4 + $0xd8] sm:$0xf0] }
 0x273   :  { %v7526_v58 = vpop.f32.mrf.mxu2 }
 0x275   :  { %v7531_v5 = vpop.f32.mrf.mxu1 }
 0x27b   :  { %v7533_v55 = vpop.f32.mrf.mxu2 }
 0x27c   :  { %3534 = vmatmul.bf16.gmra.mxu0 %v5522_v43 }
 0x27d   :  { %v7535_v20 = vpop.f32.mrf.mxu1 }
 0x280   :  { %2517 = vmatmul.bf16.gmra.mxu1 %v5798_v17  ;;  %2846 = vmatmul.bf16.gmra.mxu2 %v5674_v19  ;;  %v5703_v17 = vld [vmem:[#allocation4 + $0x1f0] sm:$0xf0]  ;;  %v5581_v19 = vld [vmem:[#allocation4 + $0xe8] sm:$0xf] }
 0x281   :  { %3175 = vmatmul.bf16.gmra.mxu3 %v5550_v23  ;;  %v6784_v23 = vld [vmem:[#allocation4 + $0xf4] sm:$0xf0] }
 0x282   :  { %v5582_v41 = vor.u32 %v6784_v23, %v5581_v19 }
 0x283   :  { %v7537_v31 = vpop.f32.mrf.mxu2 }
 0x285   :  { %v7539_v32 = vpop.f32.mrf.mxu1 }
 0x28b   :  { %v7541_v51 = vpop.f32.mrf.mxu2 }
 0x28c   :  { %3539 = vmatmul.bf16.gmra.mxu0 %v5538_v16  ;;  %v5706_v16 = vor.u32 %v6813_v6, %v5703_v17  ;;  %v5722_v17 = vor.u32 %v6817_v9, %v5719_v10  ;;  %v6821_v9 = vld [vmem:[#allocation4 + $0x224] sm:$0xf]  ;;  %v5735_v10 = vld [vmem:[#allocation4 + $0x230] sm:$0xf0] }
 0x28d   :  { %v7543_v60 = vpop.f32.mrf.mxu1 }
 0x28e   :  { %9389 = vst [vmem:[#allocation9_spill] sm:$0xff] %v7543_v60 }
 0x290   :  { %2522 = vmatmul.bf16.gmra.mxu1 %v5814_v61  ;;  %2851 = vmatmul.bf16.gmra.mxu2 %v5690_v54  ;;  %v5570_v61 = vor.u32 %v6778_v45, %v5567_v49  ;;  %v5845_v54 = vld [vmem:[#allocation4 + $0x300] sm:$0xf] }
 0x291   :  { %3180 = vmatmul.bf16.gmra.mxu3 %v5566_v0  ;;  %v6851_v0 = vld [vmem:[#allocation4 + $0x30c] sm:$0xf0] }
 0x292   :  { %v5846_v6 = vor.u32 %v6851_v0, %v5845_v54  ;;  %v5861_v54 = vld [vmem:[#allocation4 + $0x320] sm:$0xf]  ;;  %v6855_v0 = vld [vmem:[#allocation4 + $0x32c] sm:$0xf0] }
 0x293   :  { %v7545_v2 = vpop.f32.mrf.mxu2 }
 0x295   :  { %v7547_v43 = vpop.f32.mrf.mxu1 }
 0x296   :  { %9390 = vst [vmem:[#allocation10_spill] sm:$0xff] %v7547_v43  ;;  %v6786_v43 = vld [vmem:[#allocation4 + $0x10c] sm:$0xf] }
 0x29b   :  { %v7549_v22 = vpop.f32.mrf.mxu2 }
 0x29c   :  { %3544 = vmatmul.bf16.gmra.mxu0 %v5554_v14  ;;  %v5597_v14 = vld [vmem:[#allocation4 + $0x108] sm:$0xf] }
 0x29d   :  { %v7551_v40 = vpop.f32.mrf.mxu1  ;;  %v5598_v23 = vor.u32 %v6788_v26, %v5597_v14  ;;  %v5613_v14 = vld [vmem:[#allocation4 + $0x128] sm:$0xf]  ;;  %v6792_v26 = vld [vmem:[#allocation4 + $0x134] sm:$0xf0] }
 0x29e   :  { %9391 = vst [vmem:[#allocation11_spill] sm:$0xff] %v7551_v40  ;;  %v5583_v40 = vld [vmem:[#allocation4 + $0xf8] sm:$0xf0] }
 0x2a0   :  { %2527 = vmatmul.bf16.gmra.mxu1 %v5830_v39  ;;  %2856 = vmatmul.bf16.gmra.mxu2 %v5706_v16  ;;  %v2783_v39 = vadd.f32 %v7480_v7, %v7395_v15  ;;  %v5862_v7 = vor.u32 %v6855_v0, %v5861_v54  ;;  %v5877_v0 = vld [vmem:[#allocation4 + $0x340] sm:$0xf] }
 0x2a1   :  { %3185 = vmatmul.bf16.gmra.mxu3 %v5582_v41 }
 0x2a3   :  { %v7553_v42 = vpop.f32.mrf.mxu2 }
 0x2a5   :  { %v7555_v12 = vpop.f32.mrf.mxu1 }
 0x2a6   :  { %9392 = vst [vmem:[#allocation12_spill] sm:$0xff] %v7555_v12  ;;  %v6782_v12 = vld [vmem:[#allocation4 + $0xec] sm:$0xf] }
 0x2ab   :  { %v7557_v62 = vpop.f32.mrf.mxu2 }
 0x2ac   :  { %3549 = vmatmul.bf16.gmra.mxu0 %v5570_v61  ;;  %v5586_v61 = vor.u32 %v6782_v12, %v5583_v40  ;;  %v2788_v40 = vadd.f32 %v7496_v52, %v7408_v25  ;;  %v2790_v25 = vadd.f32 %v7500_v53, %v7412_v28 }
 0x2ad   :  { %v7559_v19 = vpop.f32.mrf.mxu1 }
 0x2ae   :  { %9393 = vst [vmem:[#allocation13_spill] sm:$0xff] %v7559_v19 }
 0x2b0   :  { %2532 = vmatmul.bf16.gmra.mxu1 %v5846_v6  ;;  %2861 = vmatmul.bf16.gmra.mxu2 %v5722_v17  ;;  %v2785_v6 = vadd.f32 %v7488_v21, %v7404_v36 }
 0x2b1   :  { %3190 = vmatmul.bf16.gmra.mxu3 %v5598_v23  ;;  %v5738_v23 = vor.u32 %v6821_v9, %v5735_v10  ;;  %v6859_v10 = vld [vmem:[#allocation4 + $0x34c] sm:$0xf0] }
 0x2b3   :  { %v7563_v16 = vpop.f32.mrf.mxu2 }
 0x2b4   :  { %v3151_v41 = vpop.f32.mrf.mxu3 }
 0x2b5   :  { %v3152_v45 = vadd.f32 %v3151_v41, %v2783_v39  ;;  %v7565_v49 = vpop.f32.mrf.mxu1 }
 0x2b6   :  { %9394 = vst [vmem:[#allocation14_spill] sm:$0xff] %v7565_v49  ;;  %v5614_v49 = vor.u32 %v6792_v26, %v5613_v14  ;;  %v5751_v14 = vld [vmem:[#allocation4 + $0x250] sm:$0xf0] }
 0x2bb   :  { %v7569_v17 = vpop.f32.mrf.mxu2 }
 0x2bc   :  { %v3153_v15 = vpop.f32.mrf.mxu3  ;;  %3554 = vmatmul.bf16.gmra.mxu0 %v5586_v61  ;;  %v5599_v61 = vld [vmem:[#allocation4 + $0x118] sm:$0xf0] }
 0x2bd   :  { %v3154_v39 = vadd.f32 %v3153_v15, %v2785_v6  ;;  %v7571_v41 = vpop.f32.mrf.mxu1  ;;  %v5602_v54 = vor.u32 %v6786_v43, %v5599_v61  ;;  %v6825_v6 = vld [vmem:[#allocation4 + $0x244] sm:$0xf]  ;;  %v5629_v15 = vld [vmem:[#allocation4 + $0x148] sm:$0xf] }
 0x2be   :  { %9395 = vst [vmem:[#allocation15_spill] sm:$0xff] %v7571_v41  ;;  %v2793_v41 = vadd.f32 %v7504_v56, %v7416_v37  ;;  %v6863_v37 = vld [vmem:[#allocation4 + $0x36c] sm:$0xf0]  ;;  %v6829_v56 = vld [vmem:[#allocation4 + $0x264] sm:$0xf] }
 0x2c0   :  { %2537 = vmatmul.bf16.gmra.mxu1 %v5862_v7  ;;  %2866 = vmatmul.bf16.gmra.mxu2 %v5738_v23  ;;  %v5754_v23 = vor.u32 %v6825_v6, %v5751_v14  ;;  %v5615_v6 = vld [vmem:[#allocation4 + $0x138] sm:$0xf0] }
 0x2c1   :  { %3195 = vmatmul.bf16.gmra.mxu3 %v5614_v49  ;;  %v6796_v49 = vld [vmem:[#allocation4 + $0x154] sm:$0xf0] }
 0x2c2   :  { %v5630_v43 = vor.u32 %v6796_v49, %v5629_v15  ;;  %v5893_v49 = vld [vmem:[#allocation4 + $0x360] sm:$0xf] }
 0x2c3   :  { %v7575_v12 = vpop.f32.mrf.mxu2 }
 0x2c4   :  { %v3156_v19 = vpop.f32.mrf.mxu3 }
 0x2c5   :  { %v3157_v36 = vadd.f32 %v3156_v19, %v2788_v40  ;;  %v7577_v21 = vpop.f32.mrf.mxu1  ;;  %v5878_v19 = vor.u32 %v6859_v10, %v5877_v0  ;;  %v6790_v10 = vld [vmem:[#allocation4 + $0x12c] sm:$0xf] }
 0x2c6   :  { %9396 = vst [vmem:[#allocation16_spill] sm:$0xff] %v7577_v21 }
 0x2c9   :  { %v3520_v9 = vpop.f32.mrf.mxu0 }
 0x2ca   :  { %v3521_v26 = vadd.f32 %v3520_v9, %v3152_v45 }
 0x2cb   :  { %v7581_v52 = vpop.f32.mrf.mxu2 }
 0x2cc   :  { %v3158_v7 = vpop.f32.mrf.mxu3  ;;  %3559 = vmatmul.bf16.gmra.mxu0 %v5602_v54  ;;  %v3880_v45 = vpack.c.bf16 %v3521_v26, %v3521_v26 }
 0x2cd   :  { %v3159_v40 = vadd.f32 %v3158_v7, %v2790_v25  ;;  %v7583_v21 = vpop.f32.mrf.mxu1  ;;  %v5767_v7 = vld [vmem:[#allocation4 + $0x270] sm:$0xf0] }
 0x2ce   :  { %v7591_v14 = vunpack.c.l.b16 %v3880_v45  ;;  %v5894_v45 = vor.u32 %v6863_v37, %v5893_v49  ;;  %v6794_v37 = vld [vmem:[#allocation4 + $0x14c] sm:$0xf] }
 0x2d0   :  { %2542 = vmatmul.bf16.gmra.mxu1 %v5878_v19  ;;  %2871 = vmatmul.bf16.gmra.mxu2 %v5754_v23  ;;  %9397 = vst [vmem:[#allocation17_spill] sm:$0xff] %v7591_v14  ;;  %v5645_v23 = vld [vmem:[#allocation4 + $0x168] sm:$0xf]  ;;  %v2798_v14 = vadd.f32 %v7512_v29, %v7424_v46  ;;  %v6867_v46 = vld [vmem:[#allocation4 + $0x38c] sm:$0xf0] }
 0x2d1   :  { %3200 = vmatmul.bf16.gmra.mxu3 %v5630_v43  ;;  %v3522_v61 = vpop.f32.mrf.mxu0  ;;  %v6833_v29 = vld [vmem:[#allocation4 + $0x284] sm:$0xf] }
 0x2d2   :  { %v3523_v9 = vadd.f32 %v3522_v61, %v3154_v39  ;;  %v5618_v39 = vor.u32 %v6790_v10, %v5615_v6 }
 0x2d3   :  { %v7587_v28 = vpop.f32.mrf.mxu2 }
 0x2d4   :  { %v3881_v53 = vpack.c.bf16 %v3523_v9, %v3523_v9  ;;  %v3161_v60 = vpop.f32.mrf.mxu3  ;;  %v5770_v9 = vor.u32 %v6829_v56, %v5767_v7  ;;  %v5631_v56 = vld [vmem:[#allocation4 + $0x158] sm:$0xf0] }
 0x2d5   :  { %v3162_v54 = vadd.f32 %v3161_v60, %v2793_v41  ;;  %v7589_v0 = vpop.f32.mrf.mxu1  ;;  %v6800_v60 = vld [vmem:[#allocation4 + $0x174] sm:$0xf0]  ;;  %v2795_v41 = vadd.f32 %v7508_v33, %v7420_v38 }
 0x2d6   :  { %v7593_v15 = vunpack.c.l.b16 %v3881_v53  ;;  %v5646_v10 = vor.u32 %v6800_v60, %v5645_v23  ;;  %v5909_v60 = vld [vmem:[#allocation4 + $0x380] sm:$0xf] }
 0x2d8   :  { %9398 = vst [vmem:[#allocation18_spill] sm:$0xff] %v7593_v15 }
 0x2d9   :  { %v3525_v25 = vpop.f32.mrf.mxu0 }
 0x2da   :  { %v3526_v19 = vadd.f32 %v3525_v25, %v3157_v36 }
 0x2db   :  { %v7599_v43 = vpop.f32.mrf.mxu2 }
 0x2dc   :  { %v3163_v61 = vpop.f32.mrf.mxu3  ;;  %3564 = vmatmul.bf16.gmra.mxu0 %v5618_v39  ;;  %v3882_v36 = vpack.c.bf16 %v3526_v19, %v3526_v19 }
 0x2dd   :  { %v3164_v53 = vadd.f32 %v3163_v61, %v2795_v41  ;;  %v7601_v26 = vpop.f32.mrf.mxu1  ;;  %v5783_v61 = vld [vmem:[#allocation4 + $0x290] sm:$0xf0] }
 0x2de   :  { %v7609_v7 = vunpack.c.l.b16 %v3882_v36  ;;  %v5910_v36 = vor.u32 %v6867_v46, %v5909_v60  ;;  %v6798_v46 = vld [vmem:[#allocation4 + $0x16c] sm:$0xf] }
 0x2e0   :  { %2547 = vmatmul.bf16.gmra.mxu1 %v5894_v45  ;;  %2876 = vmatmul.bf16.gmra.mxu2 %v5770_v9  ;;  %9399 = vst [vmem:[#allocation19_spill] sm:$0xff] %v7609_v7  ;;  %v5661_v9 = vld [vmem:[#allocation4 + $0x188] sm:$0xf]  ;;  %v2803_v7 = vadd.f32 %v7526_v58, %v7428_v59  ;;  %v6871_v59 = vld [vmem:[#allocation4 + $0x3ac] sm:$0xf0] }
 0x2e1   :  { %3205 = vmatmul.bf16.gmra.mxu3 %v5646_v10  ;;  %v3527_v6 = vpop.f32.mrf.mxu0  ;;  %v6837_v58 = vld [vmem:[#allocation4 + $0x2a4] sm:$0xf] }
 0x2e2   :  { %v3528_v25 = vadd.f32 %v3527_v6, %v3159_v40  ;;  %v5634_v40 = vor.u32 %v6794_v37, %v5631_v56 }
 0x2e3   :  { %v7605_v38 = vpop.f32.mrf.mxu2 }
 0x2e4   :  { %v3883_v33 = vpack.c.bf16 %v3528_v25, %v3528_v25  ;;  %v3166_v15 = vpop.f32.mrf.mxu3  ;;  %v5786_v25 = vor.u32 %v6833_v29, %v5783_v61  ;;  %v5647_v29 = vld [vmem:[#allocation4 + $0x178] sm:$0xf0] }
 0x2e5   :  { %v3167_v39 = vadd.f32 %v3166_v15, %v2798_v14  ;;  %v7607_v49 = vpop.f32.mrf.mxu1  ;;  %v6804_v14 = vld [vmem:[#allocation4 + $0x194] sm:$0xf0]  ;;  %v2800_v15 = vadd.f32 %v7516_v44, %v7426_v48 }
 0x2e6   :  { %v7611_v23 = vunpack.c.l.b16 %v3883_v33  ;;  %v5662_v37 = vor.u32 %v6804_v14, %v5661_v9  ;;  %v5925_v14 = vld [vmem:[#allocation4 + $0x3a0] sm:$0xf] }
 0x2e8   :  { %9400 = vst [vmem:[#allocation20_spill] sm:$0xff] %v7611_v23 }
 0x2e9   :  { %v3530_v41 = vpop.f32.mrf.mxu0 }
 0x2ea   :  { %v3531_v45 = vadd.f32 %v3530_v41, %v3162_v54 }
 0x2eb   :  { %v7617_v10 = vpop.f32.mrf.mxu2 }
 0x2ec   :  { %v3168_v6 = vpop.f32.mrf.mxu3  ;;  %3569 = vmatmul.bf16.gmra.mxu0 %v5634_v40  ;;  %v3884_v54 = vpack.c.bf16 %v3531_v45, %v3531_v45 }
 0x2ed   :  { %v3169_v33 = vadd.f32 %v3168_v6, %v2800_v15  ;;  %v7619_v19 = vpop.f32.mrf.mxu1  ;;  %v5799_v6 = vld [vmem:[#allocation4 + $0x2b0] sm:$0xf0] }
 0x2ee   :  { %v7627_v61 = vunpack.c.l.b16 %v3884_v54  ;;  %v5926_v54 = vor.u32 %v6871_v59, %v5925_v14  ;;  %v6802_v59 = vld [vmem:[#allocation4 + $0x18c] sm:$0xf] }
 0x2f0   :  { %2552 = vmatmul.bf16.gmra.mxu1 %v5910_v36  ;;  %2881 = vmatmul.bf16.gmra.mxu2 %v5786_v25  ;;  %9401 = vst [vmem:[#allocation21_spill] sm:$0xff] %v7627_v61  ;;  %v5677_v25 = vld [vmem:[#allocation4 + $0x1a8] sm:$0xf]  ;;  %v2808_v61 = vadd.f32 %v7537_v31, %v7432_v8  ;;  %v6875_v8 = vld [vmem:[#allocation4 + $0x3cc] sm:$0xf0] }
 0x2f1   :  { %3210 = vmatmul.bf16.gmra.mxu3 %v5662_v37  ;;  %v3532_v56 = vpop.f32.mrf.mxu0  ;;  %v6841_v31 = vld [vmem:[#allocation4 + $0x2c4] sm:$0xf] }
 0x2f2   :  { %v3533_v41 = vadd.f32 %v3532_v56, %v3164_v53  ;;  %v5650_v53 = vor.u32 %v6798_v46, %v5647_v29 }
 0x2f3   :  { %v7623_v48 = vpop.f32.mrf.mxu2 }
 0x2f4   :  { %v3885_v44 = vpack.c.bf16 %v3533_v41, %v3533_v41  ;;  %v3171_v23 = vpop.f32.mrf.mxu3  ;;  %v5802_v41 = vor.u32 %v6837_v58, %v5799_v6  ;;  %v5663_v58 = vld [vmem:[#allocation4 + $0x198] sm:$0xf0] }
 0x2f5   :  { %v3172_v40 = vadd.f32 %v3171_v23, %v2803_v7  ;;  %v7625_v60 = vpop.f32.mrf.mxu1  ;;  %v6808_v7 = vld [vmem:[#allocation4 + $0x1b4] sm:$0xf0]  ;;  %v2805_v23 = vadd.f32 %v7533_v55, %v7430_v63 }
 0x2f6   :  { %v7629_v9 = vunpack.c.l.b16 %v3885_v44  ;;  %v5678_v46 = vor.u32 %v6808_v7, %v5677_v25  ;;  %v5941_v7 = vld [vmem:[#allocation4 + $0x3c0] sm:$0xf] }
 0x2f8   :  { %9402 = vst [vmem:[#allocation22_spill] sm:$0xff] %v7629_v9 }
 0x2f9   :  { %v3535_v15 = vpop.f32.mrf.mxu0 }
 0x2fa   :  { %v3536_v36 = vadd.f32 %v3535_v15, %v3167_v39 }
 0x2fb   :  { %v7635_v37 = vpop.f32.mrf.mxu2 }
 0x2fc   :  { %v3173_v56 = vpop.f32.mrf.mxu3  ;;  %3574 = vmatmul.bf16.gmra.mxu0 %v5650_v53  ;;  %v3886_v39 = vpack.c.bf16 %v3536_v36, %v3536_v36 }
 0x2fd   :  { %v3174_v44 = vadd.f32 %v3173_v56, %v2805_v23  ;;  %v7637_v45 = vpop.f32.mrf.mxu1  ;;  %v5815_v56 = vld [vmem:[#allocation4 + $0x2d0] sm:$0xf0] }
 0x2fe   :  { %v7645_v6 = vunpack.c.l.b16 %v3886_v39  ;;  %v5942_v39 = vor.u32 %v6875_v8, %v5941_v7  ;;  %v6806_v8 = vld [vmem:[#allocation4 + $0x1ac] sm:$0xf] }
 0x300   :  { %2557 = vmatmul.bf16.gmra.mxu1 %v5926_v54  ;;  %2886 = vmatmul.bf16.gmra.mxu2 %v5802_v41  ;;  %9403 = vst [vmem:[#allocation23_spill] sm:$0xff] %v7645_v6  ;;  %v5693_v41 = vld [vmem:[#allocation4 + $0x1c8] sm:$0xf]  ;;  %v2813_v6 = vadd.f32 %v7545_v2, %v7440_v34  ;;  %v6879_v34 = vld [vmem:[#allocation4 + $0x3ec] sm:$0xf0] }
 0x301   :  { %3215 = vmatmul.bf16.gmra.mxu3 %v5678_v46  ;;  %v3537_v29 = vpop.f32.mrf.mxu0  ;;  %v6845_v2 = vld [vmem:[#allocation4 + $0x2e4] sm:$0xf] }
 0x302   :  { %v3538_v15 = vadd.f32 %v3537_v29, %v3169_v33  ;;  %v5666_v33 = vor.u32 %v6802_v59, %v5663_v58 }
 0x303   :  { %v7641_v63 = vpop.f32.mrf.mxu2 }
 0x304   :  { %v3887_v55 = vpack.c.bf16 %v3538_v15, %v3538_v15  ;;  %v3176_v9 = vpop.f32.mrf.mxu3  ;;  %v5818_v15 = vor.u32 %v6841_v31, %v5815_v56  ;;  %v5679_v31 = vld [vmem:[#allocation4 + $0x1b8] sm:$0xf0] }
 0x305   :  { %v3177_v53 = vadd.f32 %v3176_v9, %v2808_v61  ;;  %v7643_v14 = vpop.f32.mrf.mxu1  ;;  %v6812_v61 = vld [vmem:[#allocation4 + $0x1d4] sm:$0xf0]  ;;  %v2810_v9 = vadd.f32 %v7541_v51, %v7434_v11 }
 0x306   :  { %v7647_v25 = vunpack.c.l.b16 %v3887_v55  ;;  %v5694_v59 = vor.u32 %v6812_v61, %v5693_v41  ;;  %v5957_v61 = vld [vmem:[#allocation4 + $0x3e0] sm:$0xf] }
 0x308   :  { %9404 = vst [vmem:[#allocation24_spill] sm:$0xff] %v7647_v25 }
 0x309   :  { %v3540_v23 = vpop.f32.mrf.mxu0 }
 0x30a   :  { %v3541_v54 = vadd.f32 %v3540_v23, %v3172_v40 }
 0x30b   :  { %v7653_v46 = vpop.f32.mrf.mxu2 }
 0x30c   :  { %v3178_v29 = vpop.f32.mrf.mxu3  ;;  %3579 = vmatmul.bf16.gmra.mxu0 %v5666_v33  ;;  %v3888_v40 = vpack.c.bf16 %v3541_v54, %v3541_v54 }
 0x30d   :  { %v3179_v55 = vadd.f32 %v3178_v29, %v2810_v9  ;;  %v7655_v36 = vpop.f32.mrf.mxu1  ;;  %v5831_v29 = vld [vmem:[#allocation4 + $0x2f0] sm:$0xf0] }
 0x30e   :  { %v7663_v56 = vunpack.c.l.b16 %v3888_v40  ;;  %v5958_v40 = vor.u32 %v6879_v34, %v5957_v61  ;;  %v6810_v34 = vld [vmem:[#allocation4 + $0x1cc] sm:$0xf] }
 0x310   :  { %2562 = vmatmul.bf16.gmra.mxu1 %v5942_v39  ;;  %2891 = vmatmul.bf16.gmra.mxu2 %v5818_v15  ;;  %9405 = vst [vmem:[#allocation25_spill] sm:$0xff] %v7663_v56  ;;  %v5709_v15 = vld [vmem:[#allocation4 + $0x1e8] sm:$0xf]  ;;  %v2818_v56 = vadd.f32 %v7553_v42, %v7466_v30  ;;  %v6883_v30 = vld [vmem:[#allocation4 + $0x40c] sm:$0xf0] }
 0x311   :  { %3220 = vmatmul.bf16.gmra.mxu3 %v5694_v59  ;;  %v3542_v58 = vpop.f32.mrf.mxu0  ;;  %v6849_v42 = vld [vmem:[#allocation4 + $0x304] sm:$0xf] }
 0x312   :  { %v3543_v23 = vadd.f32 %v3542_v58, %v3174_v44  ;;  %v5682_v44 = vor.u32 %v6806_v8, %v5679_v31 }
 0x313   :  { %v7659_v11 = vpop.f32.mrf.mxu2 }
 0x314   :  { %v3889_v51 = vpack.c.bf16 %v3543_v23, %v3543_v23  ;;  %v3181_v25 = vpop.f32.mrf.mxu3  ;;  %v5834_v23 = vor.u32 %v6845_v2, %v5831_v29  ;;  %v5695_v2 = vld [vmem:[#allocation4 + $0x1d8] sm:$0xf0] }
 0x315   :  { %v3182_v33 = vadd.f32 %v3181_v25, %v2813_v6  ;;  %v7661_v7 = vpop.f32.mrf.mxu1  ;;  %v6816_v6 = vld [vmem:[#allocation4 + $0x1f4] sm:$0xf0]  ;;  %v2815_v25 = vadd.f32 %v7549_v22, %v7454_v47 }
 0x316   :  { %v7665_v41 = vunpack.c.l.b16 %v3889_v51  ;;  %v5710_v8 = vor.u32 %v6816_v6, %v5709_v15  ;;  %v5973_v6 = vld [vmem:[#allocation4 + $0x400] sm:$0xf] }
 0x318   :  { %9406 = vst [vmem:[#allocation26_spill] sm:$0xff] %v7665_v41 }
 0x319   :  { %v3545_v9 = vpop.f32.mrf.mxu0 }
 0x31a   :  { %v3546_v39 = vadd.f32 %v3545_v9, %v3177_v53 }
 0x31b   :  { %v7671_v59 = vpop.f32.mrf.mxu2 }
 0x31c   :  { %v3183_v58 = vpop.f32.mrf.mxu3  ;;  %3584 = vmatmul.bf16.gmra.mxu0 %v5682_v44  ;;  %v3890_v53 = vpack.c.bf16 %v3546_v39, %v3546_v39 }
 0x31d   :  { %v3184_v51 = vadd.f32 %v3183_v58, %v2815_v25  ;;  %v7673_v54 = vpop.f32.mrf.mxu1  ;;  %v5847_v58 = vld [vmem:[#allocation4 + $0x310] sm:$0xf0] }
 0x31e   :  { %v7681_v29 = vunpack.c.l.b16 %v3890_v53  ;;  %v5974_v53 = vor.u32 %v6883_v30, %v5973_v6  ;;  %v6814_v30 = vld [vmem:[#allocation4 + $0x1ec] sm:$0xf] }
 0x320   :  { %2567 = vmatmul.bf16.gmra.mxu1 %v5958_v40  ;;  %2896 = vmatmul.bf16.gmra.mxu2 %v5834_v23  ;;  %9407 = vst [vmem:[#allocation27_spill] sm:$0xff] %v7681_v29  ;;  %v5725_v23 = vld [vmem:[#allocation4 + $0x208] sm:$0xf]  ;;  %v2823_v29 = vadd.f32 %v7563_v16, %v7478_v3  ;;  %v6887_v3 = vld [vmem:[#allocation4 + $0x42c] sm:$0xf0] }
 0x321   :  { %3225 = vmatmul.bf16.gmra.mxu3 %v5710_v8  ;;  %v3547_v31 = vpop.f32.mrf.mxu0  ;;  %v6853_v16 = vld [vmem:[#allocation4 + $0x324] sm:$0xf] }
 0x322   :  { %v3548_v9 = vadd.f32 %v3547_v31, %v3179_v55  ;;  %v5698_v55 = vor.u32 %v6810_v34, %v5695_v2 }
 0x323   :  { %v7677_v47 = vpop.f32.mrf.mxu2 }
 0x324   :  { %v3891_v22 = vpack.c.bf16 %v3548_v9, %v3548_v9  ;;  %v3186_v41 = vpop.f32.mrf.mxu3  ;;  %v5850_v9 = vor.u32 %v6849_v42, %v5847_v58  ;;  %v5711_v42 = vld [vmem:[#allocation4 + $0x1f8] sm:$0xf0] }
 0x325   :  { %v3187_v44 = vadd.f32 %v3186_v41, %v2818_v56  ;;  %v7679_v61 = vpop.f32.mrf.mxu1  ;;  %v6820_v56 = vld [vmem:[#allocation4 + $0x214] sm:$0xf0]  ;;  %v2820_v41 = vadd.f32 %v7557_v62, %v7476_v13 }
 0x326   :  { %v7683_v15 = vunpack.c.l.b16 %v3891_v22  ;;  %v5726_v34 = vor.u32 %v6820_v56, %v5725_v23  ;;  %v5989_v56 = vld [vmem:[#allocation4 + $0x420] sm:$0xf] }
 0x328   :  { %9408 = vst [vmem:[#allocation28_spill] sm:$0xff] %v7683_v15 }
 0x329   :  { %v3550_v25 = vpop.f32.mrf.mxu0 }
 0x32a   :  { %v3551_v40 = vadd.f32 %v3550_v25, %v3182_v33 }
 0x32b   :  { %v7689_v8 = vpop.f32.mrf.mxu2 }
 0x32c   :  { %v3188_v31 = vpop.f32.mrf.mxu3  ;;  %3589 = vmatmul.bf16.gmra.mxu0 %v5698_v55  ;;  %v3892_v33 = vpack.c.bf16 %v3551_v40, %v3551_v40 }
 0x32d   :  { %v3189_v22 = vadd.f32 %v3188_v31, %v2820_v41  ;;  %v7691_v39 = vpop.f32.mrf.mxu1  ;;  %v5863_v31 = vld [vmem:[#allocation4 + $0x330] sm:$0xf0] }
 0x32e   :  { %v7699_v58 = vunpack.c.l.b16 %v3892_v33  ;;  %v5990_v33 = vor.u32 %v6887_v3, %v5989_v56  ;;  %v6818_v3 = vld [vmem:[#allocation4 + $0x20c] sm:$0xf] }
 0x330   :  { %2572 = vmatmul.bf16.gmra.mxu1 %v5974_v53  ;;  %2901 = vmatmul.bf16.gmra.mxu2 %v5850_v9  ;;  %9409 = vst [vmem:[#allocation29_spill] sm:$0xff] %v7699_v58  ;;  %v5741_v9 = vld [vmem:[#allocation4 + $0x228] sm:$0xf]  ;;  %v2828_v58 = vadd.f32 %v7575_v12, %v7494_v35  ;;  %v6891_v35 = vld [vmem:[#allocation4 + $0x44c] sm:$0xf0] }
 0x331   :  { %3230 = vmatmul.bf16.gmra.mxu3 %v5726_v34  ;;  %v3552_v2 = vpop.f32.mrf.mxu0  ;;  %v6857_v12 = vld [vmem:[#allocation4 + $0x344] sm:$0xf] }
 0x332   :  { %v3553_v25 = vadd.f32 %v3552_v2, %v3184_v51  ;;  %v5714_v51 = vor.u32 %v6814_v30, %v5711_v42 }
 0x333   :  { %v7695_v13 = vpop.f32.mrf.mxu2 }
 0x334   :  { %v3893_v62 = vpack.c.bf16 %v3553_v25, %v3553_v25  ;;  %v3191_v15 = vpop.f32.mrf.mxu3  ;;  %v5866_v25 = vor.u32 %v6853_v16, %v5863_v31  ;;  %v5727_v16 = vld [vmem:[#allocation4 + $0x218] sm:$0xf0] }
 0x335   :  { %v3192_v55 = vadd.f32 %v3191_v15, %v2823_v29  ;;  %v7697_v6 = vpop.f32.mrf.mxu1  ;;  %v6824_v29 = vld [vmem:[#allocation4 + $0x234] sm:$0xf0]  ;;  %v2825_v15 = vadd.f32 %v7569_v17, %v7482_v57 }
 0x336   :  { %v7701_v23 = vunpack.c.l.b16 %v3893_v62  ;;  %v5742_v30 = vor.u32 %v6824_v29, %v5741_v9  ;;  %v6005_v29 = vld [vmem:[#allocation4 + $0x440] sm:$0xf] }
 0x338   :  { %9410 = vst [vmem:[#allocation30_spill] sm:$0xff] %v7701_v23 }
 0x339   :  { %v3555_v41 = vpop.f32.mrf.mxu0 }
 0x33a   :  { %v3556_v53 = vadd.f32 %v3555_v41, %v3187_v44 }
 0x33b   :  { %v7707_v34 = vpop.f32.mrf.mxu2 }
 0x33c   :  { %v3193_v2 = vpop.f32.mrf.mxu3  ;;  %3594 = vmatmul.bf16.gmra.mxu0 %v5714_v51  ;;  %v3894_v44 = vpack.c.bf16 %v3556_v53, %v3556_v53 }
 0x33d   :  { %v3194_v62 = vadd.f32 %v3193_v2, %v2825_v15  ;;  %v7709_v40 = vpop.f32.mrf.mxu1  ;;  %v5879_v2 = vld [vmem:[#allocation4 + $0x350] sm:$0xf0] }
 0x33e   :  { %v7717_v31 = vunpack.c.l.b16 %v3894_v44  ;;  %v6006_v44 = vor.u32 %v6891_v35, %v6005_v29  ;;  %v6822_v35 = vld [vmem:[#allocation4 + $0x22c] sm:$0xf] }
 0x340   :  { %2577 = vmatmul.bf16.gmra.mxu1 %v5990_v33  ;;  %2906 = vmatmul.bf16.gmra.mxu2 %v5866_v25  ;;  %9411 = vst [vmem:[#allocation31_spill] sm:$0xff] %v7717_v31  ;;  %v5757_v25 = vld [vmem:[#allocation4 + $0x248] sm:$0xf]  ;;  %v2833_v31 = vadd.f32 %v7587_v28, %v7502_v1  ;;  %v6895_v1 = vld [vmem:[#allocation4 + $0x46c] sm:$0xf0] }
 0x341   :  { %3235 = vmatmul.bf16.gmra.mxu3 %v5742_v30  ;;  %v3557_v42 = vpop.f32.mrf.mxu0  ;;  %v6861_v28 = vld [vmem:[#allocation4 + $0x364] sm:$0xf] }
 0x342   :  { %v3558_v41 = vadd.f32 %v3557_v42, %v3189_v22  ;;  %v5730_v22 = vor.u32 %v6818_v3, %v5727_v16 }
 0x343   :  { %v7713_v57 = vpop.f32.mrf.mxu2 }
 0x344   :  { %v3895_v17 = vpack.c.bf16 %v3558_v41, %v3558_v41  ;;  %v3196_v23 = vpop.f32.mrf.mxu3  ;;  %v5882_v41 = vor.u32 %v6857_v12, %v5879_v2  ;;  %v5743_v12 = vld [vmem:[#allocation4 + $0x238] sm:$0xf0] }
 0x345   :  { %v3197_v51 = vadd.f32 %v3196_v23, %v2828_v58  ;;  %v7715_v56 = vpop.f32.mrf.mxu1  ;;  %v6828_v58 = vld [vmem:[#allocation4 + $0x254] sm:$0xf0]  ;;  %v2830_v23 = vadd.f32 %v7581_v52, %v7498_v18 }
 0x346   :  { %v7719_v9 = vunpack.c.l.b16 %v3895_v17  ;;  %v5758_v3 = vor.u32 %v6828_v58, %v5757_v25  ;;  %v6021_v58 = vld [vmem:[#allocation4 + $0x460] sm:$0xf] }
 0x348   :  { %9412 = vst [vmem:[#allocation32_spill] sm:$0xff] %v7719_v9 }
 0x349   :  { %v3560_v15 = vpop.f32.mrf.mxu0 }
 0x34a   :  { %v3561_v33 = vadd.f32 %v3560_v15, %v3192_v55 }
 0x34b   :  { %v7725_v30 = vpop.f32.mrf.mxu2 }
 0x34c   :  { %v3198_v42 = vpop.f32.mrf.mxu3  ;;  %3599 = vmatmul.bf16.gmra.mxu0 %v5730_v22  ;;  %v3896_v55 = vpack.c.bf16 %v3561_v33, %v3561_v33 }
 0x34d   :  { %v3199_v17 = vadd.f32 %v3198_v42, %v2830_v23  ;;  %v7727_v53 = vpop.f32.mrf.mxu1  ;;  %v5895_v42 = vld [vmem:[#allocation4 + $0x370] sm:$0xf0] }
 0x34e   :  { %v7735_v2 = vunpack.c.l.b16 %v3896_v55  ;;  %v6022_v55 = vor.u32 %v6895_v1, %v6021_v58  ;;  %v6826_v1 = vld [vmem:[#allocation4 + $0x24c] sm:$0xf] }
 0x350   :  { %2582 = vmatmul.bf16.gmra.mxu1 %v6006_v44  ;;  %2911 = vmatmul.bf16.gmra.mxu2 %v5882_v41  ;;  %9413 = vst [vmem:[#allocation33_spill] sm:$0xff] %v7735_v2  ;;  %v5773_v41 = vld [vmem:[#allocation4 + $0x268] sm:$0xf]  ;;  %v2838_v2 = vadd.f32 %v7605_v38, %v7510_v24  ;;  %v6899_v24 = vld [vmem:[#allocation4 + $0x48c] sm:$0xf0] }
 0x351   :  { %3240 = vmatmul.bf16.gmra.mxu3 %v5758_v3  ;;  %v3562_v16 = vpop.f32.mrf.mxu0  ;;  %v6865_v38 = vld [vmem:[#allocation4 + $0x384] sm:$0xf] }
 0x352   :  { %v3563_v15 = vadd.f32 %v3562_v16, %v3194_v62  ;;  %v5746_v62 = vor.u32 %v6822_v35, %v5743_v12 }
 0x353   :  { %v7731_v18 = vpop.f32.mrf.mxu2 }
 0x354   :  { %v3897_v52 = vpack.c.bf16 %v3563_v15, %v3563_v15  ;;  %v3201_v9 = vpop.f32.mrf.mxu3  ;;  %v5898_v15 = vor.u32 %v6861_v28, %v5895_v42  ;;  %v5759_v28 = vld [vmem:[#allocation4 + $0x258] sm:$0xf0] }
 0x355   :  { %v3202_v22 = vadd.f32 %v3201_v9, %v2833_v31  ;;  %v7733_v29 = vpop.f32.mrf.mxu1  ;;  %v6832_v31 = vld [vmem:[#allocation4 + $0x274] sm:$0xf0]  ;;  %v2835_v9 = vadd.f32 %v7599_v43, %v7506_v4 }
 0x356   :  { %v7737_v25 = vunpack.c.l.b16 %v3897_v52  ;;  %v5774_v35 = vor.u32 %v6832_v31, %v5773_v41  ;;  %v6037_v31 = vld [vmem:[#allocation4 + $0x480] sm:$0xf] }
 0x358   :  { %9414 = vst [vmem:[#allocation34_spill] sm:$0xff] %v7737_v25 }
 0x359   :  { %v3565_v23 = vpop.f32.mrf.mxu0 }
 0x35a   :  { %v3566_v44 = vadd.f32 %v3565_v23, %v3197_v51 }
 0x35b   :  { %v7743_v3 = vpop.f32.mrf.mxu2 }
 0x35c   :  { %v3203_v16 = vpop.f32.mrf.mxu3  ;;  %3604 = vmatmul.bf16.gmra.mxu0 %v5746_v62  ;;  %v3898_v51 = vpack.c.bf16 %v3566_v44, %v3566_v44 }
 0x35d   :  { %v3204_v52 = vadd.f32 %v3203_v16, %v2835_v9  ;;  %v7745_v33 = vpop.f32.mrf.mxu1  ;;  %v5911_v16 = vld [vmem:[#allocation4 + $0x390] sm:$0xf0] }
 0x35e   :  { %v7753_v42 = vunpack.c.l.b16 %v3898_v51  ;;  %v6038_v51 = vor.u32 %v6899_v24, %v6037_v31  ;;  %v6830_v24 = vld [vmem:[#allocation4 + $0x26c] sm:$0xf] }
 0x360   :  { %2587 = vmatmul.bf16.gmra.mxu1 %v6022_v55  ;;  %2916 = vmatmul.bf16.gmra.mxu2 %v5898_v15  ;;  %9415 = vst [vmem:[#allocation35_spill] sm:$0xff] %v7753_v42  ;;  %v5789_v15 = vld [vmem:[#allocation4 + $0x288] sm:$0xf]  ;;  %v2843_v42 = vadd.f32 %v7623_v48, %v7518_v50  ;;  %v6903_v50 = vld [vmem:[#allocation4 + $0x4ac] sm:$0xf0] }
 0x361   :  { %3245 = vmatmul.bf16.gmra.mxu3 %v5774_v35  ;;  %v3567_v12 = vpop.f32.mrf.mxu0  ;;  %v6869_v48 = vld [vmem:[#allocation4 + $0x3a4] sm:$0xf] }
 0x362   :  { %v3568_v23 = vadd.f32 %v3567_v12, %v3199_v17  ;;  %v5762_v17 = vor.u32 %v6826_v1, %v5759_v28 }
 0x363   :  { %v7749_v4 = vpop.f32.mrf.mxu2 }
 0x364   :  { %v3899_v43 = vpack.c.bf16 %v3568_v23, %v3568_v23  ;;  %v3206_v25 = vpop.f32.mrf.mxu3  ;;  %v5914_v23 = vor.u32 %v6865_v38, %v5911_v16  ;;  %v5775_v38 = vld [vmem:[#allocation4 + $0x278] sm:$0xf0] }
 0x365   :  { %v3207_v62 = vadd.f32 %v3206_v25, %v2838_v2  ;;  %v7751_v58 = vpop.f32.mrf.mxu1  ;;  %v6836_v2 = vld [vmem:[#allocation4 + $0x294] sm:$0xf0]  ;;  %v2840_v25 = vadd.f32 %v7617_v10, %v7514_v27 }
 0x366   :  { %v7755_v41 = vunpack.c.l.b16 %v3899_v43  ;;  %v5790_v1 = vor.u32 %v6836_v2, %v5789_v15  ;;  %v6053_v2 = vld [vmem:[#allocation4 + $0x4a0] sm:$0xf] }
 0x368   :  { %9416 = vst [vmem:[#allocation36_spill] sm:$0xff] %v7755_v41 }
 0x369   :  { %v3570_v9 = vpop.f32.mrf.mxu0 }
 0x36a   :  { %v3571_v55 = vadd.f32 %v3570_v9, %v3202_v22 }
 0x36b   :  { %v7761_v35 = vpop.f32.mrf.mxu2 }
 0x36c   :  { %v3208_v12 = vpop.f32.mrf.mxu3  ;;  %3609 = vmatmul.bf16.gmra.mxu0 %v5762_v17  ;;  %v3900_v22 = vpack.c.bf16 %v3571_v55, %v3571_v55 }
 0x36d   :  { %v3209_v43 = vadd.f32 %v3208_v12, %v2840_v25  ;;  %v7763_v44 = vpop.f32.mrf.mxu1  ;;  %v5927_v12 = vld [vmem:[#allocation4 + $0x3b0] sm:$0xf0] }
 0x36e   :  { %v7771_v16 = vunpack.c.l.b16 %v3900_v22  ;;  %v6054_v22 = vor.u32 %v6903_v50, %v6053_v2  ;;  %v6834_v50 = vld [vmem:[#allocation4 + $0x28c] sm:$0xf] }
 0x370   :  { %2592 = vmatmul.bf16.gmra.mxu1 %v6038_v51  ;;  %2921 = vmatmul.bf16.gmra.mxu2 %v5914_v23  ;;  %9417 = vst [vmem:[#allocation37_spill] sm:$0xff] %v7771_v16  ;;  %v5805_v23 = vld [vmem:[#allocation4 + $0x2a8] sm:$0xf]  ;;  %v2848_v16 = vadd.f32 %v7641_v63, %v7535_v20  ;;  %v6907_v20 = vld [vmem:[#allocation4 + $0x4cc] sm:$0xf0] }
 0x371   :  { %3250 = vmatmul.bf16.gmra.mxu3 %v5790_v1  ;;  %v3572_v28 = vpop.f32.mrf.mxu0  ;;  %v6873_v63 = vld [vmem:[#allocation4 + $0x3c4] sm:$0xf] }
 0x372   :  { %v3573_v9 = vadd.f32 %v3572_v28, %v3204_v52  ;;  %v5778_v52 = vor.u32 %v6830_v24, %v5775_v38 }
 0x373   :  { %v7767_v27 = vpop.f32.mrf.mxu2 }
 0x374   :  { %v3901_v10 = vpack.c.bf16 %v3573_v9, %v3573_v9  ;;  %v3211_v41 = vpop.f32.mrf.mxu3  ;;  %v5930_v9 = vor.u32 %v6869_v48, %v5927_v12  ;;  %v5791_v48 = vld [vmem:[#allocation4 + $0x298] sm:$0xf0] }
 0x375   :  { %v3212_v17 = vadd.f32 %v3211_v41, %v2843_v42  ;;  %v7769_v31 = vpop.f32.mrf.mxu1  ;;  %v6840_v42 = vld [vmem:[#allocation4 + $0x2b4] sm:$0xf0]  ;;  %v2845_v41 = vadd.f32 %v7635_v37, %v7531_v5 }
 0x376   :  { %v7773_v15 = vunpack.c.l.b16 %v3901_v10  ;;  %v5806_v24 = vor.u32 %v6840_v42, %v5805_v23  ;;  %v6069_v42 = vld [vmem:[#allocation4 + $0x4c0] sm:$0xf] }
 0x378   :  { %9418 = vst [vmem:[#allocation38_spill] sm:$0xff] %v7773_v15 }
 0x379   :  { %v3575_v25 = vpop.f32.mrf.mxu0 }
 0x37a   :  { %v3576_v51 = vadd.f32 %v3575_v25, %v3207_v62 }
 0x37b   :  { %v7779_v1 = vpop.f32.mrf.mxu2 }
 0x37c   :  { %v3213_v28 = vpop.f32.mrf.mxu3  ;;  %3614 = vmatmul.bf16.gmra.mxu0 %v5778_v52  ;;  %v3902_v62 = vpack.c.bf16 %v3576_v51, %v3576_v51 }
 0x37d   :  { %v3214_v10 = vadd.f32 %v3213_v28, %v2845_v41  ;;  %v7781_v55 = vpop.f32.mrf.mxu1  ;;  %v5943_v28 = vld [vmem:[#allocation4 + $0x3d0] sm:$0xf0] }
 0x37e   :  { %v7789_v12 = vunpack.c.l.b16 %v3902_v62  ;;  %v6070_v62 = vor.u32 %v6907_v20, %v6069_v42  ;;  %v6838_v20 = vld [vmem:[#allocation4 + $0x2ac] sm:$0xf] }
 0x380   :  { %2597 = vmatmul.bf16.gmra.mxu1 %v6054_v22  ;;  %2926 = vmatmul.bf16.gmra.mxu2 %v5930_v9  ;;  %9420 = vst [vmem:[#allocation40_spill] sm:$0xff] %v7789_v12  ;;  %v5821_v9 = vld [vmem:[#allocation4 + $0x2c8] sm:$0xf] }
 0x381   :  { %3255 = vmatmul.bf16.gmra.mxu3 %v5806_v24  ;;  %v3577_v38 = vpop.f32.mrf.mxu0  ;;  %v9423_v12 = vld [vmem:[#allocation9_spill] sm:$0xff] }
 0x382   :  { %v3578_v25 = vadd.f32 %v3577_v38, %v3209_v43  ;;  %v5794_v43 = vor.u32 %v6834_v50, %v5791_v48 }
 0x383   :  { %v7785_v5 = vpop.f32.mrf.mxu2 }
 0x384   :  { %v3903_v37 = vpack.c.bf16 %v3578_v25, %v3578_v25  ;;  %v3216_v15 = vpop.f32.mrf.mxu3  ;;  %v5946_v25 = vor.u32 %v6873_v63, %v5943_v28  ;;  %v5807_v63 = vld [vmem:[#allocation4 + $0x2b8] sm:$0xf0] }
 0x385   :  { %v3217_v52 = vadd.f32 %v3216_v15, %v2848_v16  ;;  %v7787_v2 = vpop.f32.mrf.mxu1  ;;  %v6844_v16 = vld [vmem:[#allocation4 + $0x2d4] sm:$0xf0]  ;;  %v2850_v15 = vadd.f32 %v7653_v46, %v7539_v32 }
 0x386   :  { %9419 = vst [vmem:[#allocation39_spill] sm:$0xff] %v7787_v2  ;;  %v7791_v23 = vunpack.c.l.b16 %v3903_v37  ;;  %v5822_v50 = vor.u32 %v6844_v16, %v5821_v9  ;;  %v6085_v16 = vld [vmem:[#allocation4 + $0x4e0] sm:$0xf] }
 0x388   :  { %9421 = vst [vmem:[#allocation41_spill] sm:$0xff] %v7791_v23  ;;  %v2853_v23 = vadd.f32 %v7659_v11, %v9423_v12  ;;  %v6911_v11 = vld [vmem:[#allocation4 + $0x4ec] sm:$0xf0]  ;;  %v6877_v12 = vld [vmem:[#allocation4 + $0x3e4] sm:$0xf] }
 0x389   :  { %v3580_v41 = vpop.f32.mrf.mxu0 }
 0x38a   :  { %v3581_v22 = vadd.f32 %v3580_v41, %v3212_v17 }
 0x38b   :  { %v7797_v24 = vpop.f32.mrf.mxu2 }
 0x38c   :  { %v3218_v38 = vpop.f32.mrf.mxu3  ;;  %3619 = vmatmul.bf16.gmra.mxu0 %v5794_v43  ;;  %v3904_v17 = vpack.c.bf16 %v3581_v22, %v3581_v22 }
 0x38d   :  { %v3219_v37 = vadd.f32 %v3218_v38, %v2850_v15  ;;  %v7799_v51 = vpop.f32.mrf.mxu1  ;;  %v5959_v38 = vld [vmem:[#allocation4 + $0x3f0] sm:$0xf0] }
 0x38e   :  { %9422 = vst [vmem:[#allocation42_spill] sm:$0xff] %v7799_v51  ;;  %v7807_v28 = vunpack.c.l.b16 %v3904_v17 }
 0x390   :  { %2602 = vmatmul.bf16.gmra.mxu1 %v6070_v62  ;;  %2931 = vmatmul.bf16.gmra.mxu2 %v5946_v25  ;;  %9425 = vst [vmem:[#allocation43_spill] sm:$0xff] %v7807_v28  ;;  %v5837_v25 = vld [vmem:[#allocation4 + $0x2e8] sm:$0xf]  ;;  %v9429_v28 = vld [vmem:[#allocation11_spill] sm:$0xff] }
 0x391   :  { %3260 = vmatmul.bf16.gmra.mxu3 %v5822_v50  ;;  %v3582_v48 = vpop.f32.mrf.mxu0 }
 0x392   :  { %v3583_v41 = vadd.f32 %v3582_v48, %v3214_v10  ;;  %v5810_v10 = vor.u32 %v6838_v20, %v5807_v63 }
 0x393   :  { %v7803_v32 = vpop.f32.mrf.mxu2 }
 0x394   :  { %v3905_v46 = vpack.c.bf16 %v3583_v41, %v3583_v41  ;;  %v3221_v2 = vpop.f32.mrf.mxu3  ;;  %v6086_v41 = vor.u32 %v6911_v11, %v6085_v16  ;;  %v6842_v11 = vld [vmem:[#allocation4 + $0x2cc] sm:$0xf] }
 0x395   :  { %v3222_v43 = vadd.f32 %v3221_v2, %v2853_v23  ;;  %v7805_v42 = vpop.f32.mrf.mxu1  ;;  %v6848_v2 = vld [vmem:[#allocation4 + $0x2f4] sm:$0xf0]  ;;  %v9427_v23 = vld [vmem:[#allocation10_spill] sm:$0xff] }
 0x396   :  { %9424 = vst [vmem:[#allocation9_spill] sm:$0xff] %v7805_v42  ;;  %v7809_v9 = vunpack.c.l.b16 %v3905_v46  ;;  %v2855_v50 = vadd.f32 %v7671_v59, %v9427_v23  ;;  %v5962_v46 = vor.u32 %v6877_v12, %v5959_v38  ;;  %v5838_v20 = vor.u32 %v6848_v2, %v5837_v25  ;;  %v5823_v12 = vld [vmem:[#allocation4 + $0x2d8] sm:$0xf0]  ;;  %v6101_v2 = vld [vmem:[#allocation4 + $0x500] sm:$0xf] }
 0x398   :  { %9426 = vst [vmem:[#allocation44_spill] sm:$0xff] %v7809_v9  ;;  %v2858_v9 = vadd.f32 %v7677_v47, %v9429_v28  ;;  %v6915_v47 = vld [vmem:[#allocation4 + $0x50c] sm:$0xf0]  ;;  %v6881_v28 = vld [vmem:[#allocation4 + $0x404] sm:$0xf] }
 0x399   :  { %v3585_v15 = vpop.f32.mrf.mxu0 }
 0x39a   :  { %v3586_v62 = vadd.f32 %v3585_v15, %v3217_v52 }
 0x39b   :  { %v7815_v48 = vpop.f32.mrf.mxu2 }
 0x39c   :  { %v3223_v17 = vpop.f32.mrf.mxu3  ;;  %3624 = vmatmul.bf16.gmra.mxu0 %v5810_v10  ;;  %v3906_v52 = vpack.c.bf16 %v3586_v62, %v3586_v62 }
 0x39d   :  { %v3224_v42 = vadd.f32 %v3223_v17, %v2855_v50  ;;  %v7817_v22 = vpop.f32.mrf.mxu1  ;;  %v5975_v17 = vld [vmem:[#allocation4 + $0x410] sm:$0xf0] }
 0x39e   :  { %9428 = vst [vmem:[#allocation10_spill] sm:$0xff] %v7817_v22  ;;  %v7825_v38 = vunpack.c.l.b16 %v3906_v52 }
 0x3a0   :  { %2607 = vmatmul.bf16.gmra.mxu1 %v6086_v41  ;;  %2936 = vmatmul.bf16.gmra.mxu2 %v5962_v46  ;;  %9431 = vst [vmem:[#allocation45_spill] sm:$0xff] %v7825_v38  ;;  %v5853_v46 = vld [vmem:[#allocation4 + $0x308] sm:$0xf] }
 0x3a1   :  { %3265 = vmatmul.bf16.gmra.mxu3 %v5838_v20  ;;  %v3587_v63 = vpop.f32.mrf.mxu0  ;;  %v9435_v38 = vld [vmem:[#allocation13_spill] sm:$0xff] }
 0x3a2   :  { %v3588_v15 = vadd.f32 %v3587_v63, %v3219_v37  ;;  %v5826_v37 = vor.u32 %v6842_v11, %v5823_v12 }
 0x3a3   :  { %v7821_v59 = vpop.f32.mrf.mxu2 }
 0x3a4   :  { %v3907_v23 = vpack.c.bf16 %v3588_v15, %v3588_v15  ;;  %v3226_v51 = vpop.f32.mrf.mxu3  ;;  %v6102_v15 = vor.u32 %v6915_v47, %v6101_v2  ;;  %v6846_v47 = vld [vmem:[#allocation4 + $0x2ec] sm:$0xf] }
 0x3a5   :  { %v3227_v10 = vadd.f32 %v3226_v51, %v2858_v9  ;;  %v7823_v16 = vpop.f32.mrf.mxu1  ;;  %v6852_v51 = vld [vmem:[#allocation4 + $0x314] sm:$0xf0]  ;;  %v9433_v9 = vld [vmem:[#allocation12_spill] sm:$0xff] }
 0x3a6   :  { %9430 = vst [vmem:[#allocation11_spill] sm:$0xff] %v7823_v16  ;;  %v7827_v25 = vunpack.c.l.b16 %v3907_v23  ;;  %v2860_v20 = vadd.f32 %v7689_v8, %v9433_v9  ;;  %v5978_v23 = vor.u32 %v6881_v28, %v5975_v17  ;;  %v5854_v11 = vor.u32 %v6852_v51, %v5853_v46  ;;  %v5839_v28 = vld [vmem:[#allocation4 + $0x2f8] sm:$0xf0]  ;;  %v6117_v51 = vld [vmem:[#allocation4 + $0x520] sm:$0xf] }
 0x3a8   :  { %9432 = vst [vmem:[#allocation46_spill] sm:$0xff] %v7827_v25  ;;  %v2863_v25 = vadd.f32 %v7695_v13, %v9435_v38  ;;  %v6919_v13 = vld [vmem:[#allocation4 + $0x52c] sm:$0xf0]  ;;  %v6885_v38 = vld [vmem:[#allocation4 + $0x424] sm:$0xf] }
 0x3a9   :  { %v3590_v50 = vpop.f32.mrf.mxu0 }
 0x3aa   :  { %v3591_v41 = vadd.f32 %v3590_v50, %v3222_v43 }
 0x3ab   :  { %v7833_v63 = vpop.f32.mrf.mxu2 }
 0x3ac   :  { %v3228_v52 = vpop.f32.mrf.mxu3  ;;  %3629 = vmatmul.bf16.gmra.mxu0 %v5826_v37  ;;  %v3908_v43 = vpack.c.bf16 %v3591_v41, %v3591_v41 }
 0x3ad   :  { %v3229_v16 = vadd.f32 %v3228_v52, %v2860_v20  ;;  %v7835_v62 = vpop.f32.mrf.mxu1  ;;  %v5991_v52 = vld [vmem:[#allocation4 + $0x430] sm:$0xf0] }
 0x3ae   :  { %9434 = vst [vmem:[#allocation12_spill] sm:$0xff] %v7835_v62  ;;  %v7843_v17 = vunpack.c.l.b16 %v3908_v43 }
 0x3b0   :  { %2612 = vmatmul.bf16.gmra.mxu1 %v6102_v15  ;;  %2941 = vmatmul.bf16.gmra.mxu2 %v5978_v23  ;;  %9437 = vst [vmem:[#allocation47_spill] sm:$0xff] %v7843_v17  ;;  %v5869_v23 = vld [vmem:[#allocation4 + $0x328] sm:$0xf]  ;;  %v9440_v17 = vld [vmem:[#allocation15_spill] sm:$0xff] }
 0x3b1   :  { %3270 = vmatmul.bf16.gmra.mxu3 %v5854_v11  ;;  %v3592_v12 = vpop.f32.mrf.mxu0 }
 0x3b2   :  { %v3593_v50 = vadd.f32 %v3592_v12, %v3224_v42  ;;  %v5842_v42 = vor.u32 %v6846_v47, %v5839_v28 }
 0x3b3   :  { %v7839_v8 = vpop.f32.mrf.mxu2 }
 0x3b4   :  { %v3909_v9 = vpack.c.bf16 %v3593_v50, %v3593_v50  ;;  %v3231_v22 = vpop.f32.mrf.mxu3  ;;  %v6118_v50 = vor.u32 %v6919_v13, %v6117_v51  ;;  %v6850_v13 = vld [vmem:[#allocation4 + $0x30c] sm:$0xf] }
 0x3b5   :  { %v3232_v37 = vadd.f32 %v3231_v22, %v2863_v25  ;;  %v7841_v2 = vpop.f32.mrf.mxu1  ;;  %v6856_v22 = vld [vmem:[#allocation4 + $0x334] sm:$0xf0]  ;;  %v9439_v25 = vld [vmem:[#allocation14_spill] sm:$0xff] }
 0x3b6   :  { %9436 = vst [vmem:[#allocation13_spill] sm:$0xff] %v7841_v2  ;;  %v7845_v46 = vunpack.c.l.b16 %v3909_v9  ;;  %v2865_v11 = vadd.f32 %v7707_v34, %v9439_v25  ;;  %v5994_v9 = vor.u32 %v6885_v38, %v5991_v52  ;;  %v5870_v47 = vor.u32 %v6856_v22, %v5869_v23  ;;  %v5855_v38 = vld [vmem:[#allocation4 + $0x318] sm:$0xf0]  ;;  %v6133_v22 = vld [vmem:[#allocation4 + $0x540] sm:$0xf] }
 0x3b8   :  { %9438 = vst [vmem:[#allocation48_spill] sm:$0xff] %v7845_v46  ;;  %v2868_v46 = vadd.f32 %v7713_v57, %v9440_v17  ;;  %v6923_v57 = vld [vmem:[#allocation4 + $0x54c] sm:$0xf0]  ;;  %v6889_v17 = vld [vmem:[#allocation4 + $0x444] sm:$0xf] }
 0x3b9   :  { %v3595_v20 = vpop.f32.mrf.mxu0 }
 0x3ba   :  { %v3596_v15 = vadd.f32 %v3595_v20, %v3227_v10 }
 0x3bb   :  { %v7851_v12 = vpop.f32.mrf.mxu2 }
 0x3bc   :  { %v3233_v43 = vpop.f32.mrf.mxu3  ;;  %3634 = vmatmul.bf16.gmra.mxu0 %v5842_v42  ;;  %v3910_v10 = vpack.c.bf16 %v3596_v15, %v3596_v15 }
 0x3bd   :  { %v3234_v2 = vadd.f32 %v3233_v43, %v2865_v11  ;;  %v7853_v41 = vpop.f32.mrf.mxu1  ;;  %v6007_v43 = vld [vmem:[#allocation4 + $0x450] sm:$0xf0] }
 0x3be   :  { %v7861_v52 = vunpack.c.l.b16 %v3910_v10 }
 0x3c0   :  { %2617 = vmatmul.bf16.gmra.mxu1 %v6118_v50  ;;  %2946 = vmatmul.bf16.gmra.mxu2 %v5994_v9  ;;  %9442 = vst [vmem:[#allocation15_spill] sm:$0xff] %v7861_v52  ;;  %v5885_v9 = vld [vmem:[#allocation4 + $0x348] sm:$0xf]  ;;  %v2873_v52 = vadd.f32 %v7731_v18, %v7583_v21  ;;  %v6927_v21 = vld [vmem:[#allocation4 + $0x56c] sm:$0xf0] }
 0x3c1   :  { %3275 = vmatmul.bf16.gmra.mxu3 %v5870_v47  ;;  %v3597_v28 = vpop.f32.mrf.mxu0  ;;  %v6893_v18 = vld [vmem:[#allocation4 + $0x464] sm:$0xf] }
 0x3c2   :  { %v3598_v20 = vadd.f32 %v3597_v28, %v3229_v16  ;;  %v5858_v16 = vor.u32 %v6850_v13, %v5855_v38 }
 0x3c3   :  { %v7857_v34 = vpop.f32.mrf.mxu2 }
 0x3c4   :  { %v3911_v25 = vpack.c.bf16 %v3598_v20, %v3598_v20  ;;  %v3236_v62 = vpop.f32.mrf.mxu3  ;;  %v6134_v20 = vor.u32 %v6923_v57, %v6133_v22  ;;  %v6854_v57 = vld [vmem:[#allocation4 + $0x32c] sm:$0xf] }
 0x3c5   :  { %v3237_v42 = vadd.f32 %v3236_v62, %v2868_v46  ;;  %v7859_v51 = vpop.f32.mrf.mxu1  ;;  %v6860_v62 = vld [vmem:[#allocation4 + $0x354] sm:$0xf0]  ;;  %v9444_v46 = vld [vmem:[#allocation16_spill] sm:$0xff] }
 0x3c6   :  { %9441 = vst [vmem:[#allocation14_spill] sm:$0xff] %v7859_v51  ;;  %v7863_v23 = vunpack.c.l.b16 %v3911_v25  ;;  %v2870_v47 = vadd.f32 %v7725_v30, %v9444_v46  ;;  %v6010_v25 = vor.u32 %v6889_v17, %v6007_v43  ;;  %v5886_v13 = vor.u32 %v6860_v62, %v5885_v9  ;;  %v5871_v17 = vld [vmem:[#allocation4 + $0x338] sm:$0xf0]  ;;  %v6149_v62 = vld [vmem:[#allocation4 + $0x560] sm:$0xf] }
 0x3c8   :  { %9443 = vst [vmem:[#allocation49_spill] sm:$0xff] %v7863_v23 }
 0x3c9   :  { %v3600_v11 = vpop.f32.mrf.mxu0 }
 0x3ca   :  { %v3601_v50 = vadd.f32 %v3600_v11, %v3232_v37 }
 0x3cb   :  { %v7869_v28 = vpop.f32.mrf.mxu2 }
 0x3cc   :  { %v3238_v10 = vpop.f32.mrf.mxu3  ;;  %3639 = vmatmul.bf16.gmra.mxu0 %v5858_v16  ;;  %v3912_v37 = vpack.c.bf16 %v3601_v50, %v3601_v50 }
 0x3cd   :  { %v3239_v51 = vadd.f32 %v3238_v10, %v2870_v47  ;;  %v7871_v15 = vpop.f32.mrf.mxu1  ;;  %v6023_v10 = vld [vmem:[#allocation4 + $0x470] sm:$0xf0] }
 0x3ce   :  { %v7879_v43 = vunpack.c.l.b16 %v3912_v37  ;;  %v6150_v37 = vor.u32 %v6927_v21, %v6149_v62  ;;  %v6858_v21 = vld [vmem:[#allocation4 + $0x34c] sm:$0xf] }
 0x3d0   :  { %2622 = vmatmul.bf16.gmra.mxu1 %v6134_v20  ;;  %2951 = vmatmul.bf16.gmra.mxu2 %v6010_v25  ;;  %9445 = vst [vmem:[#allocation16_spill] sm:$0xff] %v7879_v43  ;;  %v5901_v25 = vld [vmem:[#allocation4 + $0x368] sm:$0xf]  ;;  %v2878_v43 = vadd.f32 %v7749_v4, %v7601_v26  ;;  %v6931_v26 = vld [vmem:[#allocation4 + $0x58c] sm:$0xf0] }
 0x3d1   :  { %3280 = vmatmul.bf16.gmra.mxu3 %v5886_v13  ;;  %v3602_v38 = vpop.f32.mrf.mxu0  ;;  %v6897_v4 = vld [vmem:[#allocation4 + $0x484] sm:$0xf] }
 0x3d2   :  { %v3603_v11 = vadd.f32 %v3602_v38, %v3234_v2  ;;  %v5874_v2 = vor.u32 %v6854_v57, %v5871_v17 }
 0x3d3   :  { %v7875_v30 = vpop.f32.mrf.mxu2 }
 0x3d4   :  { %v3913_v46 = vpack.c.bf16 %v3603_v11, %v3603_v11  ;;  %v3241_v23 = vpop.f32.mrf.mxu3  ;;  %v6026_v11 = vor.u32 %v6893_v18, %v6023_v10  ;;  %v5887_v18 = vld [vmem:[#allocation4 + $0x358] sm:$0xf0] }
 0x3d5   :  { %v3242_v16 = vadd.f32 %v3241_v23, %v2873_v52  ;;  %v7877_v22 = vpop.f32.mrf.mxu1  ;;  %v6864_v52 = vld [vmem:[#allocation4 + $0x374] sm:$0xf0]  ;;  %v2875_v23 = vadd.f32 %v7743_v3, %v7589_v0 }
 0x3d6   :  { %v7881_v9 = vunpack.c.l.b16 %v3913_v46  ;;  %v5902_v57 = vor.u32 %v6864_v52, %v5901_v25  ;;  %v6165_v52 = vld [vmem:[#allocation4 + $0x580] sm:$0xf] }
 0x3d8   :  { %9446 = vst [vmem:[#allocation50_spill] sm:$0xff] %v7881_v9 }
 0x3d9   :  { %v3605_v47 = vpop.f32.mrf.mxu0 }
 0x3da   :  { %v3606_v20 = vadd.f32 %v3605_v47, %v3237_v42 }
 0x3db   :  { %v7887_v13 = vpop.f32.mrf.mxu2 }
 0x3dc   :  { %v3243_v38 = vpop.f32.mrf.mxu3  ;;  %3644 = vmatmul.bf16.gmra.mxu0 %v5874_v2  ;;  %v3914_v42 = vpack.c.bf16 %v3606_v20, %v3606_v20 }
 0x3dd   :  { %v3244_v46 = vadd.f32 %v3243_v38, %v2875_v23  ;;  %v7889_v50 = vpop.f32.mrf.mxu1  ;;  %v6039_v38 = vld [vmem:[#allocation4 + $0x490] sm:$0xf0] }
 0x3de   :  { %v7897_v10 = vunpack.c.l.b16 %v3914_v42  ;;  %v6166_v42 = vor.u32 %v6931_v26, %v6165_v52  ;;  %v6862_v26 = vld [vmem:[#allocation4 + $0x36c] sm:$0xf] }
 0x3e0   :  { %2627 = vmatmul.bf16.gmra.mxu1 %v6150_v37  ;;  %2956 = vmatmul.bf16.gmra.mxu2 %v6026_v11  ;;  %9447 = vst [vmem:[#allocation51_spill] sm:$0xff] %v7897_v10  ;;  %v5917_v11 = vld [vmem:[#allocation4 + $0x388] sm:$0xf]  ;;  %v2883_v10 = vadd.f32 %v7767_v27, %v7619_v19  ;;  %v6935_v19 = vld [vmem:[#allocation4 + $0x5ac] sm:$0xf0] }
 0x3e1   :  { %3285 = vmatmul.bf16.gmra.mxu3 %v5902_v57  ;;  %v3607_v17 = vpop.f32.mrf.mxu0  ;;  %v6901_v27 = vld [vmem:[#allocation4 + $0x4a4] sm:$0xf] }
 0x3e2   :  { %v3608_v47 = vadd.f32 %v3607_v17, %v3239_v51  ;;  %v5890_v51 = vor.u32 %v6858_v21, %v5887_v18 }
 0x3e3   :  { %v7893_v0 = vpop.f32.mrf.mxu2 }
 0x3e4   :  { %v3915_v3 = vpack.c.bf16 %v3608_v47, %v3608_v47  ;;  %v3246_v9 = vpop.f32.mrf.mxu3  ;;  %v6042_v47 = vor.u32 %v6897_v4, %v6039_v38  ;;  %v5903_v4 = vld [vmem:[#allocation4 + $0x378] sm:$0xf0] }
 0x3e5   :  { %v3247_v2 = vadd.f32 %v3246_v9, %v2878_v43  ;;  %v7895_v62 = vpop.f32.mrf.mxu1  ;;  %v6868_v43 = vld [vmem:[#allocation4 + $0x394] sm:$0xf0]  ;;  %v2880_v9 = vadd.f32 %v7761_v35, %v7607_v49 }
 0x3e6   :  { %v7899_v25 = vunpack.c.l.b16 %v3915_v3  ;;  %v5918_v21 = vor.u32 %v6868_v43, %v5917_v11  ;;  %v6181_v43 = vld [vmem:[#allocation4 + $0x5a0] sm:$0xf] }
 0x3e8   :  { %9448 = vst [vmem:[#allocation52_spill] sm:$0xff] %v7899_v25 }
 0x3e9   :  { %v3610_v23 = vpop.f32.mrf.mxu0 }
 0x3ea   :  { %v3611_v37 = vadd.f32 %v3610_v23, %v3242_v16 }
 0x3eb   :  { %v7905_v57 = vpop.f32.mrf.mxu2 }
 0x3ec   :  { %v3248_v17 = vpop.f32.mrf.mxu3  ;;  %3649 = vmatmul.bf16.gmra.mxu0 %v5890_v51  ;;  %v3916_v16 = vpack.c.bf16 %v3611_v37, %v3611_v37 }
 0x3ed   :  { %v3249_v3 = vadd.f32 %v3248_v17, %v2880_v9  ;;  %v7907_v20 = vpop.f32.mrf.mxu1  ;;  %v6055_v17 = vld [vmem:[#allocation4 + $0x4b0] sm:$0xf0] }
 0x3ee   :  { %v7915_v38 = vunpack.c.l.b16 %v3916_v16  ;;  %v6182_v16 = vor.u32 %v6935_v19, %v6181_v43  ;;  %v6866_v19 = vld [vmem:[#allocation4 + $0x38c] sm:$0xf] }
 0x3f0   :  { %2632 = vmatmul.bf16.gmra.mxu1 %v6166_v42  ;;  %2961 = vmatmul.bf16.gmra.mxu2 %v6042_v47  ;;  %9449 = vst [vmem:[#allocation53_spill] sm:$0xff] %v7915_v38  ;;  %v5933_v47 = vld [vmem:[#allocation4 + $0x3a8] sm:$0xf]  ;;  %v2888_v38 = vadd.f32 %v7785_v5, %v7637_v45  ;;  %v6939_v45 = vld [vmem:[#allocation4 + $0x5cc] sm:$0xf0] }
 0x3f1   :  { %3290 = vmatmul.bf16.gmra.mxu3 %v5918_v21  ;;  %v3612_v18 = vpop.f32.mrf.mxu0  ;;  %v6905_v5 = vld [vmem:[#allocation4 + $0x4c4] sm:$0xf] }
 0x3f2   :  { %v3613_v23 = vadd.f32 %v3612_v18, %v3244_v46  ;;  %v5906_v46 = vor.u32 %v6862_v26, %v5903_v4 }
 0x3f3   :  { %v7911_v49 = vpop.f32.mrf.mxu2 }
 0x3f4   :  { %v3917_v35 = vpack.c.bf16 %v3613_v23, %v3613_v23  ;;  %v3251_v25 = vpop.f32.mrf.mxu3  ;;  %v6058_v23 = vor.u32 %v6901_v27, %v6055_v17  ;;  %v5919_v27 = vld [vmem:[#allocation4 + $0x398] sm:$0xf0] }
 0x3f5   :  { %v3252_v51 = vadd.f32 %v3251_v25, %v2883_v10  ;;  %v7913_v52 = vpop.f32.mrf.mxu1  ;;  %v6872_v10 = vld [vmem:[#allocation4 + $0x3b4] sm:$0xf0]  ;;  %v2885_v25 = vadd.f32 %v7779_v1, %v7625_v60 }
 0x3f6   :  { %v7917_v11 = vunpack.c.l.b16 %v3917_v35  ;;  %v5934_v26 = vor.u32 %v6872_v10, %v5933_v47  ;;  %v6197_v10 = vld [vmem:[#allocation4 + $0x5c0] sm:$0xf] }
 0x3f8   :  { %9450 = vst [vmem:[#allocation54_spill] sm:$0xff] %v7917_v11 }
 0x3f9   :  { %v3615_v9 = vpop.f32.mrf.mxu0 }
 0x3fa   :  { %v3616_v42 = vadd.f32 %v3615_v9, %v3247_v2 }
 0x3fb   :  { %v7923_v21 = vpop.f32.mrf.mxu2 }
 0x3fc   :  { %v3253_v18 = vpop.f32.mrf.mxu3  ;;  %3654 = vmatmul.bf16.gmra.mxu0 %v5906_v46  ;;  %v3918_v2 = vpack.c.bf16 %v3616_v42, %v3616_v42 }
 0x3fd   :  { %v3254_v35 = vadd.f32 %v3253_v18, %v2885_v25  ;;  %v7925_v37 = vpop.f32.mrf.mxu1  ;;  %v6071_v18 = vld [vmem:[#allocation4 + $0x4d0] sm:$0xf0] }
 0x3fe   :  { %v7933_v17 = vunpack.c.l.b16 %v3918_v2  ;;  %v6198_v2 = vor.u32 %v6939_v45, %v6197_v10  ;;  %v6870_v45 = vld [vmem:[#allocation4 + $0x3ac] sm:$0xf] }
 0x400   :  { %2637 = vmatmul.bf16.gmra.mxu1 %v6182_v16  ;;  %2966 = vmatmul.bf16.gmra.mxu2 %v6058_v23  ;;  %9451 = vst [vmem:[#allocation55_spill] sm:$0xff] %v7933_v17  ;;  %v5949_v23 = vld [vmem:[#allocation4 + $0x3c8] sm:$0xf]  ;;  %v2893_v17 = vadd.f32 %v7803_v32, %v7655_v36  ;;  %v6943_v36 = vld [vmem:[#allocation4 + $0x5ec] sm:$0xf0] }
 0x401   :  { %3295 = vmatmul.bf16.gmra.mxu3 %v5934_v26  ;;  %v3617_v4 = vpop.f32.mrf.mxu0  ;;  %v6909_v32 = vld [vmem:[#allocation4 + $0x4e4] sm:$0xf] }
 0x402   :  { %v3618_v9 = vadd.f32 %v3617_v4, %v3249_v3  ;;  %v5922_v3 = vor.u32 %v6866_v19, %v5919_v27 }
 0x403   :  { %v7929_v60 = vpop.f32.mrf.mxu2 }
 0x404   :  { %v3919_v1 = vpack.c.bf16 %v3618_v9, %v3618_v9  ;;  %v3256_v11 = vpop.f32.mrf.mxu3  ;;  %v6074_v9 = vor.u32 %v6905_v5, %v6071_v18  ;;  %v5935_v5 = vld [vmem:[#allocation4 + $0x3b8] sm:$0xf0] }
 0x405   :  { %v3257_v46 = vadd.f32 %v3256_v11, %v2888_v38  ;;  %v7931_v43 = vpop.f32.mrf.mxu1  ;;  %v6876_v38 = vld [vmem:[#allocation4 + $0x3d4] sm:$0xf0]  ;;  %v2890_v11 = vadd.f32 %v7797_v24, %v7643_v14 }
 0x406   :  { %v7935_v47 = vunpack.c.l.b16 %v3919_v1  ;;  %v5950_v19 = vor.u32 %v6876_v38, %v5949_v23  ;;  %v6213_v38 = vld [vmem:[#allocation4 + $0x5e0] sm:$0xf] }
 0x408   :  { %9452 = vst [vmem:[#allocation56_spill] sm:$0xff] %v7935_v47 }
 0x409   :  { %v3620_v25 = vpop.f32.mrf.mxu0 }
 0x40a   :  { %v3621_v16 = vadd.f32 %v3620_v25, %v3252_v51 }
 0x40b   :  { %v7941_v26 = vpop.f32.mrf.mxu2 }
 0x40c   :  { %v3258_v4 = vpop.f32.mrf.mxu3  ;;  %3659 = vmatmul.bf16.gmra.mxu0 %v5922_v3  ;;  %v3920_v51 = vpack.c.bf16 %v3621_v16, %v3621_v16 }
 0x40d   :  { %v3259_v1 = vadd.f32 %v3258_v4, %v2890_v11  ;;  %v7943_v42 = vpop.f32.mrf.mxu1  ;;  %v6087_v4 = vld [vmem:[#allocation4 + $0x4f0] sm:$0xf0] }
 0x40e   :  { %v7951_v18 = vunpack.c.l.b16 %v3920_v51  ;;  %v6214_v51 = vor.u32 %v6943_v36, %v6213_v38  ;;  %v6874_v36 = vld [vmem:[#allocation4 + $0x3cc] sm:$0xf] }
 0x410   :  { %2642 = vmatmul.bf16.gmra.mxu1 %v6198_v2  ;;  %2971 = vmatmul.bf16.gmra.mxu2 %v6074_v9  ;;  %9453 = vst [vmem:[#allocation57_spill] sm:$0xff] %v7951_v18  ;;  %v5965_v9 = vld [vmem:[#allocation4 + $0x3e8] sm:$0xf]  ;;  %v2898_v18 = vadd.f32 %v7821_v59, %v7673_v54  ;;  %v6947_v54 = vld [vmem:[#allocation4 + $0x60c] sm:$0xf0] }
 0x411   :  { %3300 = vmatmul.bf16.gmra.mxu3 %v5950_v19  ;;  %v3622_v27 = vpop.f32.mrf.mxu0  ;;  %v6913_v59 = vld [vmem:[#allocation4 + $0x504] sm:$0xf] }
 0x412   :  { %v3623_v25 = vadd.f32 %v3622_v27, %v3254_v35  ;;  %v5938_v35 = vor.u32 %v6870_v45, %v5935_v5 }
 0x413   :  { %v7947_v14 = vpop.f32.mrf.mxu2 }
 0x414   :  { %v3921_v24 = vpack.c.bf16 %v3623_v25, %v3623_v25  ;;  %v3261_v47 = vpop.f32.mrf.mxu3  ;;  %v6090_v25 = vor.u32 %v6909_v32, %v6087_v4  ;;  %v5951_v32 = vld [vmem:[#allocation4 + $0x3d8] sm:$0xf0] }
 0x415   :  { %v3262_v3 = vadd.f32 %v3261_v47, %v2893_v17  ;;  %v7949_v10 = vpop.f32.mrf.mxu1  ;;  %v6880_v17 = vld [vmem:[#allocation4 + $0x3f4] sm:$0xf0]  ;;  %v2895_v47 = vadd.f32 %v7815_v48, %v7661_v7 }
 0x416   :  { %v7953_v23 = vunpack.c.l.b16 %v3921_v24  ;;  %v5966_v45 = vor.u32 %v6880_v17, %v5965_v9  ;;  %v6229_v17 = vld [vmem:[#allocation4 + $0x600] sm:$0xf] }
 0x418   :  { %9454 = vst [vmem:[#allocation58_spill] sm:$0xff] %v7953_v23 }
 0x419   :  { %v3625_v11 = vpop.f32.mrf.mxu0 }
 0x41a   :  { %v3626_v2 = vadd.f32 %v3625_v11, %v3257_v46 }
 0x41b   :  { %v7959_v19 = vpop.f32.mrf.mxu2 }
 0x41c   :  { %v3263_v27 = vpop.f32.mrf.mxu3  ;;  %3664 = vmatmul.bf16.gmra.mxu0 %v5938_v35  ;;  %v3922_v46 = vpack.c.bf16 %v3626_v2, %v3626_v2 }
 0x41d   :  { %v3264_v24 = vadd.f32 %v3263_v27, %v2895_v47  ;;  %v7961_v16 = vpop.f32.mrf.mxu1  ;;  %v6103_v27 = vld [vmem:[#allocation4 + $0x510] sm:$0xf0] }
 0x41e   :  { %v7969_v4 = vunpack.c.l.b16 %v3922_v46  ;;  %v6230_v46 = vor.u32 %v6947_v54, %v6229_v17  ;;  %v6878_v54 = vld [vmem:[#allocation4 + $0x3ec] sm:$0xf] }
 0x420   :  { %2647 = vmatmul.bf16.gmra.mxu1 %v6214_v51  ;;  %2976 = vmatmul.bf16.gmra.mxu2 %v6090_v25  ;;  %9455 = vst [vmem:[#allocation59_spill] sm:$0xff] %v7969_v4  ;;  %v5981_v25 = vld [vmem:[#allocation4 + $0x408] sm:$0xf]  ;;  %v2903_v4 = vadd.f32 %v7839_v8, %v7691_v39  ;;  %v6951_v39 = vld [vmem:[#allocation4 + $0x62c] sm:$0xf0] }
 0x421   :  { %3305 = vmatmul.bf16.gmra.mxu3 %v5966_v45  ;;  %v3627_v5 = vpop.f32.mrf.mxu0  ;;  %v6917_v8 = vld [vmem:[#allocation4 + $0x524] sm:$0xf] }
 0x422   :  { %v3628_v11 = vadd.f32 %v3627_v5, %v3259_v1  ;;  %v5954_v1 = vor.u32 %v6874_v36, %v5951_v32 }
 0x423   :  { %v7965_v7 = vpop.f32.mrf.mxu2 }
 0x424   :  { %v3923_v48 = vpack.c.bf16 %v3628_v11, %v3628_v11  ;;  %v3266_v23 = vpop.f32.mrf.mxu3  ;;  %v6106_v11 = vor.u32 %v6913_v59, %v6103_v27  ;;  %v5967_v59 = vld [vmem:[#allocation4 + $0x3f8] sm:$0xf0] }
 0x425   :  { %v3267_v35 = vadd.f32 %v3266_v23, %v2898_v18  ;;  %v7967_v38 = vpop.f32.mrf.mxu1  ;;  %v6884_v18 = vld [vmem:[#allocation4 + $0x414] sm:$0xf0]  ;;  %v2900_v23 = vadd.f32 %v7833_v63, %v7679_v61 }
 0x426   :  { %v7971_v9 = vunpack.c.l.b16 %v3923_v48  ;;  %v5982_v36 = vor.u32 %v6884_v18, %v5981_v25  ;;  %v6245_v18 = vld [vmem:[#allocation4 + $0x620] sm:$0xf] }
 0x428   :  { %9456 = vst [vmem:[#allocation60_spill] sm:$0xff] %v7971_v9 }
 0x429   :  { %v3630_v47 = vpop.f32.mrf.mxu0 }
 0x42a   :  { %v3631_v51 = vadd.f32 %v3630_v47, %v3262_v3 }
 0x42b   :  { %v7977_v45 = vpop.f32.mrf.mxu2 }
 0x42c   :  { %v3268_v5 = vpop.f32.mrf.mxu3  ;;  %3669 = vmatmul.bf16.gmra.mxu0 %v5954_v1  ;;  %v3924_v3 = vpack.c.bf16 %v3631_v51, %v3631_v51 }
 0x42d   :  { %v3269_v48 = vadd.f32 %v3268_v5, %v2900_v23  ;;  %v7979_v2 = vpop.f32.mrf.mxu1  ;;  %v6119_v5 = vld [vmem:[#allocation4 + $0x530] sm:$0xf0] }
 0x42e   :  { %v7987_v27 = vunpack.c.l.b16 %v3924_v3  ;;  %v6246_v3 = vor.u32 %v6951_v39, %v6245_v18  ;;  %v6882_v39 = vld [vmem:[#allocation4 + $0x40c] sm:$0xf] }
 0x430   :  { %2652 = vmatmul.bf16.gmra.mxu1 %v6230_v46  ;;  %2981 = vmatmul.bf16.gmra.mxu2 %v6106_v11  ;;  %9457 = vst [vmem:[#allocation61_spill] sm:$0xff] %v7987_v27  ;;  %v5997_v11 = vld [vmem:[#allocation4 + $0x428] sm:$0xf]  ;;  %v2908_v27 = vadd.f32 %v7857_v34, %v7709_v40  ;;  %v6955_v40 = vld [vmem:[#allocation4 + $0x64c] sm:$0xf0] }
 0x431   :  { %3310 = vmatmul.bf16.gmra.mxu3 %v5982_v36  ;;  %v3632_v32 = vpop.f32.mrf.mxu0  ;;  %v6921_v34 = vld [vmem:[#allocation4 + $0x544] sm:$0xf] }
 0x432   :  { %v3633_v47 = vadd.f32 %v3632_v32, %v3264_v24  ;;  %v5970_v24 = vor.u32 %v6878_v54, %v5967_v59 }
 0x433   :  { %v7983_v61 = vpop.f32.mrf.mxu2 }
 0x434   :  { %v3925_v63 = vpack.c.bf16 %v3633_v47, %v3633_v47  ;;  %v3271_v9 = vpop.f32.mrf.mxu3  ;;  %v6122_v47 = vor.u32 %v6917_v8, %v6119_v5  ;;  %v5983_v8 = vld [vmem:[#allocation4 + $0x418] sm:$0xf0] }
 0x435   :  { %v3272_v1 = vadd.f32 %v3271_v9, %v2903_v4  ;;  %v7985_v17 = vpop.f32.mrf.mxu1  ;;  %v6888_v4 = vld [vmem:[#allocation4 + $0x434] sm:$0xf0]  ;;  %v2905_v9 = vadd.f32 %v7851_v12, %v7697_v6 }
 0x436   :  { %v7989_v25 = vunpack.c.l.b16 %v3925_v63  ;;  %v5998_v54 = vor.u32 %v6888_v4, %v5997_v11  ;;  %v6261_v4 = vld [vmem:[#allocation4 + $0x640] sm:$0xf] }
 0x438   :  { %9458 = vst [vmem:[#allocation62_spill] sm:$0xff] %v7989_v25 }
 0x439   :  { %v3635_v23 = vpop.f32.mrf.mxu0 }
 0x43a   :  { %v3636_v46 = vadd.f32 %v3635_v23, %v3267_v35 }
 0x43b   :  { %v7995_v36 = vpop.f32.mrf.mxu2 }
 0x43c   :  { %v3273_v32 = vpop.f32.mrf.mxu3  ;;  %3674 = vmatmul.bf16.gmra.mxu0 %v5970_v24  ;;  %v3926_v35 = vpack.c.bf16 %v3636_v46, %v3636_v46 }
 0x43d   :  { %v3274_v63 = vadd.f32 %v3273_v32, %v2905_v9  ;;  %v7997_v51 = vpop.f32.mrf.mxu1  ;;  %v6135_v32 = vld [vmem:[#allocation4 + $0x550] sm:$0xf0] }
 0x43e   :  { %v8005_v5 = vunpack.c.l.b16 %v3926_v35  ;;  %v6262_v35 = vor.u32 %v6955_v40, %v6261_v4  ;;  %v6886_v40 = vld [vmem:[#allocation4 + $0x42c] sm:$0xf] }
 0x440   :  { %2657 = vmatmul.bf16.gmra.mxu1 %v6246_v3  ;;  %2986 = vmatmul.bf16.gmra.mxu2 %v6122_v47  ;;  %9459 = vst [vmem:[#allocation63_spill] sm:$0xff] %v8005_v5  ;;  %v6013_v47 = vld [vmem:[#allocation4 + $0x448] sm:$0xf]  ;;  %v2913_v5 = vadd.f32 %v7875_v30, %v7727_v53  ;;  %v6959_v53 = vld [vmem:[#allocation4 + $0x66c] sm:$0xf0] }
 0x441   :  { %3315 = vmatmul.bf16.gmra.mxu3 %v5998_v54  ;;  %v3637_v59 = vpop.f32.mrf.mxu0  ;;  %v6925_v30 = vld [vmem:[#allocation4 + $0x564] sm:$0xf] }
 0x442   :  { %v3638_v23 = vadd.f32 %v3637_v59, %v3269_v48  ;;  %v5986_v48 = vor.u32 %v6882_v39, %v5983_v8 }
 0x443   :  { %v8001_v6 = vpop.f32.mrf.mxu2 }
 0x444   :  { %v3927_v12 = vpack.c.bf16 %v3638_v23, %v3638_v23  ;;  %v3276_v25 = vpop.f32.mrf.mxu3  ;;  %v6138_v23 = vor.u32 %v6921_v34, %v6135_v32  ;;  %v5999_v34 = vld [vmem:[#allocation4 + $0x438] sm:$0xf0] }
 0x445   :  { %v3277_v24 = vadd.f32 %v3276_v25, %v2908_v27  ;;  %v8003_v18 = vpop.f32.mrf.mxu1  ;;  %v6892_v27 = vld [vmem:[#allocation4 + $0x454] sm:$0xf0]  ;;  %v2910_v25 = vadd.f32 %v7869_v28, %v7715_v56 }
 0x446   :  { %v8007_v11 = vunpack.c.l.b16 %v3927_v12  ;;  %v6014_v39 = vor.u32 %v6892_v27, %v6013_v47  ;;  %v6277_v27 = vld [vmem:[#allocation4 + $0x660] sm:$0xf] }
 0x448   :  { %9460 = vst [vmem:[#allocation64_spill] sm:$0xff] %v8007_v11 }
 0x449   :  { %v3640_v9 = vpop.f32.mrf.mxu0 }
 0x44a   :  { %v3641_v3 = vadd.f32 %v3640_v9, %v3272_v1 }
 0x44b   :  { %v8013_v54 = vpop.f32.mrf.mxu2 }
 0x44c   :  { %v3278_v59 = vpop.f32.mrf.mxu3  ;;  %3679 = vmatmul.bf16.gmra.mxu0 %v5986_v48  ;;  %v3928_v1 = vpack.c.bf16 %v3641_v3, %v3641_v3 }
 0x44d   :  { %v3279_v12 = vadd.f32 %v3278_v59, %v2910_v25  ;;  %v8015_v46 = vpop.f32.mrf.mxu1  ;;  %v6151_v59 = vld [vmem:[#allocation4 + $0x570] sm:$0xf0] }
 0x44e   :  { %v8023_v32 = vunpack.c.l.b16 %v3928_v1  ;;  %v6278_v1 = vor.u32 %v6959_v53, %v6277_v27  ;;  %v6890_v53 = vld [vmem:[#allocation4 + $0x44c] sm:$0xf] }
 0x450   :  { %2662 = vmatmul.bf16.gmra.mxu1 %v6262_v35  ;;  %2991 = vmatmul.bf16.gmra.mxu2 %v6138_v23  ;;  %9461 = vst [vmem:[#allocation65_spill] sm:$0xff] %v8023_v32  ;;  %v6029_v23 = vld [vmem:[#allocation4 + $0x468] sm:$0xf]  ;;  %v2918_v32 = vadd.f32 %v7893_v0, %v7745_v33  ;;  %v6963_v33 = vld [vmem:[#allocation4 + $0x68c] sm:$0xf0] }
 0x451   :  { %3320 = vmatmul.bf16.gmra.mxu3 %v6014_v39  ;;  %v3642_v8 = vpop.f32.mrf.mxu0  ;;  %v6929_v0 = vld [vmem:[#allocation4 + $0x584] sm:$0xf] }
 0x452   :  { %v3643_v9 = vadd.f32 %v3642_v8, %v3274_v63  ;;  %v6002_v63 = vor.u32 %v6886_v40, %v5999_v34 }
 0x453   :  { %v8019_v56 = vpop.f32.mrf.mxu2 }
 0x454   :  { %v3929_v28 = vpack.c.bf16 %v3643_v9, %v3643_v9  ;;  %v3281_v11 = vpop.f32.mrf.mxu3  ;;  %v6154_v9 = vor.u32 %v6925_v30, %v6151_v59  ;;  %v6015_v30 = vld [vmem:[#allocation4 + $0x458] sm:$0xf0] }
 0x455   :  { %v3282_v48 = vadd.f32 %v3281_v11, %v2913_v5  ;;  %v8021_v4 = vpop.f32.mrf.mxu1  ;;  %v6896_v5 = vld [vmem:[#allocation4 + $0x474] sm:$0xf0]  ;;  %v2915_v11 = vadd.f32 %v7887_v13, %v7733_v29 }
 0x456   :  { %v8025_v47 = vunpack.c.l.b16 %v3929_v28  ;;  %v6030_v40 = vor.u32 %v6896_v5, %v6029_v23  ;;  %v6293_v5 = vld [vmem:[#allocation4 + $0x680] sm:$0xf] }
 0x458   :  { %9462 = vst [vmem:[#allocation66_spill] sm:$0xff] %v8025_v47 }
 0x459   :  { %v3645_v25 = vpop.f32.mrf.mxu0 }
 0x45a   :  { %v3646_v35 = vadd.f32 %v3645_v25, %v3277_v24 }
 0x45b   :  { %v8031_v39 = vpop.f32.mrf.mxu2 }
 0x45c   :  { %v3283_v8 = vpop.f32.mrf.mxu3  ;;  %3684 = vmatmul.bf16.gmra.mxu0 %v6002_v63  ;;  %v3930_v24 = vpack.c.bf16 %v3646_v35, %v3646_v35 }
 0x45d   :  { %v3284_v28 = vadd.f32 %v3283_v8, %v2915_v11  ;;  %v8033_v3 = vpop.f32.mrf.mxu1  ;;  %v6167_v8 = vld [vmem:[#allocation4 + $0x590] sm:$0xf0] }
 0x45e   :  { %v8041_v59 = vunpack.c.l.b16 %v3930_v24  ;;  %v6294_v24 = vor.u32 %v6963_v33, %v6293_v5  ;;  %v6894_v33 = vld [vmem:[#allocation4 + $0x46c] sm:$0xf] }
 0x460   :  { %2667 = vmatmul.bf16.gmra.mxu1 %v6278_v1  ;;  %2996 = vmatmul.bf16.gmra.mxu2 %v6154_v9  ;;  %9463 = vst [vmem:[#allocation67_spill] sm:$0xff] %v8041_v59  ;;  %v6045_v9 = vld [vmem:[#allocation4 + $0x488] sm:$0xf]  ;;  %v2923_v59 = vadd.f32 %v7911_v49, %v7763_v44  ;;  %v6967_v44 = vld [vmem:[#allocation4 + $0x6ac] sm:$0xf0] }
 0x461   :  { %3325 = vmatmul.bf16.gmra.mxu3 %v6030_v40  ;;  %v3647_v34 = vpop.f32.mrf.mxu0  ;;  %v6933_v49 = vld [vmem:[#allocation4 + $0x5a4] sm:$0xf] }
 0x462   :  { %v3648_v25 = vadd.f32 %v3647_v34, %v3279_v12  ;;  %v6018_v12 = vor.u32 %v6890_v53, %v6015_v30 }
 0x463   :  { %v8037_v29 = vpop.f32.mrf.mxu2 }
 0x464   :  { %v3931_v13 = vpack.c.bf16 %v3648_v25, %v3648_v25  ;;  %v3286_v47 = vpop.f32.mrf.mxu3  ;;  %v6170_v25 = vor.u32 %v6929_v0, %v6167_v8  ;;  %v6031_v0 = vld [vmem:[#allocation4 + $0x478] sm:$0xf0] }
 0x465   :  { %v3287_v63 = vadd.f32 %v3286_v47, %v2918_v32  ;;  %v8039_v27 = vpop.f32.mrf.mxu1  ;;  %v6900_v32 = vld [vmem:[#allocation4 + $0x494] sm:$0xf0]  ;;  %v2920_v47 = vadd.f32 %v7905_v57, %v7751_v58 }
 0x466   :  { %v8043_v23 = vunpack.c.l.b16 %v3931_v13  ;;  %v6046_v53 = vor.u32 %v6900_v32, %v6045_v9  ;;  %v6309_v32 = vld [vmem:[#allocation4 + $0x6a0] sm:$0xf] }
 0x468   :  { %9464 = vst [vmem:[#allocation68_spill] sm:$0xff] %v8043_v23 }
 0x469   :  { %v3650_v11 = vpop.f32.mrf.mxu0 }
 0x46a   :  { %v3651_v1 = vadd.f32 %v3650_v11, %v3282_v48 }
 0x46b   :  { %v8049_v40 = vpop.f32.mrf.mxu2 }
 0x46c   :  { %v3288_v34 = vpop.f32.mrf.mxu3  ;;  %3689 = vmatmul.bf16.gmra.mxu0 %v6018_v12  ;;  %v3932_v48 = vpack.c.bf16 %v3651_v1, %v3651_v1 }
 0x46d   :  { %v3289_v13 = vadd.f32 %v3288_v34, %v2920_v47  ;;  %v8051_v35 = vpop.f32.mrf.mxu1  ;;  %v6183_v34 = vld [vmem:[#allocation4 + $0x5b0] sm:$0xf0] }
 0x46e   :  { %v8059_v8 = vunpack.c.l.b16 %v3932_v48  ;;  %v6310_v48 = vor.u32 %v6967_v44, %v6309_v32  ;;  %v6898_v44 = vld [vmem:[#allocation4 + $0x48c] sm:$0xf] }
 0x470   :  { %2672 = vmatmul.bf16.gmra.mxu1 %v6294_v24  ;;  %3001 = vmatmul.bf16.gmra.mxu2 %v6170_v25  ;;  %9465 = vst [vmem:[#allocation69_spill] sm:$0xff] %v8059_v8  ;;  %v6061_v25 = vld [vmem:[#allocation4 + $0x4a8] sm:$0xf]  ;;  %v2928_v8 = vadd.f32 %v7929_v60, %v7781_v55  ;;  %v6971_v55 = vld [vmem:[#allocation4 + $0x6cc] sm:$0xf0] }
 0x471   :  { %3330 = vmatmul.bf16.gmra.mxu3 %v6046_v53  ;;  %v3652_v30 = vpop.f32.mrf.mxu0  ;;  %v6937_v60 = vld [vmem:[#allocation4 + $0x5c4] sm:$0xf] }
 0x472   :  { %v3653_v11 = vadd.f32 %v3652_v30, %v3284_v28  ;;  %v6034_v28 = vor.u32 %v6894_v33, %v6031_v0 }
 0x473   :  { %v8055_v58 = vpop.f32.mrf.mxu2 }
 0x474   :  { %v3933_v57 = vpack.c.bf16 %v3653_v11, %v3653_v11  ;;  %v3291_v23 = vpop.f32.mrf.mxu3  ;;  %v6186_v11 = vor.u32 %v6933_v49, %v6183_v34  ;;  %v6047_v49 = vld [vmem:[#allocation4 + $0x498] sm:$0xf0] }
 0x475   :  { %v3292_v12 = vadd.f32 %v3291_v23, %v2923_v59  ;;  %v8057_v5 = vpop.f32.mrf.mxu1  ;;  %v6904_v59 = vld [vmem:[#allocation4 + $0x4b4] sm:$0xf0]  ;;  %v2925_v23 = vadd.f32 %v7923_v21, %v7769_v31 }
 0x476   :  { %v8061_v9 = vunpack.c.l.b16 %v3933_v57  ;;  %v6062_v33 = vor.u32 %v6904_v59, %v6061_v25  ;;  %v6325_v59 = vld [vmem:[#allocation4 + $0x6c0] sm:$0xf] }
 0x478   :  { %9466 = vst [vmem:[#allocation70_spill] sm:$0xff] %v8061_v9 }
 0x479   :  { %v3655_v47 = vpop.f32.mrf.mxu0 }
 0x47a   :  { %v3656_v24 = vadd.f32 %v3655_v47, %v3287_v63 }
 0x47b   :  { %v8067_v53 = vpop.f32.mrf.mxu2 }
 0x47c   :  { %v3293_v30 = vpop.f32.mrf.mxu3  ;;  %3694 = vmatmul.bf16.gmra.mxu0 %v6034_v28  ;;  %v3934_v63 = vpack.c.bf16 %v3656_v24, %v3656_v24 }
 0x47d   :  { %v3294_v57 = vadd.f32 %v3293_v30, %v2925_v23  ;;  %v8069_v1 = vpop.f32.mrf.mxu1  ;;  %v6199_v30 = vld [vmem:[#allocation4 + $0x5d0] sm:$0xf0] }
 0x47e   :  { %9467 = vst [vmem:[#allocation71_spill] sm:$0xff] %v8069_v1  ;;  %v8077_v34 = vunpack.c.l.b16 %v3934_v63 }
 0x480   :  { %2677 = vmatmul.bf16.gmra.mxu1 %v6310_v48  ;;  %3006 = vmatmul.bf16.gmra.mxu2 %v6186_v11  ;;  %9469 = vst [vmem:[#allocation73_spill] sm:$0xff] %v8077_v34  ;;  %v6077_v11 = vld [vmem:[#allocation4 + $0x4c8] sm:$0xf]  ;;  %v9473_v34 = vld [vmem:[#allocation42_spill] sm:$0xff] }
 0x481   :  { %3335 = vmatmul.bf16.gmra.mxu3 %v6062_v33  ;;  %v3657_v0 = vpop.f32.mrf.mxu0 }
 0x482   :  { %v3658_v47 = vadd.f32 %v3657_v0, %v3289_v13  ;;  %v6050_v13 = vor.u32 %v6898_v44, %v6047_v49 }
 0x483   :  { %v8073_v31 = vpop.f32.mrf.mxu2 }
 0x484   :  { %v3935_v21 = vpack.c.bf16 %v3658_v47, %v3658_v47  ;;  %v3296_v9 = vpop.f32.mrf.mxu3  ;;  %v6326_v47 = vor.u32 %v6971_v55, %v6325_v59  ;;  %v6902_v55 = vld [vmem:[#allocation4 + $0x4ac] sm:$0xf] }
 0x485   :  { %v3297_v28 = vadd.f32 %v3296_v9, %v2928_v8  ;;  %v8075_v32 = vpop.f32.mrf.mxu1  ;;  %v6908_v8 = vld [vmem:[#allocation4 + $0x4d4] sm:$0xf0] }
 0x486   :  { %9468 = vst [vmem:[#allocation72_spill] sm:$0xff] %v8075_v32  ;;  %v8079_v25 = vunpack.c.l.b16 %v3935_v21  ;;  %v9471_v9 = vld [vmem:[#allocation39_spill] sm:$0xff]  ;;  %v6202_v21 = vor.u32 %v6937_v60, %v6199_v30  ;;  %v6078_v44 = vor.u32 %v6908_v8, %v6077_v11  ;;  %v6341_v8 = vld [vmem:[#allocation4 + $0x6e0] sm:$0xf] }
 0x487   :  { %v2930_v33 = vadd.f32 %v7941_v26, %v9471_v9  ;;  %v6063_v60 = vld [vmem:[#allocation4 + $0x4b8] sm:$0xf0] }
 0x488   :  { %9470 = vst [vmem:[#allocation74_spill] sm:$0xff] %v8079_v25  ;;  %v2933_v25 = vadd.f32 %v7947_v14, %v9473_v34  ;;  %v6975_v14 = vld [vmem:[#allocation4 + $0x6ec] sm:$0xf0]  ;;  %v6941_v34 = vld [vmem:[#allocation4 + $0x5e4] sm:$0xf] }
 0x489   :  { %v3660_v23 = vpop.f32.mrf.mxu0 }
 0x48a   :  { %v3661_v48 = vadd.f32 %v3660_v23, %v3292_v12 }
 0x48b   :  { %v8085_v0 = vpop.f32.mrf.mxu2 }
 0x48c   :  { %v3298_v63 = vpop.f32.mrf.mxu3  ;;  %3699 = vmatmul.bf16.gmra.mxu0 %v6050_v13  ;;  %v3936_v12 = vpack.c.bf16 %v3661_v48, %v3661_v48 }
 0x48d   :  { %v3299_v32 = vadd.f32 %v3298_v63, %v2930_v33  ;;  %v8087_v24 = vpop.f32.mrf.mxu1  ;;  %v6215_v63 = vld [vmem:[#allocation4 + $0x5f0] sm:$0xf0] }
 0x48e   :  { %9472 = vst [vmem:[#allocation39_spill] sm:$0xff] %v8087_v24  ;;  %v8095_v30 = vunpack.c.l.b16 %v3936_v12 }
 0x490   :  { %2682 = vmatmul.bf16.gmra.mxu1 %v6326_v47  ;;  %3011 = vmatmul.bf16.gmra.mxu2 %v6202_v21  ;;  %9475 = vst [vmem:[#allocation75_spill] sm:$0xff] %v8095_v30  ;;  %v6093_v21 = vld [vmem:[#allocation4 + $0x4e8] sm:$0xf]  ;;  %v9479_v30 = vld [vmem:[#allocation10_spill] sm:$0xff] }
 0x491   :  { %3340 = vmatmul.bf16.gmra.mxu3 %v6078_v44  ;;  %v3662_v49 = vpop.f32.mrf.mxu0 }
 0x492   :  { %v3663_v23 = vadd.f32 %v3662_v49, %v3294_v57  ;;  %v6066_v57 = vor.u32 %v6902_v55, %v6063_v60 }
 0x493   :  { %v8091_v26 = vpop.f32.mrf.mxu2 }
 0x494   :  { %v3937_v9 = vpack.c.bf16 %v3663_v23, %v3663_v23  ;;  %v3301_v1 = vpop.f32.mrf.mxu3  ;;  %v6342_v23 = vor.u32 %v6975_v14, %v6341_v8  ;;  %v6906_v14 = vld [vmem:[#allocation4 + $0x4cc] sm:$0xf] }
 0x495   :  { %v3302_v13 = vadd.f32 %v3301_v1, %v2933_v25  ;;  %v8093_v59 = vpop.f32.mrf.mxu1  ;;  %v6912_v1 = vld [vmem:[#allocation4 + $0x4f4] sm:$0xf0]  ;;  %v9477_v25 = vld [vmem:[#allocation9_spill] sm:$0xff] }
 0x496   :  { %9474 = vst [vmem:[#allocation42_spill] sm:$0xff] %v8093_v59  ;;  %v8097_v11 = vunpack.c.l.b16 %v3937_v9  ;;  %v2935_v44 = vadd.f32 %v7959_v19, %v9477_v25  ;;  %v6218_v9 = vor.u32 %v6941_v34, %v6215_v63  ;;  %v6094_v55 = vor.u32 %v6912_v1, %v6093_v21  ;;  %v6079_v34 = vld [vmem:[#allocation4 + $0x4d8] sm:$0xf0]  ;;  %v6357_v1 = vld [vmem:[#allocation4 + $0x700] sm:$0xf] }
 0x498   :  { %9476 = vst [vmem:[#allocation76_spill] sm:$0xff] %v8097_v11  ;;  %v2938_v11 = vadd.f32 %v7965_v7, %v9479_v30  ;;  %v6979_v7 = vld [vmem:[#allocation4 + $0x70c] sm:$0xf0]  ;;  %v6945_v30 = vld [vmem:[#allocation4 + $0x604] sm:$0xf] }
 0x499   :  { %v3665_v33 = vpop.f32.mrf.mxu0 }
 0x49a   :  { %v3666_v47 = vadd.f32 %v3665_v33, %v3297_v28 }
 0x49b   :  { %v8103_v49 = vpop.f32.mrf.mxu2 }
 0x49c   :  { %v3303_v12 = vpop.f32.mrf.mxu3  ;;  %3704 = vmatmul.bf16.gmra.mxu0 %v6066_v57  ;;  %v3938_v28 = vpack.c.bf16 %v3666_v47, %v3666_v47 }
 0x49d   :  { %v3304_v59 = vadd.f32 %v3303_v12, %v2935_v44  ;;  %v8105_v48 = vpop.f32.mrf.mxu1  ;;  %v6231_v12 = vld [vmem:[#allocation4 + $0x610] sm:$0xf0] }
 0x49e   :  { %9478 = vst [vmem:[#allocation9_spill] sm:$0xff] %v8105_v48  ;;  %v8113_v63 = vunpack.c.l.b16 %v3938_v28 }
 0x4a0   :  { %2687 = vmatmul.bf16.gmra.mxu1 %v6342_v23  ;;  %3016 = vmatmul.bf16.gmra.mxu2 %v6218_v9  ;;  %9481 = vst [vmem:[#allocation77_spill] sm:$0xff] %v8113_v63  ;;  %v6109_v9 = vld [vmem:[#allocation4 + $0x508] sm:$0xf]  ;;  %v9484_v63 = vld [vmem:[#allocation12_spill] sm:$0xff] }
 0x4a1   :  { %3345 = vmatmul.bf16.gmra.mxu3 %v6094_v55  ;;  %v3667_v60 = vpop.f32.mrf.mxu0 }
 0x4a2   :  { %v3668_v33 = vadd.f32 %v3667_v60, %v3299_v32  ;;  %v6082_v32 = vor.u32 %v6906_v14, %v6079_v34 }
 0x4a3   :  { %v8109_v19 = vpop.f32.mrf.mxu2 }
 0x4a4   :  { %v3939_v25 = vpack.c.bf16 %v3668_v33, %v3668_v33  ;;  %v3306_v24 = vpop.f32.mrf.mxu3  ;;  %v6358_v33 = vor.u32 %v6979_v7, %v6357_v1  ;;  %v6910_v7 = vld [vmem:[#allocation4 + $0x4ec] sm:$0xf] }
 0x4a5   :  { %v3307_v57 = vadd.f32 %v3306_v24, %v2938_v11  ;;  %v8111_v8 = vpop.f32.mrf.mxu1  ;;  %v6916_v24 = vld [vmem:[#allocation4 + $0x514] sm:$0xf0] }
 0x4a6   :  { %9480 = vst [vmem:[#allocation10_spill] sm:$0xff] %v8111_v8  ;;  %v8115_v21 = vunpack.c.l.b16 %v3939_v25  ;;  %v9483_v11 = vld [vmem:[#allocation11_spill] sm:$0xff]  ;;  %v6234_v25 = vor.u32 %v6945_v30, %v6231_v12  ;;  %v6110_v14 = vor.u32 %v6916_v24, %v6109_v9  ;;  %v6373_v24 = vld [vmem:[#allocation4 + $0x720] sm:$0xf] }
 0x4a7   :  { %v2940_v55 = vadd.f32 %v7977_v45, %v9483_v11  ;;  %v6095_v30 = vld [vmem:[#allocation4 + $0x4f8] sm:$0xf0] }
 0x4a8   :  { %9482 = vst [vmem:[#allocation78_spill] sm:$0xff] %v8115_v21  ;;  %v2943_v21 = vadd.f32 %v7983_v61, %v9484_v63  ;;  %v6983_v61 = vld [vmem:[#allocation4 + $0x72c] sm:$0xf0]  ;;  %v6949_v63 = vld [vmem:[#allocation4 + $0x624] sm:$0xf] }
 0x4a9   :  { %v3670_v44 = vpop.f32.mrf.mxu0 }
 0x4aa   :  { %v3671_v23 = vadd.f32 %v3670_v44, %v3302_v13 }
 0x4ab   :  { %v8121_v60 = vpop.f32.mrf.mxu2 }
 0x4ac   :  { %v3308_v28 = vpop.f32.mrf.mxu3  ;;  %3709 = vmatmul.bf16.gmra.mxu0 %v6082_v32  ;;  %v3940_v13 = vpack.c.bf16 %v3671_v23, %v3671_v23 }
 0x4ad   :  { %v3309_v8 = vadd.f32 %v3308_v28, %v2940_v55  ;;  %v8123_v47 = vpop.f32.mrf.mxu1  ;;  %v6247_v28 = vld [vmem:[#allocation4 + $0x630] sm:$0xf0] }
 0x4ae   :  { %v8131_v12 = vunpack.c.l.b16 %v3940_v13 }
 0x4b0   :  { %2692 = vmatmul.bf16.gmra.mxu1 %v6358_v33  ;;  %3021 = vmatmul.bf16.gmra.mxu2 %v6234_v25  ;;  %9486 = vst [vmem:[#allocation12_spill] sm:$0xff] %v8131_v12  ;;  %v6125_v25 = vld [vmem:[#allocation4 + $0x528] sm:$0xf]  ;;  %v2948_v12 = vadd.f32 %v8001_v6, %v7853_v41  ;;  %v6987_v41 = vld [vmem:[#allocation4 + $0x74c] sm:$0xf0] }
 0x4b1   :  { %3350 = vmatmul.bf16.gmra.mxu3 %v6110_v14  ;;  %v3672_v34 = vpop.f32.mrf.mxu0  ;;  %v6953_v6 = vld [vmem:[#allocation4 + $0x644] sm:$0xf] }
 0x4b2   :  { %v3673_v44 = vadd.f32 %v3672_v34, %v3304_v59  ;;  %v6098_v59 = vor.u32 %v6910_v7, %v6095_v30 }
 0x4b3   :  { %v8127_v45 = vpop.f32.mrf.mxu2 }
 0x4b4   :  { %v3941_v11 = vpack.c.bf16 %v3673_v44, %v3673_v44  ;;  %v3311_v48 = vpop.f32.mrf.mxu3  ;;  %v6374_v44 = vor.u32 %v6983_v61, %v6373_v24  ;;  %v6914_v61 = vld [vmem:[#allocation4 + $0x50c] sm:$0xf] }
 0x4b5   :  { %v3312_v32 = vadd.f32 %v3311_v48, %v2943_v21  ;;  %v8129_v1 = vpop.f32.mrf.mxu1  ;;  %v6920_v48 = vld [vmem:[#allocation4 + $0x534] sm:$0xf0]  ;;  %v9488_v21 = vld [vmem:[#allocation13_spill] sm:$0xff] }
 0x4b6   :  { %9485 = vst [vmem:[#allocation11_spill] sm:$0xff] %v8129_v1  ;;  %v8133_v9 = vunpack.c.l.b16 %v3941_v11  ;;  %v2945_v14 = vadd.f32 %v7995_v36, %v9488_v21  ;;  %v6250_v11 = vor.u32 %v6949_v63, %v6247_v28  ;;  %v6126_v7 = vor.u32 %v6920_v48, %v6125_v25  ;;  %v6111_v63 = vld [vmem:[#allocation4 + $0x518] sm:$0xf0]  ;;  %v6389_v48 = vld [vmem:[#allocation4 + $0x740] sm:$0xf] }
 0x4b8   :  { %9487 = vst [vmem:[#allocation79_spill] sm:$0xff] %v8133_v9 }
 0x4b9   :  { %v3675_v55 = vpop.f32.mrf.mxu0 }
 0x4ba   :  { %v3676_v33 = vadd.f32 %v3675_v55, %v3307_v57 }
 0x4bb   :  { %v8139_v34 = vpop.f32.mrf.mxu2 }
 0x4bc   :  { %v3313_v13 = vpop.f32.mrf.mxu3  ;;  %3714 = vmatmul.bf16.gmra.mxu0 %v6098_v59  ;;  %v3942_v57 = vpack.c.bf16 %v3676_v33, %v3676_v33 }
 0x4bd   :  { %v3314_v1 = vadd.f32 %v3313_v13, %v2945_v14  ;;  %v8141_v23 = vpop.f32.mrf.mxu1  ;;  %v6263_v13 = vld [vmem:[#allocation4 + $0x650] sm:$0xf0] }
 0x4be   :  { %v8149_v28 = vunpack.c.l.b16 %v3942_v57 }
 0x4c0   :  { %2697 = vmatmul.bf16.gmra.mxu1 %v6374_v44  ;;  %3026 = vmatmul.bf16.gmra.mxu2 %v6250_v11  ;;  %9490 = vst [vmem:[#allocation80_spill] sm:$0xff] %v8149_v28  ;;  %v6141_v11 = vld [vmem:[#allocation4 + $0x548] sm:$0xf]  ;;  %v2953_v28 = vadd.f32 %v8019_v56, %v7871_v15  ;;  %v6991_v15 = vld [vmem:[#allocation4 + $0x76c] sm:$0xf0] }
 0x4c1   :  { %3355 = vmatmul.bf16.gmra.mxu3 %v6126_v7  ;;  %v3677_v30 = vpop.f32.mrf.mxu0  ;;  %v6957_v56 = vld [vmem:[#allocation4 + $0x664] sm:$0xf] }
 0x4c2   :  { %v3678_v55 = vadd.f32 %v3677_v30, %v3309_v8  ;;  %v6114_v8 = vor.u32 %v6914_v61, %v6111_v63 }
 0x4c3   :  { %v8145_v36 = vpop.f32.mrf.mxu2 }
 0x4c4   :  { %v3943_v21 = vpack.c.bf16 %v3678_v55, %v3678_v55  ;;  %v3316_v9 = vpop.f32.mrf.mxu3  ;;  %v6390_v55 = vor.u32 %v6987_v41, %v6389_v48  ;;  %v6918_v41 = vld [vmem:[#allocation4 + $0x52c] sm:$0xf] }
 0x4c5   :  { %v3317_v59 = vadd.f32 %v3316_v9, %v2948_v12  ;;  %v8147_v24 = vpop.f32.mrf.mxu1  ;;  %v6924_v12 = vld [vmem:[#allocation4 + $0x554] sm:$0xf0]  ;;  %v9492_v9 = vld [vmem:[#allocation14_spill] sm:$0xff] }
 0x4c6   :  { %9489 = vst [vmem:[#allocation13_spill] sm:$0xff] %v8147_v24  ;;  %v8151_v25 = vunpack.c.l.b16 %v3943_v21  ;;  %v2950_v7 = vadd.f32 %v8013_v54, %v9492_v9  ;;  %v6266_v21 = vor.u32 %v6953_v6, %v6263_v13  ;;  %v6142_v61 = vor.u32 %v6924_v12, %v6141_v11  ;;  %v6127_v6 = vld [vmem:[#allocation4 + $0x538] sm:$0xf0]  ;;  %v6405_v12 = vld [vmem:[#allocation4 + $0x760] sm:$0xf] }
 0x4c8   :  { %9491 = vst [vmem:[#allocation81_spill] sm:$0xff] %v8151_v25 }
 0x4c9   :  { %v3680_v14 = vpop.f32.mrf.mxu0 }
 0x4ca   :  { %v3681_v44 = vadd.f32 %v3680_v14, %v3312_v32 }
 0x4cb   :  { %v8157_v30 = vpop.f32.mrf.mxu2 }
 0x4cc   :  { %v3318_v57 = vpop.f32.mrf.mxu3  ;;  %3719 = vmatmul.bf16.gmra.mxu0 %v6114_v8  ;;  %v3944_v32 = vpack.c.bf16 %v3681_v44, %v3681_v44 }
 0x4cd   :  { %v3319_v24 = vadd.f32 %v3318_v57, %v2950_v7  ;;  %v8159_v33 = vpop.f32.mrf.mxu1  ;;  %v6279_v57 = vld [vmem:[#allocation4 + $0x670] sm:$0xf0] }
 0x4ce   :  { %v8167_v13 = vunpack.c.l.b16 %v3944_v32  ;;  %v6406_v32 = vor.u32 %v6991_v15, %v6405_v12  ;;  %v6922_v15 = vld [vmem:[#allocation4 + $0x54c] sm:$0xf] }
 0x4d0   :  { %2702 = vmatmul.bf16.gmra.mxu1 %v6390_v55  ;;  %3031 = vmatmul.bf16.gmra.mxu2 %v6266_v21  ;;  %9493 = vst [vmem:[#allocation14_spill] sm:$0xff] %v8167_v13  ;;  %v6157_v21 = vld [vmem:[#allocation4 + $0x568] sm:$0xf]  ;;  %v2958_v13 = vadd.f32 %v8037_v29, %v7889_v50  ;;  %v6995_v50 = vld [vmem:[#allocation4 + $0x78c] sm:$0xf0] }
 0x4d1   :  { %3360 = vmatmul.bf16.gmra.mxu3 %v6142_v61  ;;  %v3682_v63 = vpop.f32.mrf.mxu0  ;;  %v6961_v29 = vld [vmem:[#allocation4 + $0x684] sm:$0xf] }
 0x4d2   :  { %v3683_v14 = vadd.f32 %v3682_v63, %v3314_v1  ;;  %v6130_v1 = vor.u32 %v6918_v41, %v6127_v6 }
 0x4d3   :  { %v8163_v54 = vpop.f32.mrf.mxu2 }
 0x4d4   :  { %v3945_v9 = vpack.c.bf16 %v3683_v14, %v3683_v14  ;;  %v3321_v25 = vpop.f32.mrf.mxu3  ;;  %v6282_v14 = vor.u32 %v6957_v56, %v6279_v57  ;;  %v6143_v56 = vld [vmem:[#allocation4 + $0x558] sm:$0xf0] }
 0x4d5   :  { %v3322_v8 = vadd.f32 %v3321_v25, %v2953_v28  ;;  %v8165_v48 = vpop.f32.mrf.mxu1  ;;  %v6928_v28 = vld [vmem:[#allocation4 + $0x574] sm:$0xf0]  ;;  %v2955_v25 = vadd.f32 %v8031_v39, %v7877_v22 }
 0x4d6   :  { %v8169_v11 = vunpack.c.l.b16 %v3945_v9  ;;  %v6158_v41 = vor.u32 %v6928_v28, %v6157_v21  ;;  %v6421_v28 = vld [vmem:[#allocation4 + $0x780] sm:$0xf] }
 0x4d8   :  { %9494 = vst [vmem:[#allocation82_spill] sm:$0xff] %v8169_v11 }
 0x4d9   :  { %v3685_v7 = vpop.f32.mrf.mxu0 }
 0x4da   :  { %v3686_v55 = vadd.f32 %v3685_v7, %v3317_v59 }
 0x4db   :  { %v8175_v61 = vpop.f32.mrf.mxu2 }
 0x4dc   :  { %v3323_v63 = vpop.f32.mrf.mxu3  ;;  %3724 = vmatmul.bf16.gmra.mxu0 %v6130_v1  ;;  %v3946_v59 = vpack.c.bf16 %v3686_v55, %v3686_v55 }
 0x4dd   :  { %v3324_v9 = vadd.f32 %v3323_v63, %v2955_v25  ;;  %v8177_v44 = vpop.f32.mrf.mxu1  ;;  %v6295_v63 = vld [vmem:[#allocation4 + $0x690] sm:$0xf0] }
 0x4de   :  { %v8185_v57 = vunpack.c.l.b16 %v3946_v59  ;;  %v6422_v59 = vor.u32 %v6995_v50, %v6421_v28  ;;  %v6926_v50 = vld [vmem:[#allocation4 + $0x56c] sm:$0xf] }
 0x4e0   :  { %2707 = vmatmul.bf16.gmra.mxu1 %v6406_v32  ;;  %3036 = vmatmul.bf16.gmra.mxu2 %v6282_v14  ;;  %9495 = vst [vmem:[#allocation83_spill] sm:$0xff] %v8185_v57  ;;  %v6173_v14 = vld [vmem:[#allocation4 + $0x588] sm:$0xf]  ;;  %v2963_v57 = vadd.f32 %v8055_v58, %v7907_v20  ;;  %v6999_v20 = vld [vmem:[#allocation4 + $0x7ac] sm:$0xf0] }
 0x4e1   :  { %3365 = vmatmul.bf16.gmra.mxu3 %v6158_v41  ;;  %v3687_v6 = vpop.f32.mrf.mxu0  ;;  %v6965_v58 = vld [vmem:[#allocation4 + $0x6a4] sm:$0xf] }
 0x4e2   :  { %v3688_v7 = vadd.f32 %v3687_v6, %v3319_v24  ;;  %v6146_v24 = vor.u32 %v6922_v15, %v6143_v56 }
 0x4e3   :  { %v8181_v22 = vpop.f32.mrf.mxu2 }
 0x4e4   :  { %v3947_v39 = vpack.c.bf16 %v3688_v7, %v3688_v7  ;;  %v3326_v11 = vpop.f32.mrf.mxu3  ;;  %v6298_v7 = vor.u32 %v6961_v29, %v6295_v63  ;;  %v6159_v29 = vld [vmem:[#allocation4 + $0x578] sm:$0xf0] }
 0x4e5   :  { %v3327_v1 = vadd.f32 %v3326_v11, %v2958_v13  ;;  %v8183_v12 = vpop.f32.mrf.mxu1  ;;  %v6932_v13 = vld [vmem:[#allocation4 + $0x594] sm:$0xf0]  ;;  %v2960_v11 = vadd.f32 %v8049_v40, %v7895_v62 }
 0x4e6   :  { %v8187_v21 = vunpack.c.l.b16 %v3947_v39  ;;  %v6174_v15 = vor.u32 %v6932_v13, %v6173_v14  ;;  %v6437_v13 = vld [vmem:[#allocation4 + $0x7a0] sm:$0xf] }
 0x4e8   :  { %9496 = vst [vmem:[#allocation84_spill] sm:$0xff] %v8187_v21 }
 0x4e9   :  { %v3690_v25 = vpop.f32.mrf.mxu0 }
 0x4ea   :  { %v3691_v32 = vadd.f32 %v3690_v25, %v3322_v8 }
 0x4eb   :  { %v8193_v41 = vpop.f32.mrf.mxu2 }
 0x4ec   :  { %v3328_v6 = vpop.f32.mrf.mxu3  ;;  %3729 = vmatmul.bf16.gmra.mxu0 %v6146_v24  ;;  %v3948_v8 = vpack.c.bf16 %v3691_v32, %v3691_v32 }
 0x4ed   :  { %v3329_v39 = vadd.f32 %v3328_v6, %v2960_v11  ;;  %v8195_v55 = vpop.f32.mrf.mxu1  ;;  %v6311_v6 = vld [vmem:[#allocation4 + $0x6b0] sm:$0xf0] }
 0x4ee   :  { %v8203_v63 = vunpack.c.l.b16 %v3948_v8  ;;  %v6438_v8 = vor.u32 %v6999_v20, %v6437_v13  ;;  %v6930_v20 = vld [vmem:[#allocation4 + $0x58c] sm:$0xf] }
 0x4f0   :  { %2712 = vmatmul.bf16.gmra.mxu1 %v6422_v59  ;;  %3041 = vmatmul.bf16.gmra.mxu2 %v6298_v7  ;;  %9497 = vst [vmem:[#allocation85_spill] sm:$0xff] %v8203_v63  ;;  %v6189_v7 = vld [vmem:[#allocation4 + $0x5a8] sm:$0xf]  ;;  %v2968_v63 = vadd.f32 %v8073_v31, %v7925_v37  ;;  %v7003_v37 = vld [vmem:[#allocation4 + $0x7cc] sm:$0xf0] }
 0x4f1   :  { %3370 = vmatmul.bf16.gmra.mxu3 %v6174_v15  ;;  %v3692_v56 = vpop.f32.mrf.mxu0  ;;  %v6969_v31 = vld [vmem:[#allocation4 + $0x6c4] sm:$0xf] }
 0x4f2   :  { %v3693_v25 = vadd.f32 %v3692_v56, %v3324_v9  ;;  %v6162_v9 = vor.u32 %v6926_v50, %v6159_v29 }
 0x4f3   :  { %v8199_v62 = vpop.f32.mrf.mxu2 }
 0x4f4   :  { %v3949_v40 = vpack.c.bf16 %v3693_v25, %v3693_v25  ;;  %v3331_v21 = vpop.f32.mrf.mxu3  ;;  %v6314_v25 = vor.u32 %v6965_v58, %v6311_v6  ;;  %v6175_v58 = vld [vmem:[#allocation4 + $0x598] sm:$0xf0] }
 0x4f5   :  { %v3332_v24 = vadd.f32 %v3331_v21, %v2963_v57  ;;  %v8201_v28 = vpop.f32.mrf.mxu1  ;;  %v6936_v57 = vld [vmem:[#allocation4 + $0x5b4] sm:$0xf0]  ;;  %v2965_v21 = vadd.f32 %v8067_v53, %v7913_v52 }
 0x4f6   :  { %v8205_v14 = vunpack.c.l.b16 %v3949_v40  ;;  %v6190_v50 = vor.u32 %v6936_v57, %v6189_v7  ;;  %v6453_v57 = vld [vmem:[#allocation4 + $0x7c0] sm:$0xf] }
 0x4f8   :  { %9498 = vst [vmem:[#allocation86_spill] sm:$0xff] %v8205_v14 }
 0x4f9   :  { %v3695_v11 = vpop.f32.mrf.mxu0 }
 0x4fa   :  { %v3696_v59 = vadd.f32 %v3695_v11, %v3327_v1 }
 0x4fb   :  { %v8211_v15 = vpop.f32.mrf.mxu2 }
 0x4fc   :  { %v3333_v56 = vpop.f32.mrf.mxu3  ;;  %3734 = vmatmul.bf16.gmra.mxu0 %v6162_v9  ;;  %v3950_v1 = vpack.c.bf16 %v3696_v59, %v3696_v59 }
 0x4fd   :  { %v3334_v40 = vadd.f32 %v3333_v56, %v2965_v21  ;;  %v8213_v32 = vpop.f32.mrf.mxu1  ;;  %v6327_v56 = vld [vmem:[#allocation4 + $0x6d0] sm:$0xf0] }
 0x4fe   :  { %v8221_v6 = vunpack.c.l.b16 %v3950_v1  ;;  %v6454_v1 = vor.u32 %v7003_v37, %v6453_v57  ;;  %v6934_v37 = vld [vmem:[#allocation4 + $0x5ac] sm:$0xf] }
 0x500   :  { %2717 = vmatmul.bf16.gmra.mxu1 %v6438_v8  ;;  %3046 = vmatmul.bf16.gmra.mxu2 %v6314_v25  ;;  %9499 = vst [vmem:[#allocation87_spill] sm:$0xff] %v8221_v6  ;;  %v6205_v25 = vld [vmem:[#allocation4 + $0x5c8] sm:$0xf]  ;;  %v2973_v6 = vadd.f32 %v8091_v26, %v7943_v42  ;;  %v7007_v42 = vld [vmem:[#allocation4 + $0x7ec] sm:$0xf0] }
 0x501   :  { %3375 = vmatmul.bf16.gmra.mxu3 %v6190_v50  ;;  %v3697_v29 = vpop.f32.mrf.mxu0  ;;  %v6973_v26 = vld [vmem:[#allocation4 + $0x6e4] sm:$0xf] }
 0x502   :  { %v3698_v11 = vadd.f32 %v3697_v29, %v3329_v39  ;;  %v6178_v39 = vor.u32 %v6930_v20, %v6175_v58 }
 0x503   :  { %v8217_v52 = vpop.f32.mrf.mxu2 }
 0x504   :  { %v3951_v53 = vpack.c.bf16 %v3698_v11, %v3698_v11  ;;  %v3336_v14 = vpop.f32.mrf.mxu3  ;;  %v6330_v11 = vor.u32 %v6969_v31, %v6327_v56  ;;  %v6191_v31 = vld [vmem:[#allocation4 + $0x5b8] sm:$0xf0] }
 0x505   :  { %v3337_v9 = vadd.f32 %v3336_v14, %v2968_v63  ;;  %v8219_v13 = vpop.f32.mrf.mxu1  ;;  %v6940_v63 = vld [vmem:[#allocation4 + $0x5d4] sm:$0xf0]  ;;  %v2970_v14 = vadd.f32 %v8085_v0, %v7931_v43 }
 0x506   :  { %v8223_v7 = vunpack.c.l.b16 %v3951_v53  ;;  %v6206_v20 = vor.u32 %v6940_v63, %v6205_v25  ;;  %v6469_v63 = vld [vmem:[#allocation4 + $0x7e0] sm:$0xf] }
 0x508   :  { %9500 = vst [vmem:[#allocation88_spill] sm:$0xff] %v8223_v7 }
 0x509   :  { %v3700_v21 = vpop.f32.mrf.mxu0 }
 0x50a   :  { %v3701_v8 = vadd.f32 %v3700_v21, %v3332_v24 }
 0x50b   :  { %v8229_v50 = vpop.f32.mrf.mxu2 }
 0x50c   :  { %v3338_v29 = vpop.f32.mrf.mxu3  ;;  %3739 = vmatmul.bf16.gmra.mxu0 %v6178_v39  ;;  %v3952_v24 = vpack.c.bf16 %v3701_v8, %v3701_v8 }
 0x50d   :  { %v3339_v53 = vadd.f32 %v3338_v29, %v2970_v14  ;;  %v8231_v59 = vpop.f32.mrf.mxu1  ;;  %v6343_v29 = vld [vmem:[#allocation4 + $0x6f0] sm:$0xf0] }
 0x50e   :  { %v8239_v56 = vunpack.c.l.b16 %v3952_v24  ;;  %v6470_v24 = vor.u32 %v7007_v42, %v6469_v63  ;;  %v6938_v42 = vld [vmem:[#allocation4 + $0x5cc] sm:$0xf] }
 0x510   :  { %2722 = vmatmul.bf16.gmra.mxu1 %v6454_v1  ;;  %3051 = vmatmul.bf16.gmra.mxu2 %v6330_v11  ;;  %9501 = vst [vmem:[#allocation89_spill] sm:$0xff] %v8239_v56  ;;  %v6221_v11 = vld [vmem:[#allocation4 + $0x5e8] sm:$0xf]  ;;  %v2978_v56 = vadd.f32 %v8109_v19, %v7961_v16  ;;  %v7011_v16 = vld [vmem:[#allocation4 + $0x80c] sm:$0xf0] }
 0x511   :  { %3380 = vmatmul.bf16.gmra.mxu3 %v6206_v20  ;;  %v3702_v58 = vpop.f32.mrf.mxu0  ;;  %v6977_v19 = vld [vmem:[#allocation4 + $0x704] sm:$0xf] }
 0x512   :  { %v3703_v21 = vadd.f32 %v3702_v58, %v3334_v40  ;;  %v6194_v40 = vor.u32 %v6934_v37, %v6191_v31 }
 0x513   :  { %v8235_v43 = vpop.f32.mrf.mxu2 }
 0x514   :  { %v3953_v0 = vpack.c.bf16 %v3703_v21, %v3703_v21  ;;  %v3341_v7 = vpop.f32.mrf.mxu3  ;;  %v6346_v21 = vor.u32 %v6973_v26, %v6343_v29  ;;  %v6207_v26 = vld [vmem:[#allocation4 + $0x5d8] sm:$0xf0] }
 0x515   :  { %v3342_v39 = vadd.f32 %v3341_v7, %v2973_v6  ;;  %v8237_v57 = vpop.f32.mrf.mxu1  ;;  %v6944_v6 = vld [vmem:[#allocation4 + $0x5f4] sm:$0xf0]  ;;  %v2975_v7 = vadd.f32 %v8103_v49, %v7949_v10 }
 0x516   :  { %v8241_v25 = vunpack.c.l.b16 %v3953_v0  ;;  %v6222_v37 = vor.u32 %v6944_v6, %v6221_v11  ;;  %v6485_v6 = vld [vmem:[#allocation4 + $0x800] sm:$0xf] }
 0x518   :  { %9502 = vst [vmem:[#allocation90_spill] sm:$0xff] %v8241_v25 }
 0x519   :  { %v3705_v14 = vpop.f32.mrf.mxu0 }
 0x51a   :  { %v3706_v1 = vadd.f32 %v3705_v14, %v3337_v9 }
 0x51b   :  { %v8247_v20 = vpop.f32.mrf.mxu2 }
 0x51c   :  { %v3343_v58 = vpop.f32.mrf.mxu3  ;;  %3744 = vmatmul.bf16.gmra.mxu0 %v6194_v40  ;;  %v3954_v9 = vpack.c.bf16 %v3706_v1, %v3706_v1 }
 0x51d   :  { %v3344_v0 = vadd.f32 %v3343_v58, %v2975_v7  ;;  %v8249_v8 = vpop.f32.mrf.mxu1  ;;  %v6359_v58 = vld [vmem:[#allocation4 + $0x710] sm:$0xf0] }
 0x51e   :  { %v8257_v29 = vunpack.c.l.b16 %v3954_v9  ;;  %v6486_v9 = vor.u32 %v7011_v16, %v6485_v6  ;;  %v6942_v16 = vld [vmem:[#allocation4 + $0x5ec] sm:$0xf] }
 0x520   :  { %2727 = vmatmul.bf16.gmra.mxu1 %v6470_v24  ;;  %3056 = vmatmul.bf16.gmra.mxu2 %v6346_v21  ;;  %9503 = vst [vmem:[#allocation91_spill] sm:$0xff] %v8257_v29  ;;  %v6237_v21 = vld [vmem:[#allocation4 + $0x608] sm:$0xf]  ;;  %v2983_v29 = vadd.f32 %v8127_v45, %v7979_v2  ;;  %v7015_v2 = vld [vmem:[#allocation4 + $0x82c] sm:$0xf0] }
 0x521   :  { %3385 = vmatmul.bf16.gmra.mxu3 %v6222_v37  ;;  %v3707_v31 = vpop.f32.mrf.mxu0  ;;  %v6981_v45 = vld [vmem:[#allocation4 + $0x724] sm:$0xf] }
 0x522   :  { %v3708_v14 = vadd.f32 %v3707_v31, %v3339_v53  ;;  %v6210_v53 = vor.u32 %v6938_v42, %v6207_v26 }
 0x523   :  { %v8253_v10 = vpop.f32.mrf.mxu2 }
 0x524   :  { %v3955_v49 = vpack.c.bf16 %v3708_v14, %v3708_v14  ;;  %v3346_v25 = vpop.f32.mrf.mxu3  ;;  %v6362_v14 = vor.u32 %v6977_v19, %v6359_v58  ;;  %v6223_v19 = vld [vmem:[#allocation4 + $0x5f8] sm:$0xf0] }
 0x525   :  { %v3347_v40 = vadd.f32 %v3346_v25, %v2978_v56  ;;  %v8255_v63 = vpop.f32.mrf.mxu1  ;;  %v6948_v56 = vld [vmem:[#allocation4 + $0x614] sm:$0xf0]  ;;  %v2980_v25 = vadd.f32 %v8121_v60, %v7967_v38 }
 0x526   :  { %v8259_v11 = vunpack.c.l.b16 %v3955_v49  ;;  %v6238_v42 = vor.u32 %v6948_v56, %v6237_v21  ;;  %v6501_v56 = vld [vmem:[#allocation4 + $0x820] sm:$0xf] }
 0x528   :  { %9504 = vst [vmem:[#allocation92_spill] sm:$0xff] %v8259_v11 }
 0x529   :  { %v3710_v7 = vpop.f32.mrf.mxu0 }
 0x52a   :  { %v3711_v24 = vadd.f32 %v3710_v7, %v3342_v39 }
 0x52b   :  { %v8265_v37 = vpop.f32.mrf.mxu2 }
 0x52c   :  { %v3348_v31 = vpop.f32.mrf.mxu3  ;;  %3749 = vmatmul.bf16.gmra.mxu0 %v6210_v53  ;;  %v3956_v39 = vpack.c.bf16 %v3711_v24, %v3711_v24 }
 0x52d   :  { %v3349_v49 = vadd.f32 %v3348_v31, %v2980_v25  ;;  %v8267_v1 = vpop.f32.mrf.mxu1  ;;  %v6375_v31 = vld [vmem:[#allocation4 + $0x730] sm:$0xf0] }
 0x52e   :  { %v8275_v58 = vunpack.c.l.b16 %v3956_v39  ;;  %v6502_v39 = vor.u32 %v7015_v2, %v6501_v56  ;;  %v6946_v2 = vld [vmem:[#allocation4 + $0x60c] sm:$0xf] }
 0x530   :  { %2732 = vmatmul.bf16.gmra.mxu1 %v6486_v9  ;;  %3061 = vmatmul.bf16.gmra.mxu2 %v6362_v14  ;;  %9505 = vst [vmem:[#allocation93_spill] sm:$0xff] %v8275_v58  ;;  %v6253_v14 = vld [vmem:[#allocation4 + $0x628] sm:$0xf]  ;;  %v2988_v58 = vadd.f32 %v8145_v36, %v7997_v51  ;;  %v7019_v51 = vld [vmem:[#allocation4 + $0x84c] sm:$0xf0] }
 0x531   :  { %3390 = vmatmul.bf16.gmra.mxu3 %v6238_v42  ;;  %v3712_v26 = vpop.f32.mrf.mxu0  ;;  %v6985_v36 = vld [vmem:[#allocation4 + $0x744] sm:$0xf] }
 0x532   :  { %v3713_v7 = vadd.f32 %v3712_v26, %v3344_v0  ;;  %v6226_v0 = vor.u32 %v6942_v16, %v6223_v19 }
 0x533   :  { %v8271_v38 = vpop.f32.mrf.mxu2 }
 0x534   :  { %v3957_v60 = vpack.c.bf16 %v3713_v7, %v3713_v7  ;;  %v3351_v11 = vpop.f32.mrf.mxu3  ;;  %v6378_v7 = vor.u32 %v6981_v45, %v6375_v31  ;;  %v6239_v45 = vld [vmem:[#allocation4 + $0x618] sm:$0xf0] }
 0x535   :  { %v3352_v53 = vadd.f32 %v3351_v11, %v2983_v29  ;;  %v8273_v6 = vpop.f32.mrf.mxu1  ;;  %v6952_v29 = vld [vmem:[#allocation4 + $0x634] sm:$0xf0]  ;;  %v2985_v11 = vadd.f32 %v8139_v34, %v7985_v17 }
 0x536   :  { %v8277_v21 = vunpack.c.l.b16 %v3957_v60  ;;  %v6254_v16 = vor.u32 %v6952_v29, %v6253_v14  ;;  %v6517_v29 = vld [vmem:[#allocation4 + $0x840] sm:$0xf] }
 0x538   :  { %9506 = vst [vmem:[#allocation94_spill] sm:$0xff] %v8277_v21 }
 0x539   :  { %v3715_v25 = vpop.f32.mrf.mxu0 }
 0x53a   :  { %v3716_v9 = vadd.f32 %v3715_v25, %v3347_v40 }
 0x53b   :  { %v8283_v42 = vpop.f32.mrf.mxu2 }
 0x53c   :  { %v3353_v26 = vpop.f32.mrf.mxu3  ;;  %3754 = vmatmul.bf16.gmra.mxu0 %v6226_v0  ;;  %v3958_v40 = vpack.c.bf16 %v3716_v9, %v3716_v9 }
 0x53d   :  { %v3354_v60 = vadd.f32 %v3353_v26, %v2985_v11  ;;  %v8285_v24 = vpop.f32.mrf.mxu1  ;;  %v6391_v26 = vld [vmem:[#allocation4 + $0x750] sm:$0xf0] }
 0x53e   :  { %v8293_v31 = vunpack.c.l.b16 %v3958_v40  ;;  %v6518_v40 = vor.u32 %v7019_v51, %v6517_v29  ;;  %v6950_v51 = vld [vmem:[#allocation4 + $0x62c] sm:$0xf] }
 0x540   :  { %2737 = vmatmul.bf16.gmra.mxu1 %v6502_v39  ;;  %3066 = vmatmul.bf16.gmra.mxu2 %v6378_v7  ;;  %9507 = vst [vmem:[#allocation95_spill] sm:$0xff] %v8293_v31  ;;  %v6269_v7 = vld [vmem:[#allocation4 + $0x648] sm:$0xf]  ;;  %v2993_v31 = vadd.f32 %v8163_v54, %v8015_v46  ;;  %v7023_v46 = vld [vmem:[#allocation4 + $0x86c] sm:$0xf0] }
 0x541   :  { %3395 = vmatmul.bf16.gmra.mxu3 %v6254_v16  ;;  %v3717_v19 = vpop.f32.mrf.mxu0  ;;  %v6989_v54 = vld [vmem:[#allocation4 + $0x764] sm:$0xf] }
 0x542   :  { %v3718_v25 = vadd.f32 %v3717_v19, %v3349_v49  ;;  %v6242_v49 = vor.u32 %v6946_v2, %v6239_v45 }
 0x543   :  { %v8289_v17 = vpop.f32.mrf.mxu2 }
 0x544   :  { %v3959_v34 = vpack.c.bf16 %v3718_v25, %v3718_v25  ;;  %v3356_v21 = vpop.f32.mrf.mxu3  ;;  %v6394_v25 = vor.u32 %v6985_v36, %v6391_v26  ;;  %v6255_v36 = vld [vmem:[#allocation4 + $0x638] sm:$0xf0] }
 0x545   :  { %v3357_v0 = vadd.f32 %v3356_v21, %v2988_v58  ;;  %v8291_v56 = vpop.f32.mrf.mxu1  ;;  %v6956_v58 = vld [vmem:[#allocation4 + $0x654] sm:$0xf0]  ;;  %v2990_v21 = vadd.f32 %v8157_v30, %v8003_v18 }
 0x546   :  { %v8295_v14 = vunpack.c.l.b16 %v3959_v34  ;;  %v6270_v2 = vor.u32 %v6956_v58, %v6269_v7  ;;  %v6533_v58 = vld [vmem:[#allocation4 + $0x860] sm:$0xf] }
 0x548   :  { %9508 = vst [vmem:[#allocation96_spill] sm:$0xff] %v8295_v14 }
 0x549   :  { %v3720_v11 = vpop.f32.mrf.mxu0 }
 0x54a   :  { %v3721_v39 = vadd.f32 %v3720_v11, %v3352_v53 }
 0x54b   :  { %v8301_v16 = vpop.f32.mrf.mxu2 }
 0x54c   :  { %v3358_v19 = vpop.f32.mrf.mxu3  ;;  %3759 = vmatmul.bf16.gmra.mxu0 %v6242_v49  ;;  %v3960_v53 = vpack.c.bf16 %v3721_v39, %v3721_v39 }
 0x54d   :  { %v3359_v34 = vadd.f32 %v3358_v19, %v2990_v21  ;;  %v8303_v9 = vpop.f32.mrf.mxu1  ;;  %v6407_v19 = vld [vmem:[#allocation4 + $0x770] sm:$0xf0] }
 0x54e   :  { %v8311_v26 = vunpack.c.l.b16 %v3960_v53  ;;  %v6534_v53 = vor.u32 %v7023_v46, %v6533_v58  ;;  %v6954_v46 = vld [vmem:[#allocation4 + $0x64c] sm:$0xf] }
 0x550   :  { %2742 = vmatmul.bf16.gmra.mxu1 %v6518_v40  ;;  %3071 = vmatmul.bf16.gmra.mxu2 %v6394_v25  ;;  %9509 = vst [vmem:[#allocation97_spill] sm:$0xff] %v8311_v26  ;;  %v6285_v25 = vld [vmem:[#allocation4 + $0x668] sm:$0xf]  ;;  %v2998_v26 = vadd.f32 %v8181_v22, %v8033_v3  ;;  %v7027_v3 = vld [vmem:[#allocation4 + $0x88c] sm:$0xf0] }
 0x551   :  { %3400 = vmatmul.bf16.gmra.mxu3 %v6270_v2  ;;  %v3722_v45 = vpop.f32.mrf.mxu0  ;;  %v6993_v22 = vld [vmem:[#allocation4 + $0x784] sm:$0xf] }
 0x552   :  { %v3723_v11 = vadd.f32 %v3722_v45, %v3354_v60  ;;  %v6258_v60 = vor.u32 %v6950_v51, %v6255_v36 }
 0x553   :  { %v8307_v18 = vpop.f32.mrf.mxu2 }
 0x554   :  { %v3961_v30 = vpack.c.bf16 %v3723_v11, %v3723_v11  ;;  %v3361_v14 = vpop.f32.mrf.mxu3  ;;  %v6410_v11 = vor.u32 %v6989_v54, %v6407_v19  ;;  %v6271_v54 = vld [vmem:[#allocation4 + $0x658] sm:$0xf0] }
 0x555   :  { %v3362_v49 = vadd.f32 %v3361_v14, %v2993_v31  ;;  %v8309_v29 = vpop.f32.mrf.mxu1  ;;  %v6960_v31 = vld [vmem:[#allocation4 + $0x674] sm:$0xf0]  ;;  %v2995_v14 = vadd.f32 %v8175_v61, %v8021_v4 }
 0x556   :  { %v8313_v7 = vunpack.c.l.b16 %v3961_v30  ;;  %v6286_v51 = vor.u32 %v6960_v31, %v6285_v25  ;;  %v6549_v31 = vld [vmem:[#allocation4 + $0x880] sm:$0xf] }
 0x558   :  { %9510 = vst [vmem:[#allocation98_spill] sm:$0xff] %v8313_v7 }
 0x559   :  { %v3725_v21 = vpop.f32.mrf.mxu0 }
 0x55a   :  { %v3726_v40 = vadd.f32 %v3725_v21, %v3357_v0 }
 0x55b   :  { %v8319_v2 = vpop.f32.mrf.mxu2 }
 0x55c   :  { %v3363_v45 = vpop.f32.mrf.mxu3  ;;  %3764 = vmatmul.bf16.gmra.mxu0 %v6258_v60  ;;  %v3962_v0 = vpack.c.bf16 %v3726_v40, %v3726_v40 }
 0x55d   :  { %v3364_v30 = vadd.f32 %v3363_v45, %v2995_v14  ;;  %v8321_v39 = vpop.f32.mrf.mxu1  ;;  %v6423_v45 = vld [vmem:[#allocation4 + $0x790] sm:$0xf0] }
 0x55e   :  { %v8329_v19 = vunpack.c.l.b16 %v3962_v0  ;;  %v6550_v0 = vor.u32 %v7027_v3, %v6549_v31  ;;  %v6958_v3 = vld [vmem:[#allocation4 + $0x66c] sm:$0xf] }
 0x560   :  { %2747 = vmatmul.bf16.gmra.mxu1 %v6534_v53  ;;  %3076 = vmatmul.bf16.gmra.mxu2 %v6410_v11  ;;  %9511 = vst [vmem:[#allocation99_spill] sm:$0xff] %v8329_v19  ;;  %v6301_v11 = vld [vmem:[#allocation4 + $0x688] sm:$0xf]  ;;  %v3003_v19 = vadd.f32 %v8199_v62, %v8051_v35  ;;  %v7031_v35 = vld [vmem:[#allocation4 + $0x8ac] sm:$0xf0] }
 0x561   :  { %3405 = vmatmul.bf16.gmra.mxu3 %v6286_v51  ;;  %v3727_v36 = vpop.f32.mrf.mxu0  ;;  %v6997_v62 = vld [vmem:[#allocation4 + $0x7a4] sm:$0xf] }
 0x562   :  { %v3728_v21 = vadd.f32 %v3727_v36, %v3359_v34  ;;  %v6274_v34 = vor.u32 %v6954_v46, %v6271_v54 }
 0x563   :  { %v8325_v4 = vpop.f32.mrf.mxu2 }
 0x564   :  { %v3963_v61 = vpack.c.bf16 %v3728_v21, %v3728_v21  ;;  %v3366_v7 = vpop.f32.mrf.mxu3  ;;  %v6426_v21 = vor.u32 %v6993_v22, %v6423_v45  ;;  %v6287_v22 = vld [vmem:[#allocation4 + $0x678] sm:$0xf0] }
 0x565   :  { %v3367_v60 = vadd.f32 %v3366_v7, %v2998_v26  ;;  %v8327_v58 = vpop.f32.mrf.mxu1  ;;  %v6964_v26 = vld [vmem:[#allocation4 + $0x694] sm:$0xf0]  ;;  %v3000_v7 = vadd.f32 %v8193_v41, %v8039_v27 }
 0x566   :  { %v8331_v25 = vunpack.c.l.b16 %v3963_v61  ;;  %v6302_v46 = vor.u32 %v6964_v26, %v6301_v11  ;;  %v6565_v26 = vld [vmem:[#allocation4 + $0x8a0] sm:$0xf] }
 0x568   :  { %9512 = vst [vmem:[#allocation100_spill] sm:$0xff] %v8331_v25 }
 0x569   :  { %v3730_v14 = vpop.f32.mrf.mxu0 }
 0x56a   :  { %v3731_v53 = vadd.f32 %v3730_v14, %v3362_v49 }
 0x56b   :  { %v8337_v51 = vpop.f32.mrf.mxu2 }
 0x56c   :  { %v3368_v36 = vpop.f32.mrf.mxu3  ;;  %3769 = vmatmul.bf16.gmra.mxu0 %v6274_v34  ;;  %v3964_v49 = vpack.c.bf16 %v3731_v53, %v3731_v53 }
 0x56d   :  { %v3369_v61 = vadd.f32 %v3368_v36, %v3000_v7  ;;  %v8339_v40 = vpop.f32.mrf.mxu1  ;;  %v6439_v36 = vld [vmem:[#allocation4 + $0x7b0] sm:$0xf0] }
 0x56e   :  { %v8347_v45 = vunpack.c.l.b16 %v3964_v49  ;;  %v6566_v49 = vor.u32 %v7031_v35, %v6565_v26  ;;  %v6962_v35 = vld [vmem:[#allocation4 + $0x68c] sm:$0xf] }
 0x570   :  { %2752 = vmatmul.bf16.gmra.mxu1 %v6550_v0  ;;  %3081 = vmatmul.bf16.gmra.mxu2 %v6426_v21  ;;  %9514 = vst [vmem:[#allocation102_spill] sm:$0xff] %v8347_v45  ;;  %v6317_v21 = vld [vmem:[#allocation4 + $0x6a8] sm:$0xf]  ;;  %v9517_v45 = vld [vmem:[#allocation71_spill] sm:$0xff] }
 0x571   :  { %3410 = vmatmul.bf16.gmra.mxu3 %v6302_v46  ;;  %v3732_v54 = vpop.f32.mrf.mxu0 }
 0x572   :  { %v3733_v14 = vadd.f32 %v3732_v54, %v3364_v30  ;;  %v6290_v30 = vor.u32 %v6958_v3, %v6287_v22 }
 0x573   :  { %v8343_v27 = vpop.f32.mrf.mxu2 }
 0x574   :  { %v3965_v41 = vpack.c.bf16 %v3733_v14, %v3733_v14  ;;  %v3371_v25 = vpop.f32.mrf.mxu3  ;;  %v6442_v14 = vor.u32 %v6997_v62, %v6439_v36  ;;  %v6303_v62 = vld [vmem:[#allocation4 + $0x698] sm:$0xf0] }
 0x575   :  { %v3372_v34 = vadd.f32 %v3371_v25, %v3003_v19  ;;  %v8345_v31 = vpop.f32.mrf.mxu1  ;;  %v6968_v19 = vld [vmem:[#allocation4 + $0x6b4] sm:$0xf0]  ;;  %v3005_v25 = vadd.f32 %v8211_v15, %v8057_v5 }
 0x576   :  { %9513 = vst [vmem:[#allocation101_spill] sm:$0xff] %v8345_v31  ;;  %v8349_v11 = vunpack.c.l.b16 %v3965_v41  ;;  %v6318_v3 = vor.u32 %v6968_v19, %v6317_v21  ;;  %v6581_v19 = vld [vmem:[#allocation4 + $0x8c0] sm:$0xf] }
 0x578   :  { %9515 = vst [vmem:[#allocation103_spill] sm:$0xff] %v8349_v11  ;;  %v3008_v11 = vadd.f32 %v8217_v52, %v9517_v45  ;;  %v7035_v52 = vld [vmem:[#allocation4 + $0x8cc] sm:$0xf0]  ;;  %v7001_v45 = vld [vmem:[#allocation4 + $0x7c4] sm:$0xf] }
 0x579   :  { %v3735_v7 = vpop.f32.mrf.mxu0 }
 0x57a   :  { %v3736_v0 = vadd.f32 %v3735_v7, %v3367_v60 }
 0x57b   :  { %v8355_v46 = vpop.f32.mrf.mxu2 }
 0x57c   :  { %v3373_v54 = vpop.f32.mrf.mxu3  ;;  %3774 = vmatmul.bf16.gmra.mxu0 %v6290_v30  ;;  %v3966_v60 = vpack.c.bf16 %v3736_v0, %v3736_v0 }
 0x57d   :  { %v3374_v41 = vadd.f32 %v3373_v54, %v3005_v25  ;;  %v8357_v53 = vpop.f32.mrf.mxu1  ;;  %v6455_v54 = vld [vmem:[#allocation4 + $0x7d0] sm:$0xf0] }
 0x57e   :  { %9516 = vst [vmem:[#allocation104_spill] sm:$0xff] %v8357_v53  ;;  %v8365_v36 = vunpack.c.l.b16 %v3966_v60 }
 0x580   :  { %2757 = vmatmul.bf16.gmra.mxu1 %v6566_v49  ;;  %3086 = vmatmul.bf16.gmra.mxu2 %v6442_v14  ;;  %9519 = vst [vmem:[#allocation105_spill] sm:$0xff] %v8365_v36  ;;  %v6333_v14 = vld [vmem:[#allocation4 + $0x6c8] sm:$0xf]  ;;  %v9523_v36 = vld [vmem:[#allocation39_spill] sm:$0xff] }
 0x581   :  { %3415 = vmatmul.bf16.gmra.mxu3 %v6318_v3  ;;  %v3737_v22 = vpop.f32.mrf.mxu0 }
 0x582   :  { %v3738_v7 = vadd.f32 %v3737_v22, %v3369_v61  ;;  %v6306_v61 = vor.u32 %v6962_v35, %v6303_v62 }
 0x583   :  { %v8361_v5 = vpop.f32.mrf.mxu2 }
 0x584   :  { %v3967_v15 = vpack.c.bf16 %v3738_v7, %v3738_v7  ;;  %v3376_v31 = vpop.f32.mrf.mxu3  ;;  %v6582_v7 = vor.u32 %v7035_v52, %v6581_v19  ;;  %v6966_v52 = vld [vmem:[#allocation4 + $0x6ac] sm:$0xf] }
 0x585   :  { %v3377_v30 = vadd.f32 %v3376_v31, %v3008_v11  ;;  %v8363_v26 = vpop.f32.mrf.mxu1  ;;  %v6972_v31 = vld [vmem:[#allocation4 + $0x6d4] sm:$0xf0]  ;;  %v9521_v11 = vld [vmem:[#allocation72_spill] sm:$0xff] }
 0x586   :  { %9518 = vst [vmem:[#allocation71_spill] sm:$0xff] %v8363_v26  ;;  %v8367_v21 = vunpack.c.l.b16 %v3967_v15  ;;  %v3010_v3 = vadd.f32 %v8229_v50, %v9521_v11  ;;  %v6458_v15 = vor.u32 %v7001_v45, %v6455_v54  ;;  %v6334_v35 = vor.u32 %v6972_v31, %v6333_v14  ;;  %v6319_v45 = vld [vmem:[#allocation4 + $0x6b8] sm:$0xf0]  ;;  %v6597_v31 = vld [vmem:[#allocation4 + $0x8e0] sm:$0xf] }
 0x588   :  { %9520 = vst [vmem:[#allocation106_spill] sm:$0xff] %v8367_v21  ;;  %v3013_v21 = vadd.f32 %v8235_v43, %v9523_v36  ;;  %v7039_v43 = vld [vmem:[#allocation4 + $0x8ec] sm:$0xf0]  ;;  %v7005_v36 = vld [vmem:[#allocation4 + $0x7e4] sm:$0xf] }
 0x589   :  { %v3740_v25 = vpop.f32.mrf.mxu0 }
 0x58a   :  { %v3741_v49 = vadd.f32 %v3740_v25, %v3372_v34 }
 0x58b   :  { %v8373_v22 = vpop.f32.mrf.mxu2 }
 0x58c   :  { %v3378_v60 = vpop.f32.mrf.mxu3  ;;  %3779 = vmatmul.bf16.gmra.mxu0 %v6306_v61  ;;  %v3968_v34 = vpack.c.bf16 %v3741_v49, %v3741_v49 }
 0x58d   :  { %v3379_v26 = vadd.f32 %v3378_v60, %v3010_v3  ;;  %v8375_v0 = vpop.f32.mrf.mxu1  ;;  %v6471_v60 = vld [vmem:[#allocation4 + $0x7f0] sm:$0xf0] }
 0x58e   :  { %9522 = vst [vmem:[#allocation72_spill] sm:$0xff] %v8375_v0  ;;  %v8383_v54 = vunpack.c.l.b16 %v3968_v34 }
 0x590   :  { %2762 = vmatmul.bf16.gmra.mxu1 %v6582_v7  ;;  %3091 = vmatmul.bf16.gmra.mxu2 %v6458_v15  ;;  %9525 = vst [vmem:[#allocation107_spill] sm:$0xff] %v8383_v54  ;;  %v6349_v15 = vld [vmem:[#allocation4 + $0x6e8] sm:$0xf] }
 0x591   :  { %3420 = vmatmul.bf16.gmra.mxu3 %v6334_v35  ;;  %v3742_v62 = vpop.f32.mrf.mxu0  ;;  %v9528_v54 = vld [vmem:[#allocation9_spill] sm:$0xff] }
 0x592   :  { %v3743_v25 = vadd.f32 %v3742_v62, %v3374_v41  ;;  %v6322_v41 = vor.u32 %v6966_v52, %v6319_v45 }
 0x593   :  { %v8379_v50 = vpop.f32.mrf.mxu2 }
 0x594   :  { %v3969_v11 = vpack.c.bf16 %v3743_v25, %v3743_v25  ;;  %v3381_v53 = vpop.f32.mrf.mxu3  ;;  %v6598_v25 = vor.u32 %v7039_v43, %v6597_v31  ;;  %v6970_v43 = vld [vmem:[#allocation4 + $0x6cc] sm:$0xf] }
 0x595   :  { %v3382_v61 = vadd.f32 %v3381_v53, %v3013_v21  ;;  %v8381_v19 = vpop.f32.mrf.mxu1  ;;  %v6976_v53 = vld [vmem:[#allocation4 + $0x6f4] sm:$0xf0]  ;;  %v9527_v21 = vld [vmem:[#allocation42_spill] sm:$0xff] }
 0x596   :  { %9524 = vst [vmem:[#allocation39_spill] sm:$0xff] %v8381_v19  ;;  %v8385_v14 = vunpack.c.l.b16 %v3969_v11  ;;  %v3015_v35 = vadd.f32 %v8247_v20, %v9527_v21  ;;  %v6474_v11 = vor.u32 %v7005_v36, %v6471_v60  ;;  %v6350_v52 = vor.u32 %v6976_v53, %v6349_v15  ;;  %v6335_v36 = vld [vmem:[#allocation4 + $0x6d8] sm:$0xf0] }
 0x598   :  { %9526 = vst [vmem:[#allocation108_spill] sm:$0xff] %v8385_v14  ;;  %v3018_v14 = vadd.f32 %v8253_v10, %v9528_v54  ;;  %v6487_v10 = vld [vmem:[#allocation4 + $0x810] sm:$0xf0] }
 0x599   :  { %v3745_v3 = vpop.f32.mrf.mxu0 }
 0x59a   :  { %v3746_v7 = vadd.f32 %v3745_v3, %v3377_v30 }
 0x59b   :  { %v8391_v62 = vpop.f32.mrf.mxu2 }
 0x59c   :  { %v3383_v34 = vpop.f32.mrf.mxu3  ;;  %3784 = vmatmul.bf16.gmra.mxu0 %v6322_v41  ;;  %v3970_v30 = vpack.c.bf16 %v3746_v7, %v3746_v7 }
 0x59d   :  { %v3384_v19 = vadd.f32 %v3383_v34, %v3015_v35  ;;  %v8393_v49 = vpop.f32.mrf.mxu1  ;;  %v7009_v35 = vld [vmem:[#allocation4 + $0x804] sm:$0xf]  ;;  %v6365_v34 = vld [vmem:[#allocation4 + $0x708] sm:$0xf] }
 0x59e   :  { %v8401_v60 = vunpack.c.l.b16 %v3970_v30 }
 0x5a0   :  { %2767 = vmatmul.bf16.gmra.mxu1 %v6598_v25  ;;  %3096 = vmatmul.bf16.gmra.mxu2 %v6474_v11  ;;  %9529 = vst [vmem:[#allocation42_spill] sm:$0xff] %v8401_v60  ;;  %v6980_v25 = vld [vmem:[#allocation4 + $0x714] sm:$0xf0]  ;;  %v9531_v11 = vld [vmem:[#allocation10_spill] sm:$0xff] }
 0x5a1   :  { %3425 = vmatmul.bf16.gmra.mxu3 %v6350_v52  ;;  %v3747_v45 = vpop.f32.mrf.mxu0 }
 0x5a2   :  { %v3748_v3 = vadd.f32 %v3747_v45, %v3379_v26  ;;  %v6338_v26 = vor.u32 %v6970_v43, %v6335_v36  ;;  %v6490_v45 = vor.u32 %v7009_v35, %v6487_v10  ;;  %v9532_v43 = vld [vmem:[#allocation34_spill] sm:$0xff]  ;;  %v9533_v36 = vld [vmem:[#allocation33_spill] sm:$0xff] }
 0x5a3   :  { %v8397_v20 = vpop.f32.mrf.mxu2  ;;  %v9534_v7 = vpack.c.b16 %v9532_v43, %v9533_v36  ;;  %v6381_v36 = vld [vmem:[#allocation4 + $0x728] sm:$0xf] }
 0x5a4   :  { %v3971_v21 = vpack.c.bf16 %v3748_v3, %v3748_v3  ;;  %v3386_v0 = vpop.f32.mrf.mxu3 }
 0x5a5   :  { %v3387_v41 = vadd.f32 %v3386_v0, %v3018_v14  ;;  %v8399_v31 = vpop.f32.mrf.mxu1  ;;  %v3020_v0 = vadd.f32 %v8265_v37, %v9531_v11  ;;  %v3023_v11 = vadd.f32 %v8271_v38, %v8123_v47  ;;  %v6503_v47 = vld [vmem:[#allocation4 + $0x830] sm:$0xf0] }
 0x5a6   :  { %v8403_v15 = vunpack.c.l.b16 %v3971_v21  ;;  %v6366_v21 = vor.u32 %v6980_v25, %v6365_v34  ;;  %v6974_v25 = vld [vmem:[#allocation4 + $0x6ec] sm:$0xf] }
 0x5a8   :  { %9530 = vst [vmem:[#allocation9_spill] sm:$0xff] %v8403_v15 }
 0x5a9   :  { %v3750_v53 = vpop.f32.mrf.mxu0 }
 0x5aa   :  { %v3751_v54 = vadd.f32 %v3750_v53, %v3382_v61 }
 0x5ab   :  { %v8409_v14 = vpop.f32.mrf.mxu2 }
 0x5ac   :  { %v3388_v52 = vpop.f32.mrf.mxu3  ;;  %3789 = vmatmul.bf16.gmra.mxu0 %v6338_v26  ;;  %v3972_v53 = vpack.c.bf16 %v3751_v54, %v3751_v54 }
 0x5ad   :  { %v3389_v30 = vadd.f32 %v3388_v52, %v3020_v0  ;;  %v8411_v3 = vpop.f32.mrf.mxu1  ;;  %v6351_v52 = vld [vmem:[#allocation4 + $0x6f8] sm:$0xf0] }
 0x5b0   :  { %3101 = vmatmul.bf16.gmra.mxu2 %v6490_v45  ;;  %6615 = vmatmul.msk.bf16.vlgmr.msrb.gmra.mxu1 %vm4088_vm1, %v9534_v7  ;;  %v8423_v45 = vunpack.c.l.b16 %v3972_v53 }
 0x5b1   :  { %3430 = vmatmul.bf16.gmra.mxu3 %v6366_v21  ;;  %v3752_v61 = vpop.f32.mrf.mxu0  ;;  %v7013_v21 = vld [vmem:[#allocation4 + $0x824] sm:$0xf] }
 0x5b2   :  { %v3753_v37 = vadd.f32 %v3752_v61, %v3384_v19  ;;  %9536 = vst [vmem:[#allocation34_spill] sm:$0xff] %v8423_v45  ;;  %v6354_v19 = vor.u32 %v6974_v25, %v6351_v52  ;;  %v6984_v61 = vld [vmem:[#allocation4 + $0x734] sm:$0xf0]  ;;  %v6506_v53 = vor.u32 %v7013_v21, %v6503_v47  ;;  %v9539_v25 = vld [vmem:[#allocation36_spill] sm:$0xff] }
 0x5b3   :  { %v8419_v26 = vpop.f32.mrf.mxu2  ;;  %v9540_v52 = vld [vmem:[#allocation35_spill] sm:$0xff] }
 0x5b4   :  { %v3973_v35 = vpack.c.bf16 %v3753_v37, %v3753_v37  ;;  %v3391_v10 = vpop.f32.mrf.mxu3  ;;  %v9538_v37 = vld [vmem:[#allocation11_spill] sm:$0xff]  ;;  %v9541_v7 = vpack.c.b16 %v9539_v25, %v9540_v52  ;;  %v6397_v25 = vld [vmem:[#allocation4 + $0x748] sm:$0xf] }
 0x5b5   :  { %v3392_v0 = vadd.f32 %v3391_v10, %v3023_v11  ;;  %v8421_v34 = vpop.f32.mrf.mxu1  ;;  %v3025_v11 = vadd.f32 %v8283_v42, %v9538_v37  ;;  %v3028_v42 = vadd.f32 %v8289_v17, %v8141_v23  ;;  %v6519_v23 = vld [vmem:[#allocation4 + $0x850] sm:$0xf0]  ;;  %v9545_v52 = vld [vmem:[#allocation13_spill] sm:$0xff] }
 0x5b6   :  { %9535 = vst [vmem:[#allocation10_spill] sm:$0xff] %v8421_v34  ;;  %v8425_v43 = vunpack.c.l.b16 %v3973_v35  ;;  %v6382_v34 = vor.u32 %v6984_v61, %v6381_v36  ;;  %v6978_v36 = vld [vmem:[#allocation4 + $0x70c] sm:$0xf]  ;;  %v6367_v61 = vld [vmem:[#allocation4 + $0x718] sm:$0xf0] }
 0x5b8   :  { %9537 = vst [vmem:[#allocation33_spill] sm:$0xff] %v8425_v43 }
 0x5b9   :  { %v3755_v54 = vpop.f32.mrf.mxu0 }
 0x5ba   :  { %v3756_v38 = vadd.f32 %v3755_v54, %v3387_v41 }
 0x5bb   :  { %v8431_v10 = vpop.f32.mrf.mxu2 }
 0x5bc   :  { %v3393_v60 = vpop.f32.mrf.mxu3  ;;  %3794 = vmatmul.bf16.gmra.mxu0 %v6354_v19  ;;  %v3974_v54 = vpack.c.bf16 %v3756_v38, %v3756_v38  ;;  %v7017_v38 = vld [vmem:[#allocation4 + $0x844] sm:$0xf] }
 0x5bd   :  { %v3394_v35 = vadd.f32 %v3393_v60, %v3025_v11  ;;  %v8433_v15 = vpop.f32.mrf.mxu1 }
 0x5be   :  { %v8445_v11 = vunpack.c.l.b16 %v3974_v54  ;;  %v6522_v54 = vor.u32 %v7017_v38, %v6519_v23 }
 0x5c0   :  { %3106 = vmatmul.bf16.gmra.mxu2 %v6506_v53  ;;  %6616 = vmatmul.msk.bf16.gmra.mxu1 %vm4088_vm1, %v9541_v7  ;;  %9543 = vst [vmem:[#allocation36_spill] sm:$0xff] %v8445_v11 }
 0x5c1   :  { %3435 = vmatmul.bf16.gmra.mxu3 %v6382_v34  ;;  %v3757_v41 = vpop.f32.mrf.mxu0 }
 0x5c2   :  { %v3758_v45 = vadd.f32 %v3757_v41, %v3389_v30  ;;  %v6370_v30 = vor.u32 %v6978_v36, %v6367_v61  ;;  %v3030_v41 = vadd.f32 %v8301_v16, %v9545_v52  ;;  %v9546_v36 = vld [vmem:[#allocation38_spill] sm:$0xff]  ;;  %v9547_v61 = vld [vmem:[#allocation37_spill] sm:$0xff]  ;;  %v3033_v16 = vadd.f32 %v8307_v18, %v8159_v33 }
 0x5c3   :  { %v8441_v37 = vpop.f32.mrf.mxu2  ;;  %v9548_v34 = vpack.c.b16 %v9546_v36, %v9547_v61  ;;  %v6535_v33 = vld [vmem:[#allocation4 + $0x870] sm:$0xf0]  ;;  %v6413_v36 = vld [vmem:[#allocation4 + $0x768] sm:$0xf]  ;;  %v3035_v61 = vadd.f32 %v8319_v2, %v8165_v48  ;;  %v3038_v48 = vadd.f32 %v8325_v4, %v8177_v44 }
 0x5c4   :  { %v3975_v19 = vpack.c.bf16 %v3758_v45, %v3758_v45  ;;  %v3396_v60 = vpop.f32.mrf.mxu3  ;;  %v6988_v45 = vld [vmem:[#allocation4 + $0x754] sm:$0xf0]  ;;  %v6551_v44 = vld [vmem:[#allocation4 + $0x890] sm:$0xf0] }
 0x5c5   :  { %v3397_v21 = vadd.f32 %v3396_v60, %v3028_v42  ;;  %v8443_v47 = vpop.f32.mrf.mxu1 }
 0x5c6   :  { %9542 = vst [vmem:[#allocation11_spill] sm:$0xff] %v8443_v47  ;;  %v8447_v53 = vunpack.c.l.b16 %v3975_v19  ;;  %v6398_v47 = vor.u32 %v6988_v45, %v6397_v25  ;;  %v6982_v25 = vld [vmem:[#allocation4 + $0x72c] sm:$0xf]  ;;  %v6383_v45 = vld [vmem:[#allocation4 + $0x738] sm:$0xf0] }
 0x5c8   :  { %9544 = vst [vmem:[#allocation35_spill] sm:$0xff] %v8447_v53 }
 0x5c9   :  { %v3760_v7 = vpop.f32.mrf.mxu0 }
 0x5ca   :  { %v3761_v17 = vadd.f32 %v3760_v7, %v3392_v0 }
 0x5cb   :  { %v8453_v42 = vpop.f32.mrf.mxu2 }
 0x5cc   :  { %v3398_v60 = vpop.f32.mrf.mxu3  ;;  %3799 = vmatmul.bf16.gmra.mxu0 %v6370_v30  ;;  %v3976_v7 = vpack.c.bf16 %v3761_v17, %v3761_v17  ;;  %v7021_v17 = vld [vmem:[#allocation4 + $0x864] sm:$0xf] }
 0x5cd   :  { %v3399_v19 = vadd.f32 %v3398_v60, %v3030_v41  ;;  %v8455_v43 = vpop.f32.mrf.mxu1 }
 0x5ce   :  { %v8467_v60 = vunpack.c.l.b16 %v3976_v7  ;;  %v6538_v7 = vor.u32 %v7021_v17, %v6535_v33 }
 0x5d0   :  { %3111 = vmatmul.bf16.gmra.mxu2 %v6522_v54  ;;  %6617 = vmatmul.msk.bf16.gmra.mxu1 %vm4088_vm1, %v9548_v34 }
 0x5d1   :  { %3440 = vmatmul.bf16.gmra.mxu3 %v6398_v47  ;;  %v3762_v0 = vpop.f32.mrf.mxu0 }
 0x5d2   :  { %v3763_v11 = vadd.f32 %v3762_v0, %v3394_v35  ;;  %v6386_v35 = vor.u32 %v6982_v25, %v6383_v45  ;;  %v9551_v25 = vld [vmem:[#allocation41_spill] sm:$0xff]  ;;  %v9552_v45 = vld [vmem:[#allocation40_spill] sm:$0xff] }
 0x5d3   :  { %v8463_v52 = vpop.f32.mrf.mxu2  ;;  %v9553_v47 = vpack.c.b16 %v9551_v25, %v9552_v45  ;;  %v6429_v25 = vld [vmem:[#allocation4 + $0x788] sm:$0xf]  ;;  %v3040_v45 = vadd.f32 %v8337_v51, %v8183_v12  ;;  %v3043_v12 = vadd.f32 %v8343_v27, %v8195_v55  ;;  %v6567_v55 = vld [vmem:[#allocation4 + $0x8b0] sm:$0xf0] }
 0x5d4   :  { %v3977_v30 = vpack.c.bf16 %v3763_v11, %v3763_v11  ;;  %v3401_v38 = vpop.f32.mrf.mxu3  ;;  %v6992_v11 = vld [vmem:[#allocation4 + $0x774] sm:$0xf0] }
 0x5d5   :  { %v3402_v23 = vadd.f32 %v3401_v38, %v3033_v16  ;;  %v8465_v41 = vpop.f32.mrf.mxu1  ;;  %v6414_v53 = vor.u32 %v6992_v11, %v6413_v36  ;;  %v6986_v36 = vld [vmem:[#allocation4 + $0x74c] sm:$0xf]  ;;  %v6399_v11 = vld [vmem:[#allocation4 + $0x758] sm:$0xf0] }
 0x5d6   :  { %9549 = vst [vmem:[#allocation13_spill] sm:$0xff] %v8465_v41  ;;  %v8469_v54 = vunpack.c.l.b16 %v3977_v30 }
 0x5d9   :  { %v3765_v34 = vpop.f32.mrf.mxu0 }
 0x5da   :  { %v3766_v18 = vadd.f32 %v3765_v34, %v3397_v21 }
 0x5db   :  { %v8475_v0 = vpop.f32.mrf.mxu2 }
 0x5dc   :  { %v3403_v16 = vpop.f32.mrf.mxu3  ;;  %3804 = vmatmul.bf16.gmra.mxu0 %v6386_v35  ;;  %v3978_v34 = vpack.c.bf16 %v3766_v18, %v3766_v18  ;;  %v7025_v18 = vld [vmem:[#allocation4 + $0x884] sm:$0xf] }
 0x5dd   :  { %v3404_v30 = vadd.f32 %v3403_v16, %v3035_v61  ;;  %v8477_v38 = vpop.f32.mrf.mxu1 }
 0x5de   :  { %9550 = vst [vmem:[#allocation38_spill] sm:$0xff] %v8477_v38  ;;  %v8489_v16 = vunpack.c.l.b16 %v3978_v34  ;;  %v6554_v34 = vor.u32 %v7025_v18, %v6551_v44 }
 0x5e0   :  { %3116 = vmatmul.bf16.gmra.mxu2 %v6538_v7  ;;  %6618 = vmatmul.msk.bf16.gmra.mxu1 %vm4088_vm1, %v9553_v47 }
 0x5e1   :  { %3445 = vmatmul.bf16.gmra.mxu3 %v6414_v53  ;;  %v3767_v21 = vpop.f32.mrf.mxu0 }
 0x5e2   :  { %v3768_v41 = vadd.f32 %v3767_v21, %v3399_v19  ;;  %v6402_v19 = vor.u32 %v6986_v36, %v6399_v11  ;;  %v9556_v36 = vld [vmem:[#allocation44_spill] sm:$0xff]  ;;  %v9557_v11 = vld [vmem:[#allocation43_spill] sm:$0xff] }
 0x5e3   :  { %v8485_v2 = vpop.f32.mrf.mxu2  ;;  %v9558_v53 = vpack.c.b16 %v9556_v36, %v9557_v11  ;;  %v6445_v36 = vld [vmem:[#allocation4 + $0x7a8] sm:$0xf]  ;;  %v3045_v11 = vadd.f32 %v8355_v46, %v8201_v28  ;;  %v3048_v28 = vadd.f32 %v8361_v5, %v8213_v32  ;;  %v6583_v32 = vld [vmem:[#allocation4 + $0x8d0] sm:$0xf0] }
 0x5e4   :  { %v3979_v35 = vpack.c.bf16 %v3768_v41, %v3768_v41  ;;  %v3406_v17 = vpop.f32.mrf.mxu3  ;;  %v6996_v41 = vld [vmem:[#allocation4 + $0x794] sm:$0xf0] }
 0x5e5   :  { %v3407_v33 = vadd.f32 %v3406_v17, %v3038_v48  ;;  %v8487_v61 = vpop.f32.mrf.mxu1 }
 0x5e6   :  { %9554 = vst [vmem:[#allocation37_spill] sm:$0xff] %v8487_v61  ;;  %v8491_v7 = vunpack.c.l.b16 %v3979_v35  ;;  %v6430_v61 = vor.u32 %v6996_v41, %v6429_v25  ;;  %v6990_v25 = vld [vmem:[#allocation4 + $0x76c] sm:$0xf]  ;;  %v6415_v41 = vld [vmem:[#allocation4 + $0x778] sm:$0xf0] }
 0x5e9   :  { %v3770_v47 = vpop.f32.mrf.mxu0 }
 0x5ea   :  { %v3771_v4 = vadd.f32 %v3770_v47, %v3402_v23 }
 0x5eb   :  { %v8497_v21 = vpop.f32.mrf.mxu2 }
 0x5ec   :  { %v3408_v48 = vpop.f32.mrf.mxu3  ;;  %3809 = vmatmul.bf16.gmra.mxu0 %v6402_v19  ;;  %v3980_v47 = vpack.c.bf16 %v3771_v4, %v3771_v4  ;;  %v7029_v4 = vld [vmem:[#allocation4 + $0x8a4] sm:$0xf] }
 0x5ed   :  { %v3409_v35 = vadd.f32 %v3408_v48, %v3040_v45  ;;  %v8499_v17 = vpop.f32.mrf.mxu1 }
 0x5ee   :  { %9555 = vst [vmem:[#allocation41_spill] sm:$0xff] %v8499_v17  ;;  %v8511_v48 = vunpack.c.l.b16 %v3980_v47  ;;  %v6570_v47 = vor.u32 %v7029_v4, %v6567_v55 }
 0x5f0   :  { %3121 = vmatmul.bf16.gmra.mxu2 %v6554_v34  ;;  %6619 = vmatmul.msk.bf16.gmra.mxu1 %vm4088_vm1, %v9558_v53 }
 0x5f1   :  { %3450 = vmatmul.bf16.gmra.mxu3 %v6430_v61  ;;  %v3772_v23 = vpop.f32.mrf.mxu0 }
 0x5f2   :  { %v3773_v38 = vadd.f32 %v3772_v23, %v3404_v30  ;;  %v6418_v30 = vor.u32 %v6990_v25, %v6415_v41  ;;  %v9561_v25 = vld [vmem:[#allocation46_spill] sm:$0xff]  ;;  %v9562_v41 = vld [vmem:[#allocation45_spill] sm:$0xff] }
 0x5f3   :  { %v8507_v51 = vpop.f32.mrf.mxu2  ;;  %v9563_v61 = vpack.c.b16 %v9561_v25, %v9562_v41  ;;  %v6461_v25 = vld [vmem:[#allocation4 + $0x7c8] sm:$0xf]  ;;  %v3050_v41 = vadd.f32 %v8373_v22, %v8219_v13 }
 0x5f4   :  { %v3981_v19 = vpack.c.bf16 %v3773_v38, %v3773_v38  ;;  %v3411_v18 = vpop.f32.mrf.mxu3  ;;  %v7000_v38 = vld [vmem:[#allocation4 + $0x7b4] sm:$0xf0] }
 0x5f5   :  { %v3412_v44 = vadd.f32 %v3411_v18, %v3043_v12  ;;  %v8509_v45 = vpop.f32.mrf.mxu1  ;;  %v6446_v18 = vor.u32 %v7000_v38, %v6445_v36  ;;  %v6994_v36 = vld [vmem:[#allocation4 + $0x78c] sm:$0xf]  ;;  %v6431_v38 = vld [vmem:[#allocation4 + $0x798] sm:$0xf0] }
 0x5f6   :  { %9559 = vst [vmem:[#allocation40_spill] sm:$0xff] %v8509_v45  ;;  %v8513_v34 = vunpack.c.l.b16 %v3981_v19 }
 0x5f9   :  { %v3775_v53 = vpop.f32.mrf.mxu0 }
 0x5fa   :  { %v3776_v27 = vadd.f32 %v3775_v53, %v3407_v33 }
 0x5fb   :  { %v8519_v23 = vpop.f32.mrf.mxu2 }
 0x5fc   :  { %v3413_v12 = vpop.f32.mrf.mxu3  ;;  %3814 = vmatmul.bf16.gmra.mxu0 %v6418_v30  ;;  %v3982_v53 = vpack.c.bf16 %v3776_v27, %v3776_v27 }
 0x5fd   :  { %v3414_v19 = vadd.f32 %v3413_v12, %v3045_v11  ;;  %v8521_v45 = vpop.f32.mrf.mxu1 }
 0x5fe   :  { %9560 = vst [vmem:[#allocation44_spill] sm:$0xff] %v8521_v45  ;;  %v8531_v11 = vunpack.c.l.b16 %v3982_v53 }
 0x600   :  { %3126 = vmatmul.bf16.gmra.mxu2 %v6570_v47  ;;  %6620 = vmatmul.msk.bf16.gmra.mxu1 %vm4088_vm1, %v9563_v61 }
 0x601   :  { %3455 = vmatmul.bf16.gmra.mxu3 %v6446_v18  ;;  %v3777_v33 = vpop.f32.mrf.mxu0  ;;  %v7033_v18 = vld [vmem:[#allocation4 + $0x8c4] sm:$0xf] }
 0x602   :  { %v3778_v17 = vadd.f32 %v3777_v33, %v3409_v35  ;;  %v6434_v35 = vor.u32 %v6994_v36, %v6431_v38  ;;  %v9565_v38 = vld [vmem:[#allocation48_spill] sm:$0xff] }
 0x603   :  { %v8529_v46 = vpop.f32.mrf.mxu2 }
 0x604   :  { %v3983_v30 = vpack.c.bf16 %v3778_v17, %v3778_v17  ;;  %v3416_v4 = vpop.f32.mrf.mxu3  ;;  %v7004_v17 = vld [vmem:[#allocation4 + $0x7d4] sm:$0xf0] }
 0x605   :  { %v3417_v55 = vadd.f32 %v3416_v4, %v3048_v28  ;;  %v8537_v47 = vpop.f32.mrf.mxu1  ;;  %v6586_v28 = vor.u32 %v7033_v18, %v6583_v32  ;;  %v6462_v36 = vor.u32 %v7004_v17, %v6461_v25  ;;  %v3053_v18 = vadd.f32 %v8379_v50, %v8231_v59  ;;  %v6477_v59 = vld [vmem:[#allocation4 + $0x7e8] sm:$0xf]  ;;  %v7008_v50 = vld [vmem:[#allocation4 + $0x7f4] sm:$0xf0] }
 0x606   :  { %v8533_v12 = vunpack.c.l.b16 %v3983_v30  ;;  %9564 = vst [vmem:[#allocation43_spill] sm:$0xff] %v8537_v47  ;;  %v7044_v30 = vld [vmem:[%s9276_s4 + $0x18] sm:$0xff]  ;;  %v6478_v47 = vor.u32 %v7008_v50, %v6477_v59 }
 0x607   :  { %4493 = vmatpush.bf16.msra.mxu1 %v7044_v30  ;;  %v6463_v59 = vld [vmem:[#allocation4 + $0x7d8] sm:$0xf0] }
 0x609   :  { %v3780_v27 = vpop.f32.mrf.mxu0 }
 0x60a   :  { %v3781_v5 = vadd.f32 %v3780_v27, %v3412_v44  ;;  %v9566_v44 = vld [vmem:[#allocation47_spill] sm:$0xff] }
 0x60b   :  { %v8541_v33 = vpop.f32.mrf.mxu2  ;;  %v9567_v27 = vpack.c.b16 %v9565_v38, %v9566_v44 }
 0x60c   :  { %v3418_v53 = vpop.f32.mrf.mxu3  ;;  %3819 = vmatmul.bf16.gmra.mxu0 %v6434_v35  ;;  %v3984_v22 = vpack.c.bf16 %v3781_v5, %v3781_v5 }
 0x60d   :  { %v3419_v4 = vadd.f32 %v3418_v53, %v3050_v41  ;;  %v8550_v61 = vpop.f32.mrf.mxu1  ;;  %v6998_v53 = vld [vmem:[#allocation4 + $0x7ac] sm:$0xf] }
 0x60e   :  { %9568 = vst [vmem:[#allocation46_spill] sm:$0xff] %v8550_v61  ;;  %v8556_v30 = vunpack.c.l.b16 %v3984_v22 }
 0x610   :  { %3131 = vmatmul.bf16.gmra.mxu2 %v6586_v28  ;;  %6621 = vmatmul.msk.bf16.gmra.mxu1 %vm4088_vm1, %v9567_v27  ;;  %v6447_v28 = vld [vmem:[#allocation4 + $0x7b8] sm:$0xf0]  ;;  %v6599_v27 = vld [vmem:[#allocation4 + $0x8f0] sm:$0xf0] }
 0x611   :  { %3460 = vmatmul.bf16.gmra.mxu3 %v6462_v36  ;;  %v3782_v13 = vpop.f32.mrf.mxu0  ;;  %v6450_v36 = vor.u32 %v6998_v53, %v6447_v28  ;;  %v9570_v53 = vld [vmem:[#allocation49_spill] sm:$0xff]  ;;  %v9571_v28 = vld [vmem:[#allocation15_spill] sm:$0xff] }
 0x612   :  { %v3783_v35 = vadd.f32 %v3782_v13, %v3414_v19  ;;  %v7037_v19 = vld [vmem:[#allocation4 + $0x8e4] sm:$0xf]  ;;  %v9572_v5 = vpack.c.b16 %v9570_v53, %v9571_v28 }
 0x613   :  { %v8554_v32 = vpop.f32.mrf.mxu2 }
 0x614   :  { %v3985_v41 = vpack.c.bf16 %v3783_v35, %v3783_v35  ;;  %v3421_v25 = vpop.f32.mrf.mxu3  ;;  %v3055_v35 = vadd.f32 %v8391_v62, %v8237_v57  ;;  %v3058_v57 = vadd.f32 %v8397_v20, %v8249_v8  ;;  %v6493_v8 = vld [vmem:[#allocation4 + $0x808] sm:$0xf]  ;;  %v7012_v20 = vld [vmem:[#allocation4 + $0x814] sm:$0xf0] }
 0x615   :  { %v3422_v17 = vadd.f32 %v3421_v25, %v3053_v18  ;;  %v8566_v25 = vpop.f32.mrf.mxu1 }
 0x616   :  { %v8558_v38 = vunpack.c.l.b16 %v3985_v41  ;;  %9569 = vst [vmem:[#allocation45_spill] sm:$0xff] %v8566_v25  ;;  %v6602_v41 = vor.u32 %v7037_v19, %v6599_v27  ;;  %v7002_v27 = vld [vmem:[#allocation4 + $0x7cc] sm:$0xf] }
 0x619   :  { %v3785_v44 = vpop.f32.mrf.mxu0 }
 0x61a   :  { %v3786_v13 = vadd.f32 %v3785_v44, %v3417_v55 }
 0x61b   :  { %v8564_v18 = vpop.f32.mrf.mxu2 }
 0x61c   :  { %v3423_v22 = vpop.f32.mrf.mxu3  ;;  %3824 = vmatmul.bf16.gmra.mxu0 %v6450_v36  ;;  %v3986_v44 = vpack.c.bf16 %v3786_v13, %v3786_v13 }
 0x61d   :  { %v3424_v61 = vadd.f32 %v3423_v22, %v3055_v35  ;;  %v8578_v35 = vpop.f32.mrf.mxu1 }
 0x61e   :  { %v8576_v50 = vunpack.c.l.b16 %v3986_v44 }
 0x620   :  { %3136 = vmatmul.bf16.gmra.mxu2 %v6602_v41  ;;  %6622 = vmatmul.msk.bf16.gmra.mxu1 %vm4088_vm1, %v9572_v5 }
 0x621   :  { %3465 = vmatmul.bf16.gmra.mxu3 %v6478_v47  ;;  %v3787_v55 = vpop.f32.mrf.mxu0 }
 0x622   :  { %v3788_v45 = vadd.f32 %v3787_v55, %v3419_v4  ;;  %v6466_v4 = vor.u32 %v7002_v27, %v6463_v59  ;;  %v6494_v55 = vor.u32 %v7012_v20, %v6493_v8  ;;  %v9577_v27 = vld [vmem:[#allocation66_spill] sm:$0xff] }
 0x623   :  { %v8574_v62 = vpop.f32.mrf.mxu2 }
 0x624   :  { %v3987_v25 = vpack.c.bf16 %v3788_v45, %v3788_v45  ;;  %v3426_v36 = vpop.f32.mrf.mxu3  ;;  %v3060_v45 = vadd.f32 %v8409_v14, %v8255_v63 }
 0x625   :  { %v3427_v19 = vadd.f32 %v3426_v36, %v3058_v57  ;;  %v8588_v44 = vpop.f32.mrf.mxu1  ;;  %v9575_v57 = vld [vmem:[#allocation17_spill] sm:$0xff] }
 0x626   :  { %v8580_v22 = vunpack.c.l.b16 %v3987_v25  ;;  %9573 = vst [vmem:[#allocation48_spill] sm:$0xff] %v8588_v44  ;;  %v9574_v25 = vld [vmem:[#allocation18_spill] sm:$0xff] }
 0x627   :  { %v9576_v36 = vpack.c.b16 %v9574_v25, %v9575_v57  ;;  %v7006_v25 = vld [vmem:[#allocation4 + $0x7ec] sm:$0xf]  ;;  %v6479_v57 = vld [vmem:[#allocation4 + $0x7f8] sm:$0xf0] }
 0x629   :  { %v3790_v5 = vpop.f32.mrf.mxu0 }
 0x62a   :  { %v3791_v13 = vadd.f32 %v3790_v5, %v3422_v17  ;;  %v9578_v17 = vld [vmem:[#allocation65_spill] sm:$0xff] }
 0x62b   :  { %v8586_v41 = vpop.f32.mrf.mxu2  ;;  %v9579_v59 = vpack.c.b16 %v9577_v27, %v9578_v17  ;;  %v6482_v27 = vor.u32 %v7006_v25, %v6479_v57  ;;  %v9584_v25 = vld [vmem:[#allocation68_spill] sm:$0xff]  ;;  %v9585_v57 = vld [vmem:[#allocation67_spill] sm:$0xff] }
 0x62c   :  { %v3428_v53 = vpop.f32.mrf.mxu3  ;;  %3829 = vmatmul.bf16.gmra.mxu0 %v6466_v4  ;;  %v3988_v14 = vpack.c.bf16 %v3791_v13, %v3791_v13  ;;  %v3063_v4 = vadd.f32 %v8419_v26, %v8267_v1  ;;  %v6509_v1 = vld [vmem:[#allocation4 + $0x828] sm:$0xf]  ;;  %v7016_v26 = vld [vmem:[#allocation4 + $0x834] sm:$0xf0] }
 0x62d   :  { %v3429_v28 = vadd.f32 %v3428_v53, %v3060_v45 }
 0x630   :  { %6627 = vmatmul.msk.bf16.vlgmr.msra.gmra.mxu2 %vm4088_vm1, %v9576_v36  ;;  %6651 = vmatmul.msk.bf16.vlgmr.msra.gmra.mxu1 %vm4088_vm1, %v9579_v59  ;;  %v8602_v36 = vunpack.c.l.b16 %v3988_v14  ;;  %v3065_v59 = vadd.f32 %v8431_v10, %v8273_v6  ;;  %v3068_v10 = vadd.f32 %v8441_v37, %v8285_v24  ;;  %v6525_v24 = vld [vmem:[#allocation4 + $0x848] sm:$0xf]  ;;  %v7020_v37 = vld [vmem:[#allocation4 + $0x854] sm:$0xf0] }
 0x631   :  { %3470 = vmatmul.bf16.gmra.mxu3 %v6494_v55  ;;  %v3792_v63 = vpop.f32.mrf.mxu0  ;;  %v9586_v55 = vpack.c.b16 %v9584_v25, %v9585_v57  ;;  %v3070_v57 = vadd.f32 %v8453_v42, %v8291_v56 }
 0x632   :  { %v3793_v5 = vadd.f32 %v3792_v63, %v3424_v61  ;;  %v8608_v61 = vpop.f32.mrf.mxu1 }
 0x633   :  { %v8600_v8 = vpop.f32.mrf.mxu2  ;;  %9580 = vst [vmem:[#allocation47_spill] sm:$0xff] %v8608_v61 }
 0x634   :  { %v3989_v20 = vpack.c.bf16 %v3793_v5, %v3793_v5  ;;  %v3431_v45 = vpop.f32.mrf.mxu3 }
 0x635   :  { %v3432_v53 = vadd.f32 %v3431_v45, %v3063_v4  ;;  %v6510_v4 = vor.u32 %v7016_v26, %v6509_v1  ;;  %v9582_v45 = vld [vmem:[#allocation19_spill] sm:$0xff] }
 0x636   :  { %v8604_v47 = vunpack.c.l.b16 %v3989_v20  ;;  %v9581_v20 = vld [vmem:[#allocation20_spill] sm:$0xff] }
 0x637   :  { %v9583_v44 = vpack.c.b16 %v9581_v20, %v9582_v45  ;;  %v6495_v20 = vld [vmem:[#allocation4 + $0x818] sm:$0xf0] }
 0x639   :  { %v3795_v13 = vpop.f32.mrf.mxu0 }
 0x63a   :  { %v3796_v17 = vadd.f32 %v3795_v13, %v3427_v19  ;;  %v8626_v1 = vpop.f32.mrf.mxu1 }
 0x63b   :  { %v8612_v63 = vpop.f32.mrf.mxu2  ;;  %9587 = vst [vmem:[#allocation49_spill] sm:$0xff] %v8626_v1  ;;  %v9590_v1 = vld [vmem:[#allocation21_spill] sm:$0xff] }
 0x63c   :  { %v3433_v5 = vpop.f32.mrf.mxu3  ;;  %3834 = vmatmul.bf16.gmra.mxu0 %v6482_v27  ;;  %v3990_v13 = vpack.c.bf16 %v3796_v17, %v3796_v17 }
 0x63d   :  { %v3434_v14 = vadd.f32 %v3433_v5, %v3065_v59 }
 0x63e   :  { %v8628_v45 = vunpack.c.l.b16 %v3990_v13  ;;  %v6526_v13 = vor.u32 %v7020_v37, %v6525_v24 }
 0x640   :  { %6628 = vmatmul.msk.bf16.gmra.mxu2 %vm4088_vm1, %v9583_v44  ;;  %6652 = vmatmul.msk.bf16.gmra.mxu1 %vm4088_vm1, %v9586_v55  ;;  %v7010_v44 = vld [vmem:[#allocation4 + $0x80c] sm:$0xf] }
 0x641   :  { %3475 = vmatmul.bf16.gmra.mxu3 %v6510_v4  ;;  %v3797_v19 = vpop.f32.mrf.mxu0 }
 0x642   :  { %v3798_v6 = vadd.f32 %v3797_v19, %v3429_v28  ;;  %v6498_v28 = vor.u32 %v7010_v44, %v6495_v20  ;;  %v9592_v44 = vld [vmem:[#allocation70_spill] sm:$0xff] }
 0x643   :  { %v8624_v27 = vpop.f32.mrf.mxu2 }
 0x644   :  { %v3991_v26 = vpack.c.bf16 %v3798_v6, %v3798_v6  ;;  %v3436_v59 = vpop.f32.mrf.mxu3 }
 0x645   :  { %v3437_v5 = vadd.f32 %v3436_v59, %v3068_v10  ;;  %v8638_v59 = vpop.f32.mrf.mxu1 }
 0x646   :  { %v8630_v25 = vunpack.c.l.b16 %v3991_v26  ;;  %9588 = vst [vmem:[#allocation15_spill] sm:$0xff] %v8638_v59  ;;  %v9589_v26 = vld [vmem:[#allocation22_spill] sm:$0xff] }
 0x647   :  { %v9591_v61 = vpack.c.b16 %v9589_v26, %v9590_v1  ;;  %v7014_v1 = vld [vmem:[#allocation4 + $0x82c] sm:$0xf]  ;;  %v6511_v26 = vld [vmem:[#allocation4 + $0x838] sm:$0xf0] }
 0x649   :  { %v3800_v17 = vpop.f32.mrf.mxu0 }
 0x64a   :  { %v3801_v4 = vadd.f32 %v3800_v17, %v3432_v53  ;;  %v9593_v53 = vld [vmem:[#allocation69_spill] sm:$0xff] }
 0x64b   :  { %v8636_v19 = vpop.f32.mrf.mxu2  ;;  %v9594_v20 = vpack.c.b16 %v9592_v44, %v9593_v53 }
 0x64c   :  { %v3438_v6 = vpop.f32.mrf.mxu3  ;;  %3839 = vmatmul.bf16.gmra.mxu0 %v6498_v28  ;;  %v3992_v42 = vpack.c.bf16 %v3801_v4, %v3801_v4  ;;  %v3073_v28 = vadd.f32 %v8463_v52, %v8303_v9  ;;  %v6541_v9 = vld [vmem:[#allocation4 + $0x868] sm:$0xf]  ;;  %v7024_v52 = vld [vmem:[#allocation4 + $0x874] sm:$0xf0]  ;;  %v9599_v4 = vld [vmem:[#allocation74_spill] sm:$0xff] }
 0x64d   :  { %v3439_v10 = vadd.f32 %v3438_v6, %v3070_v57  ;;  %v8656_v44 = vpop.f32.mrf.mxu1 }
 0x64e   :  { %9595 = vst [vmem:[#allocation18_spill] sm:$0xff] %v8656_v44 }
 0x650   :  { %6629 = vmatmul.msk.bf16.gmra.mxu2 %vm4088_vm1, %v9591_v61  ;;  %6653 = vmatmul.msk.bf16.gmra.mxu1 %vm4088_vm1, %v9594_v20  ;;  %v8652_v61 = vunpack.c.l.b16 %v3992_v42  ;;  %v3075_v20 = vadd.f32 %v8475_v0, %v8309_v29 }
 0x651   :  { %3480 = vmatmul.bf16.gmra.mxu3 %v6526_v13  ;;  %v3802_v56 = vpop.f32.mrf.mxu0 }
 0x652   :  { %v3803_v17 = vadd.f32 %v3802_v56, %v3434_v14  ;;  %v6514_v14 = vor.u32 %v7014_v1, %v6511_v26  ;;  %v9600_v1 = vld [vmem:[#allocation73_spill] sm:$0xff] }
 0x653   :  { %v8650_v24 = vpop.f32.mrf.mxu2  ;;  %v9601_v26 = vpack.c.b16 %v9599_v4, %v9600_v1 }
 0x654   :  { %v3993_v37 = vpack.c.bf16 %v3803_v17, %v3803_v17  ;;  %v3441_v57 = vpop.f32.mrf.mxu3 }
 0x655   :  { %v3442_v6 = vadd.f32 %v3441_v57, %v3073_v28  ;;  %v6542_v28 = vor.u32 %v7024_v52, %v6541_v9  ;;  %v9597_v57 = vld [vmem:[#allocation23_spill] sm:$0xff] }
 0x656   :  { %v8654_v55 = vunpack.c.l.b16 %v3993_v37  ;;  %v9596_v37 = vld [vmem:[#allocation24_spill] sm:$0xff] }
 0x657   :  { %v9598_v44 = vpack.c.b16 %v9596_v37, %v9597_v57  ;;  %v6527_v37 = vld [vmem:[#allocation4 + $0x858] sm:$0xf0] }
 0x659   :  { %v3805_v13 = vpop.f32.mrf.mxu0 }
 0x65a   :  { %v3806_v53 = vadd.f32 %v3805_v13, %v3437_v5  ;;  %v8672_v13 = vpop.f32.mrf.mxu1 }
 0x65b   :  { %v8662_v56 = vpop.f32.mrf.mxu2  ;;  %9602 = vst [vmem:[#allocation17_spill] sm:$0xff] %v8672_v13  ;;  %v9606_v13 = vld [vmem:[#allocation25_spill] sm:$0xff] }
 0x65c   :  { %v3443_v17 = vpop.f32.mrf.mxu3  ;;  %3844 = vmatmul.bf16.gmra.mxu0 %v6514_v14  ;;  %v3994_v29 = vpack.c.bf16 %v3806_v53, %v3806_v53  ;;  %v3078_v14 = vadd.f32 %v8485_v2, %v8321_v39  ;;  %v3080_v39 = vadd.f32 %v8497_v21, %v8327_v58 }
 0x65d   :  { %v3444_v42 = vadd.f32 %v3443_v17, %v3075_v20 }
 0x65e   :  { %v8678_v57 = vunpack.c.l.b16 %v3994_v29 }
 0x660   :  { %6630 = vmatmul.msk.bf16.gmra.mxu2 %vm4088_vm1, %v9598_v44  ;;  %6654 = vmatmul.msk.bf16.gmra.mxu1 %vm4088_vm1, %v9601_v26  ;;  %v7018_v44 = vld [vmem:[#allocation4 + $0x84c] sm:$0xf]  ;;  %9603 = vst [vmem:[#allocation66_spill] sm:$0xff] %v8678_v57  ;;  %v6557_v26 = vld [vmem:[#allocation4 + $0x888] sm:$0xf] }
 0x661   :  { %3485 = vmatmul.bf16.gmra.mxu3 %v6542_v28  ;;  %v3807_v5 = vpop.f32.mrf.mxu0  ;;  %v6530_v1 = vor.u32 %v7018_v44, %v6527_v37  ;;  %v9608_v44 = vld [vmem:[#allocation76_spill] sm:$0xff]  ;;  %v3083_v28 = vadd.f32 %v8507_v51, %v8339_v40  ;;  %v6573_v40 = vld [vmem:[#allocation4 + $0x8a8] sm:$0xf]  ;;  %v7032_v51 = vld [vmem:[#allocation4 + $0x8b4] sm:$0xf0] }
 0x662   :  { %v3808_v0 = vadd.f32 %v3807_v5, %v3439_v10  ;;  %v7028_v5 = vld [vmem:[#allocation4 + $0x894] sm:$0xf0] }
 0x663   :  { %v8676_v9 = vpop.f32.mrf.mxu2 }
 0x664   :  { %v3995_v52 = vpack.c.bf16 %v3808_v0, %v3808_v0  ;;  %v3446_v20 = vpop.f32.mrf.mxu3  ;;  %v8688_v0 = vpop.f32.mrf.mxu1 }
 0x665   :  { %v3447_v17 = vadd.f32 %v3446_v20, %v3078_v14  ;;  %9604 = vst [vmem:[#allocation65_spill] sm:$0xff] %v8688_v0  ;;  %v9605_v20 = vld [vmem:[#allocation26_spill] sm:$0xff]  ;;  %v9617_v0 = vld [vmem:[#allocation27_spill] sm:$0xff] }
 0x666   :  { %v8680_v4 = vunpack.c.l.b16 %v3995_v52  ;;  %v6558_v52 = vor.u32 %v7028_v5, %v6557_v26  ;;  %v9607_v59 = vpack.c.b16 %v9605_v20, %v9606_v13  ;;  %v7022_v13 = vld [vmem:[#allocation4 + $0x86c] sm:$0xf] }
 0x669   :  { %v3810_v53 = vpop.f32.mrf.mxu0 }
 0x66a   :  { %v3811_v10 = vadd.f32 %v3810_v53, %v3442_v6  ;;  %v9609_v6 = vld [vmem:[#allocation75_spill] sm:$0xff] }
 0x66b   :  { %v8686_v2 = vpop.f32.mrf.mxu2  ;;  %v9610_v37 = vpack.c.b16 %v9608_v44, %v9609_v6 }
 0x66c   :  { %v3448_v14 = vpop.f32.mrf.mxu3  ;;  %3849 = vmatmul.bf16.gmra.mxu0 %v6530_v1  ;;  %v3996_v21 = vpack.c.bf16 %v3811_v10, %v3811_v10  ;;  %v9622_v10 = vld [vmem:[#allocation104_spill] sm:$0xff] }
 0x66d   :  { %v3449_v29 = vadd.f32 %v3448_v14, %v3080_v39  ;;  %v6543_v14 = vld [vmem:[#allocation4 + $0x878] sm:$0xf0] }
 0x66e   :  { %v8704_v20 = vunpack.c.l.b16 %v3996_v21  ;;  %v6574_v21 = vor.u32 %v7032_v51, %v6573_v40 }
 0x670   :  { %6631 = vmatmul.msk.bf16.gmra.mxu2 %vm4088_vm1, %v9607_v59  ;;  %6655 = vmatmul.msk.bf16.gmra.mxu1 %vm4088_vm1, %v9610_v37  ;;  %v8702_v59 = vpop.f32.mrf.mxu1  ;;  %9612 = vst [vmem:[#allocation19_spill] sm:$0xff] %v8704_v20  ;;  %v9614_v37 = vld [vmem:[#allocation101_spill] sm:$0xff] }
 0x671   :  { %3490 = vmatmul.bf16.gmra.mxu3 %v6558_v52  ;;  %v3812_v58 = vpop.f32.mrf.mxu0  ;;  %9611 = vst [vmem:[#allocation20_spill] sm:$0xff] %v8702_v59 }
 0x672   :  { %v3813_v53 = vadd.f32 %v3812_v58, %v3444_v42  ;;  %v6546_v42 = vor.u32 %v7022_v13, %v6543_v14  ;;  %v3085_v58 = vadd.f32 %v8519_v23, %v9614_v37  ;;  %v9619_v13 = vld [vmem:[#allocation78_spill] sm:$0xff] }
 0x673   :  { %v8700_v1 = vpop.f32.mrf.mxu2 }
 0x674   :  { %v3997_v26 = vpack.c.bf16 %v3813_v53, %v3813_v53  ;;  %v3451_v5 = vpop.f32.mrf.mxu3 }
 0x675   :  { %v3452_v39 = vadd.f32 %v3451_v5, %v3083_v28 }
 0x676   :  { %v8706_v44 = vunpack.c.l.b16 %v3997_v26  ;;  %v9616_v26 = vld [vmem:[#allocation28_spill] sm:$0xff] }
 0x677   :  { %v9618_v57 = vpack.c.b16 %v9616_v26, %v9617_v0  ;;  %v7026_v0 = vld [vmem:[#allocation4 + $0x88c] sm:$0xf]  ;;  %v6559_v26 = vld [vmem:[#allocation4 + $0x898] sm:$0xf0] }
 0x678   :  { %9613 = vst [vmem:[#allocation68_spill] sm:$0xff] %v8706_v44  ;;  %v8714_v59 = vpop.f32.mrf.mxu1  ;;  %v9633_v44 = vld [vmem:[#allocation72_spill] sm:$0xff] }
 0x679   :  { %v3815_v52 = vpop.f32.mrf.mxu0  ;;  %9615 = vst [vmem:[#allocation67_spill] sm:$0xff] %v8714_v59 }
 0x67a   :  { %v3816_v6 = vadd.f32 %v3815_v52, %v3447_v17  ;;  %v9620_v17 = vld [vmem:[#allocation77_spill] sm:$0xff] }
 0x67b   :  { %v8712_v28 = vpop.f32.mrf.mxu2  ;;  %v9621_v14 = vpack.c.b16 %v9619_v13, %v9620_v17  ;;  %v6562_v13 = vor.u32 %v7026_v0, %v6559_v26  ;;  %v6589_v17 = vld [vmem:[#allocation4 + $0x8c8] sm:$0xf]  ;;  %v9627_v26 = vld [vmem:[#allocation30_spill] sm:$0xff] }
 0x67c   :  { %v3453_v53 = vpop.f32.mrf.mxu3  ;;  %3854 = vmatmul.bf16.gmra.mxu0 %v6546_v42  ;;  %v3998_v52 = vpack.c.bf16 %v3816_v6, %v3816_v6  ;;  %v3088_v42 = vadd.f32 %v8529_v46, %v9622_v10  ;;  %v7036_v46 = vld [vmem:[#allocation4 + $0x8d4] sm:$0xf0] }
 0x67d   :  { %v3454_v5 = vadd.f32 %v3453_v53, %v3085_v58  ;;  %v9626_v10 = vld [vmem:[#allocation71_spill] sm:$0xff] }
 0x680   :  { %6632 = vmatmul.msk.bf16.gmra.mxu2 %vm4088_vm1, %v9618_v57  ;;  %6656 = vmatmul.msk.bf16.gmra.mxu1 %vm4088_vm1, %v9621_v14  ;;  %v8728_v57 = vunpack.c.l.b16 %v3998_v52  ;;  %v3090_v14 = vadd.f32 %v8541_v33, %v9626_v10  ;;  %v7045_v52 = vld [vmem:[%s9276_s4 + $0x20] sm:$0xff] }
 0x681   :  { %3495 = vmatmul.bf16.gmra.mxu3 %v6574_v21  ;;  %v3817_v23 = vpop.f32.mrf.mxu0  ;;  %4628 = vmatpush.bf16.msrb.mxu2 %v7045_v52  ;;  %v9628_v21 = vld [vmem:[#allocation29_spill] sm:$0xff]  ;;  %v9630_v10 = vld [vmem:[#allocation79_spill] sm:$0xff] }
 0x682   :  { %v3818_v37 = vadd.f32 %v3817_v23, %v3449_v29  ;;  %9623 = vst [vmem:[#allocation22_spill] sm:$0xff] %v8728_v57  ;;  %v8734_v29 = vpop.f32.mrf.mxu1  ;;  %v9629_v33 = vpack.c.b16 %v9627_v26, %v9628_v21  ;;  %v6575_v52 = vld [vmem:[#allocation4 + $0x8b8] sm:$0xf0] }
 0x683   :  { %v8726_v40 = vpop.f32.mrf.mxu2  ;;  %9625 = vst [vmem:[#allocation70_spill] sm:$0xff] %v8734_v29 }
 0x684   :  { %v3999_v51 = vpack.c.bf16 %v3818_v37, %v3818_v37  ;;  %v3456_v58 = vpop.f32.mrf.mxu3 }
 0x685   :  { %v3457_v53 = vadd.f32 %v3456_v58, %v3088_v42  ;;  %v7047_v42 = vld [vmem:[%s9276_s4 + $0x30] sm:$0xff]  ;;  %v6590_v58 = vor.u32 %v7036_v46, %v6589_v17  ;;  %v3093_v17 = vadd.f32 %v8554_v32, %v9633_v44  ;;  %v7040_v32 = vld [vmem:[#allocation4 + $0x8f4] sm:$0xf0] }
 0x686   :  { %v8730_v59 = vunpack.c.l.b16 %v3999_v51  ;;  %4898 = vmatpush.bf16.msrb.mxu1 %v7047_v42  ;;  %v9636_v44 = vld [vmem:[#allocation39_spill] sm:$0xff] }
 0x688   :  { %9624 = vst [vmem:[#allocation21_spill] sm:$0xff] %v8730_v59 }
 0x689   :  { %v3820_v6 = vpop.f32.mrf.mxu0 }
 0x68a   :  { %v3821_v0 = vadd.f32 %v3820_v6, %v3452_v39  ;;  %v8758_v6 = vpop.f32.mrf.mxu1 }
 0x68b   :  { %v8738_v23 = vpop.f32.mrf.mxu2  ;;  %9634 = vst [vmem:[#allocation69_spill] sm:$0xff] %v8758_v6 }
 0x68c   :  { %v3458_v37 = vpop.f32.mrf.mxu3  ;;  %3859 = vmatmul.bf16.gmra.mxu0 %v6562_v13  ;;  %v9631_v13 = vld [vmem:[#allocation12_spill] sm:$0xff]  ;;  %v4000_v59 = vpack.c.bf16 %v3821_v0, %v3821_v0  ;;  %v3095_v0 = vadd.f32 %v8564_v18, %v9636_v44 }
 0x68d   :  { %v3459_v51 = vadd.f32 %v3458_v37, %v3090_v14  ;;  %v9632_v29 = vpack.c.b16 %v9630_v10, %v9631_v13  ;;  %v7030_v37 = vld [vmem:[#allocation4 + $0x8ac] sm:$0xf] }
 0x68e   :  { %v8760_v42 = vunpack.c.l.b16 %v4000_v59 }
 0x690   :  { %6633 = vmatmul.msk.bf16.gmra.mxu2 %vm4088_vm1, %v9629_v33  ;;  %6657 = vmatmul.msk.bf16.gmra.mxu1 %vm4088_vm1, %v9632_v29  ;;  %9635 = vst [vmem:[#allocation24_spill] sm:$0xff] %v8760_v42 }
 0x691   :  { %3500 = vmatmul.bf16.gmra.mxu3 %v6590_v58  ;;  %v3822_v57 = vpop.f32.mrf.mxu0  ;;  %v6605_v58 = vld [vmem:[#allocation4 + $0x8e8] sm:$0xf] }
 0x692   :  { %v3823_v20 = vadd.f32 %v3822_v57, %v3454_v5  ;;  %v6578_v5 = vor.u32 %v7030_v37, %v6575_v52  ;;  %v6606_v13 = vor.u32 %v7040_v32, %v6605_v58  ;;  %v8770_v59 = vpop.f32.mrf.mxu1  ;;  %v9640_v37 = vld [vmem:[#allocation81_spill] sm:$0xff]  ;;  %v9641_v52 = vld [vmem:[#allocation80_spill] sm:$0xff] }
 0x693   :  { %v8756_v39 = vpop.f32.mrf.mxu2  ;;  %v9642_v29 = vpack.c.b16 %v9640_v37, %v9641_v52  ;;  %v9643_v52 = vld [vmem:[#allocation82_spill] sm:$0xff] }
 0x694   :  { %v4001_v46 = vpack.c.bf16 %v3823_v20, %v3823_v20  ;;  %v3461_v21 = vpop.f32.mrf.mxu3 }
 0x695   :  { %v3462_v14 = vadd.f32 %v3461_v21, %v3093_v17  ;;  %v9638_v21 = vld [vmem:[#allocation31_spill] sm:$0xff] }
 0x696   :  { %v8762_v26 = vunpack.c.l.b16 %v4001_v46  ;;  %v9637_v46 = vld [vmem:[#allocation32_spill] sm:$0xff] }
 0x697   :  { %v9639_v6 = vpack.c.b16 %v9637_v46, %v9638_v21 }
 0x699   :  { %v3825_v57 = vpop.f32.mrf.mxu0 }
 0x69a   :  { %v3826_v17 = vadd.f32 %v3825_v57, %v3457_v53  ;;  %v8788_v21 = vpop.f32.mrf.mxu1 }
 0x69b   :  { %v8768_v33 = vpop.f32.mrf.mxu2 }
 0x69c   :  { %v3463_v20 = vpop.f32.mrf.mxu3  ;;  %3864 = vmatmul.bf16.gmra.mxu0 %v6578_v5  ;;  %v4002_v44 = vpack.c.bf16 %v3826_v17, %v3826_v17  ;;  %v3098_v5 = vadd.f32 %v8574_v62, %v8393_v49  ;;  %v3100_v49 = vadd.f32 %v8586_v41, %v8399_v31 }
 0x69d   :  { %v3464_v10 = vadd.f32 %v3463_v20, %v3095_v0  ;;  %v7034_v0 = vld [vmem:[#allocation4 + $0x8cc] sm:$0xf]  ;;  %v6591_v20 = vld [vmem:[#allocation4 + $0x8d8] sm:$0xf0] }
 0x6a0   :  { %6634 = vmatmul.msk.bf16.gmra.mxu2 %vm4088_vm1, %v9639_v6  ;;  %6658 = vmatmul.msk.bf16.gmra.mxu1 %vm4088_vm1, %v9642_v29  ;;  %v8784_v6 = vunpack.c.l.b16 %v4002_v44 }
 0x6a1   :  { %3505 = vmatmul.bf16.gmra.mxu3 %v6606_v13  ;;  %v3827_v18 = vpop.f32.mrf.mxu0 }
 0x6a2   :  { %v3828_v42 = vadd.f32 %v3827_v18, %v3459_v51  ;;  %v6594_v51 = vor.u32 %v7034_v0, %v6591_v20  ;;  %v9644_v18 = vld [vmem:[#allocation14_spill] sm:$0xff]  ;;  %v8808_v41 = vpop.f32.mrf.mxu1 }
 0x6a3   :  { %v8782_v58 = vpop.f32.mrf.mxu2  ;;  %v9645_v44 = vpack.c.b16 %v9643_v52, %v9644_v18  ;;  %v6607_v52 = vld [vmem:[#allocation4 + $0x8f8] sm:$0xf0] }
 0x6a4   :  { %v4003_v53 = vpack.c.bf16 %v3828_v42, %v3828_v42  ;;  %v3466_v57 = vpop.f32.mrf.mxu3 }
 0x6a5   :  { %v3467_v32 = vadd.f32 %v3466_v57, %v3098_v5  ;;  %v9646_v5 = vpack.c.b16 %v8469_v54, %v8467_v60  ;;  %v9648_v57 = vld [vmem:[#allocation16_spill] sm:$0xff]  ;;  %v7038_v54 = vld [vmem:[#allocation4 + $0x8ec] sm:$0xf] }
 0x6a6   :  { %v8786_v46 = vunpack.c.l.b16 %v4003_v53  ;;  %v9647_v53 = vld [vmem:[#allocation50_spill] sm:$0xff] }
 0x6a7   :  { %v9649_v0 = vpack.c.b16 %v9647_v53, %v9648_v57  ;;  %v6610_v53 = vor.u32 %v7038_v54, %v6607_v52  ;;  %v9655_v54 = vld [vmem:[#allocation52_spill] sm:$0xff] }
 0x6a9   :  { %v3830_v13 = vpop.f32.mrf.mxu0 }
 0x6aa   :  { %v3831_v37 = vadd.f32 %v3830_v13, %v3462_v14 }
 0x6ab   :  { %v8794_v62 = vpop.f32.mrf.mxu2 }
 0x6ac   :  { %v3468_v42 = vpop.f32.mrf.mxu3  ;;  %3869 = vmatmul.bf16.gmra.mxu0 %v6594_v51  ;;  %v4004_v20 = vpack.c.bf16 %v3831_v37, %v3831_v37  ;;  %v3103_v51 = vadd.f32 %v8600_v8, %v8411_v3  ;;  %v8824_v8 = vpop.f32.mrf.mxu1 }
 0x6ad   :  { %v3469_v17 = vadd.f32 %v3468_v42, %v3100_v49 }
 0x6ae   :  { %v8814_v18 = vunpack.c.l.b16 %v4004_v20  ;;  %v9651_v20 = vld [vmem:[#allocation84_spill] sm:$0xff] }
 0x6b0   :  { %6663 = vmatmul.msk.bf16.vlgmr.msrb.gmra.mxu2 %vm4088_vm1, %v9645_v44  ;;  %6687 = vmatmul.msk.bf16.vlgmr.msrb.gmra.mxu1 %vm4088_vm1, %v9646_v5 }
 0x6b1   :  { %6639 = vmatmul.msk.bf16.vlgmr.msra.gmra.mxu3 %vm4088_vm1, %v9649_v0  ;;  %v3832_v31 = vpop.f32.mrf.mxu0 }
 0x6b2   :  { %v3833_v14 = vadd.f32 %v3832_v31, %v3464_v10  ;;  %v9650_v10 = vld [vmem:[#allocation10_spill] sm:$0xff] }
 0x6b3   :  { %v8812_v13 = vpop.f32.mrf.mxu2  ;;  %v3105_v57 = vadd.f32 %v8612_v63, %v9650_v10  ;;  %v9656_v63 = vld [vmem:[#allocation51_spill] sm:$0xff] }
 0x6b4   :  { %v4005_v49 = vpack.c.bf16 %v3833_v14, %v3833_v14  ;;  %v3471_v42 = vpop.f32.mrf.mxu3  ;;  %v9657_v52 = vpack.c.b16 %v9655_v54, %v9656_v63 }
 0x6b5   :  { %v3472_v60 = vadd.f32 %v3471_v42, %v3103_v51  ;;  %v9652_v51 = vld [vmem:[#allocation83_spill] sm:$0xff]  ;;  %v9654_v42 = vpack.c.b16 %v8491_v7, %v8489_v16 }
 0x6b6   :  { %v8816_v44 = vunpack.c.l.b16 %v4005_v49  ;;  %v9653_v49 = vpack.c.b16 %v9651_v20, %v9652_v51  ;;  %v8842_v51 = vpop.f32.mrf.mxu1 }
 0x6b9   :  { %v3835_v37 = vpop.f32.mrf.mxu0 }
 0x6ba   :  { %v3836_v14 = vadd.f32 %v3835_v37, %v3467_v32  ;;  %v3108_v32 = vadd.f32 %v8624_v27, %v8433_v15 }
 0x6bb   :  { %v8822_v3 = vpop.f32.mrf.mxu2 }
 0x6bc   :  { %v3473_v0 = vpop.f32.mrf.mxu3  ;;  %3874 = vmatmul.bf16.gmra.mxu0 %v6610_v53  ;;  %v4006_v5 = vpack.c.bf16 %v3836_v14, %v3836_v14  ;;  %v9658_v14 = vld [vmem:[#allocation11_spill] sm:$0xff] }
 0x6bd   :  { %v3474_v31 = vadd.f32 %v3473_v0, %v3105_v57 }
 0x6be   :  { %v8844_v16 = vunpack.c.l.b16 %v4006_v5 }
 0x6c0   :  { %6664 = vmatmul.msk.bf16.gmra.mxu2 %vm4088_vm1, %v9653_v49  ;;  %6688 = vmatmul.msk.bf16.gmra.mxu1 %vm4088_vm1, %v9654_v42 }
 0x6c1   :  { %6640 = vmatmul.msk.bf16.gmra.mxu3 %vm4088_vm1, %v9657_v52  ;;  %v3837_v10 = vpop.f32.mrf.mxu0  ;;  %v8854_v52 = vpop.f32.mrf.mxu1 }
 0x6c2   :  { %v3838_v53 = vadd.f32 %v3837_v10, %v3469_v17  ;;  %v3110_v17 = vadd.f32 %v8636_v19, %v9658_v14  ;;  %v9659_v10 = vld [vmem:[#allocation86_spill] sm:$0xff] }
 0x6c3   :  { %v8840_v37 = vpop.f32.mrf.mxu2 }
 0x6c4   :  { %v4007_v57 = vpack.c.bf16 %v3838_v53, %v3838_v53  ;;  %v3476_v0 = vpop.f32.mrf.mxu3  ;;  %v9660_v53 = vld [vmem:[#allocation85_spill] sm:$0xff] }
 0x6c5   :  { %v3477_v20 = vadd.f32 %v3476_v0, %v3108_v32  ;;  %v9661_v5 = vpack.c.b16 %v9659_v10, %v9660_v53  ;;  %v9662_v32 = vpack.c.b16 %v8513_v34, %v8511_v48  ;;  %v9664_v0 = vld [vmem:[#allocation53_spill] sm:$0xff] }
 0x6c6   :  { %v8846_v7 = vunpack.c.l.b16 %v4007_v57  ;;  %v9663_v57 = vld [vmem:[#allocation54_spill] sm:$0xff] }
 0x6c7   :  { %v9665_v19 = vpack.c.b16 %v9663_v57, %v9664_v0 }
 0x6c9   :  { %v3840_v42 = vpop.f32.mrf.mxu0  ;;  %v8878_v57 = vpop.f32.mrf.mxu1 }
 0x6ca   :  { %v3841_v63 = vadd.f32 %v3840_v42, %v3472_v60  ;;  %v3113_v42 = vadd.f32 %v8650_v24, %v8455_v43 }
 0x6cb   :  { %v8852_v54 = vpop.f32.mrf.mxu2 }
 0x6cc   :  { %v3478_v15 = vpop.f32.mrf.mxu3 }
 0x6cd   :  { %v3479_v27 = vadd.f32 %v3478_v15, %v3110_v17  ;;  %v4008_v17 = vpack.c.bf16 %v3841_v63, %v3841_v63  ;;  %v9666_v63 = vld [vmem:[#allocation13_spill] sm:$0xff] }
 0x6cf   :  { %v8872_v49 = vunpack.c.l.b16 %v4008_v17 }
 0x6d0   :  { %6665 = vmatmul.msk.bf16.gmra.mxu2 %vm4088_vm1, %v9661_v5  ;;  %6689 = vmatmul.msk.bf16.gmra.mxu1 %vm4088_vm1, %v9662_v32 }
 0x6d1   :  { %6641 = vmatmul.msk.bf16.gmra.mxu3 %vm4088_vm1, %v9665_v19  ;;  %v3842_v14 = vpop.f32.mrf.mxu0 }
 0x6d2   :  { %v3843_v60 = vadd.f32 %v3842_v14, %v3474_v31  ;;  %v3115_v31 = vadd.f32 %v8662_v56, %v9666_v63  ;;  %v9667_v14 = vld [vmem:[#allocation88_spill] sm:$0xff] }
 0x6d3   :  { %v8870_v15 = vpop.f32.mrf.mxu2 }
 0x6d4   :  { %v4009_v10 = vpack.c.bf16 %v3843_v60, %v3843_v60  ;;  %v3481_v53 = vpop.f32.mrf.mxu3  ;;  %v9668_v60 = vld [vmem:[#allocation87_spill] sm:$0xff] }
 0x6d5   :  { %v3482_v5 = vadd.f32 %v3481_v53, %v3113_v42  ;;  %v9669_v17 = vpack.c.b16 %v9667_v14, %v9668_v60  ;;  %v9670_v42 = vpack.c.b16 %v8533_v12, %v8531_v11  ;;  %v9672_v53 = vld [vmem:[#allocation55_spill] sm:$0xff] }
 0x6d6   :  { %v8874_v48 = vunpack.c.l.b16 %v4009_v10  ;;  %v9671_v10 = vld [vmem:[#allocation56_spill] sm:$0xff] }
 0x6d7   :  { %v9673_v34 = vpack.c.b16 %v9671_v10, %v9672_v53 }
 0x6d9   :  { %v3845_v32 = vpop.f32.mrf.mxu0 }
 0x6da   :  { %v3846_v19 = vadd.f32 %v3845_v32, %v3477_v20 }
 0x6db   :  { %v8882_v0 = vpop.f32.mrf.mxu2 }
 0x6dc   :  { %v3483_v43 = vpop.f32.mrf.mxu3  ;;  %v4010_v63 = vpack.c.bf16 %v3846_v19, %v3846_v19  ;;  %v9677_v19 = vld [vmem:[#allocation37_spill] sm:$0xff] }
 0x6dd   :  { %v3484_v24 = vadd.f32 %v3483_v43, %v3115_v31  ;;  %v9674_v31 = vld [vmem:[#allocation38_spill] sm:$0xff]  ;;  %v8900_v43 = vpop.f32.mrf.mxu1 }
 0x6de   :  { %v3118_v20 = vadd.f32 %v8676_v9, %v9674_v31  ;;  %v8902_v12 = vunpack.c.l.b16 %v4010_v63  ;;  %v9678_v31 = vld [vmem:[#allocation90_spill] sm:$0xff] }
 0x6e0   :  { %6666 = vmatmul.msk.bf16.gmra.mxu2 %vm4088_vm1, %v9669_v17  ;;  %6690 = vmatmul.msk.bf16.gmra.mxu1 %vm4088_vm1, %v9670_v42  ;;  %9675 = vst [vmem:[#allocation23_spill] sm:$0xff] %v8902_v12  ;;  %v9685_v12 = vld [vmem:[#allocation41_spill] sm:$0xff] }
 0x6e1   :  { %6642 = vmatmul.msk.bf16.gmra.mxu3 %vm4088_vm1, %v9673_v34  ;;  %v3847_v56 = vpop.f32.mrf.mxu0  ;;  %v9683_v34 = vld [vmem:[#allocation57_spill] sm:$0xff] }
 0x6e2   :  { %v3848_v29 = vadd.f32 %v3847_v56, %v3479_v27  ;;  %v3120_v27 = vadd.f32 %v8686_v2, %v9677_v19 }
 0x6e3   :  { %v8898_v32 = vpop.f32.mrf.mxu2 }
 0x6e4   :  { %v4011_v14 = vpack.c.bf16 %v3848_v29, %v3848_v29  ;;  %v3486_v60 = vpop.f32.mrf.mxu3 }
 0x6e5   :  { %v3487_v11 = vadd.f32 %v3486_v60, %v3118_v20  ;;  %v8912_v56 = vpop.f32.mrf.mxu1  ;;  %v9679_v20 = vld [vmem:[#allocation89_spill] sm:$0xff]  ;;  %v9682_v60 = vld [vmem:[#allocation58_spill] sm:$0xff] }
 0x6e6   :  { %v8904_v17 = vunpack.c.l.b16 %v4011_v14  ;;  %v9680_v63 = vpack.c.b16 %v9678_v31, %v9679_v20  ;;  %v9681_v14 = vpack.c.b16 %v8558_v38, %v8556_v30  ;;  %v9684_v2 = vpack.c.b16 %v9682_v60, %v9683_v34 }
 0x6e8   :  { %9676 = vst [vmem:[#allocation74_spill] sm:$0xff] %v8904_v17 }
 0x6e9   :  { %v3850_v42 = vpop.f32.mrf.mxu0 }
 0x6ea   :  { %v3851_v29 = vadd.f32 %v3850_v42, %v3482_v5  ;;  %v3123_v5 = vadd.f32 %v8700_v1, %v9685_v12  ;;  %v9687_v1 = vld [vmem:[#allocation40_spill] sm:$0xff] }
 0x6eb   :  { %v8910_v10 = vpop.f32.mrf.mxu2  ;;  %v3125_v12 = vadd.f32 %v8712_v28, %v9687_v1 }
 0x6ec   :  { %v3488_v9 = vpop.f32.mrf.mxu3 }
 0x6ed   :  { %v3489_v53 = vadd.f32 %v3488_v9, %v3120_v27  ;;  %v4012_v27 = vpack.c.bf16 %v3851_v29, %v3851_v29  ;;  %v8934_v38 = vpop.f32.mrf.mxu1 }
 0x6ef   :  { %v8930_v17 = vunpack.c.l.b16 %v4012_v27  ;;  %v9688_v27 = vld [vmem:[#allocation92_spill] sm:$0xff] }
 0x6f0   :  { %6667 = vmatmul.msk.bf16.gmra.mxu2 %vm4088_vm1, %v9680_v63  ;;  %6691 = vmatmul.msk.bf16.gmra.mxu1 %vm4088_vm1, %v9681_v14 }
 0x6f1   :  { %6643 = vmatmul.msk.bf16.gmra.mxu3 %vm4088_vm1, %v9684_v2  ;;  %v3852_v19 = vpop.f32.mrf.mxu0  ;;  %9686 = vst [vmem:[#allocation73_spill] sm:$0xff] %v8930_v17 }
 0x6f2   :  { %v3853_v9 = vadd.f32 %v3852_v19, %v3484_v24  ;;  %v7046_v24 = vld [vmem:[%s9276_s4 + $0x28] sm:$0xff] }
 0x6f3   :  { %v8928_v42 = vpop.f32.mrf.mxu2  ;;  %4763 = vmatpush.bf16.msrb.mxu3 %v7046_v24  ;;  %v9693_v24 = vld [vmem:[#allocation59_spill] sm:$0xff] }
 0x6f4   :  { %v4013_v31 = vpack.c.bf16 %v3853_v9, %v3853_v9  ;;  %v3491_v20 = vpop.f32.mrf.mxu3  ;;  %v9689_v9 = vld [vmem:[#allocation91_spill] sm:$0xff] }
 0x6f5   :  { %v3492_v63 = vadd.f32 %v3491_v20, %v3123_v5  ;;  %v9690_v5 = vpack.c.b16 %v9688_v27, %v9689_v9  ;;  %v9692_v20 = vld [vmem:[#allocation60_spill] sm:$0xff]  ;;  %v8957_v1 = vpop.f32.mrf.mxu1 }
 0x6f6   :  { %v8932_v30 = vunpack.c.l.b16 %v4013_v31  ;;  %v9691_v31 = vpack.c.b16 %v8580_v22, %v8576_v50  ;;  %v9694_v34 = vpack.c.b16 %v9692_v20, %v9693_v24  ;;  %v9698_v24 = vld [vmem:[#allocation43_spill] sm:$0xff] }
 0x6f9   :  { %v3855_v29 = vpop.f32.mrf.mxu0 }
 0x6fa   :  { %v3856_v19 = vadd.f32 %v3855_v29, %v3487_v11  ;;  %v9695_v29 = vld [vmem:[#allocation44_spill] sm:$0xff] }
 0x6fb   :  { %v8943_v14 = vpop.f32.mrf.mxu2 }
 0x6fc   :  { %v3493_v60 = vpop.f32.mrf.mxu3 }
 0x6fd   :  { %v3494_v2 = vadd.f32 %v3493_v60, %v3125_v12  ;;  %v4014_v12 = vpack.c.bf16 %v3856_v19, %v3856_v19  ;;  %v3128_v60 = vadd.f32 %v8726_v40, %v9695_v29  ;;  %v3130_v19 = vadd.f32 %v8738_v23, %v9698_v24  ;;  %v9703_v24 = vld [vmem:[#allocation62_spill] sm:$0xff] }
 0x6fe   :  { %v9702_v23 = vpack.c.b16 %v8604_v47, %v8602_v36 }
 0x6ff   :  { %v8963_v22 = vunpack.c.l.b16 %v4014_v12 }
 0x700   :  { %6668 = vmatmul.msk.bf16.gmra.mxu2 %vm4088_vm1, %v9690_v5  ;;  %6692 = vmatmul.msk.bf16.gmra.mxu1 %vm4088_vm1, %v9691_v31 }
 0x701   :  { %6644 = vmatmul.msk.bf16.gmra.mxu3 %vm4088_vm1, %v9694_v34  ;;  %v3857_v28 = vpop.f32.mrf.mxu0  ;;  %9696 = vst [vmem:[#allocation26_spill] sm:$0xff] %v8963_v22  ;;  %v9704_v34 = vld [vmem:[#allocation61_spill] sm:$0xff] }
 0x702   :  { %v3858_v11 = vadd.f32 %v3857_v28, %v3489_v53  ;;  %v8973_v28 = vpop.f32.mrf.mxu1  ;;  %v9705_v22 = vpack.c.b16 %v9703_v24, %v9704_v34 }
 0x703   :  { %v8961_v27 = vpop.f32.mrf.mxu2 }
 0x704   :  { %v4015_v9 = vpack.c.bf16 %v3858_v11, %v3858_v11  ;;  %v3496_v5 = vpop.f32.mrf.mxu3  ;;  %v7048_v11 = vld [vmem:[%s9276_s4 + $0x38] sm:$0xff] }
 0x705   :  { %v3497_v50 = vadd.f32 %v3496_v5, %v3128_v60  ;;  %5033 = vmatpush.bf16.msra.mxu2 %v7048_v11  ;;  %v9699_v60 = vld [vmem:[#allocation94_spill] sm:$0xff] }
 0x706   :  { %v8965_v31 = vunpack.c.l.b16 %v4015_v9  ;;  %v9700_v9 = vld [vmem:[#allocation93_spill] sm:$0xff] }
 0x707   :  { %v9701_v5 = vpack.c.b16 %v9699_v60, %v9700_v9 }
 0x708   :  { %9697 = vst [vmem:[#allocation25_spill] sm:$0xff] %v8965_v31 }
 0x709   :  { %v3860_v20 = vpop.f32.mrf.mxu0 }
 0x70a   :  { %v3861_v29 = vadd.f32 %v3860_v20, %v3492_v63  ;;  %v9706_v63 = vld [vmem:[#allocation46_spill] sm:$0xff] }
 0x70b   :  { %v8971_v53 = vpop.f32.mrf.mxu2  ;;  %v3133_v20 = vadd.f32 %v8756_v39, %v9706_v63  ;;  %v9709_v63 = vld [vmem:[#allocation96_spill] sm:$0xff] }
 0x70c   :  { %v3498_v40 = vpop.f32.mrf.mxu3  ;;  %v4016_v17 = vpack.c.bf16 %v3861_v29, %v3861_v29  ;;  %v9708_v29 = vld [vmem:[#allocation45_spill] sm:$0xff] }
 0x70d   :  { %v3499_v12 = vadd.f32 %v3498_v40, %v3130_v19 }
 0x70e   :  { %v8996_v47 = vunpack.c.l.b16 %v4016_v17 }
 0x710   :  { %6669 = vmatmul.msk.bf16.gmra.mxu2 %vm4088_vm1, %v9701_v5  ;;  %6693 = vmatmul.msk.bf16.gmra.mxu1 %vm4088_vm1, %v9702_v23  ;;  %v8994_v5 = vpop.f32.mrf.mxu1  ;;  %9707 = vst [vmem:[#allocation76_spill] sm:$0xff] %v8996_v47 }
 0x711   :  { %6645 = vmatmul.msk.bf16.gmra.mxu3 %vm4088_vm1, %v9705_v22  ;;  %v3862_v31 = vpop.f32.mrf.mxu0  ;;  %v9714_v22 = vld [vmem:[#allocation63_spill] sm:$0xff] }
 0x712   :  { %v3863_v19 = vadd.f32 %v3862_v31, %v3494_v2  ;;  %v3135_v2 = vadd.f32 %v8768_v33, %v9708_v29 }
 0x713   :  { %v8992_v40 = vpop.f32.mrf.mxu2 }
 0x714   :  { %v4017_v11 = vpack.c.bf16 %v3863_v19, %v3863_v19  ;;  %v3501_v60 = vpop.f32.mrf.mxu3 }
 0x715   :  { %v3502_v9 = vadd.f32 %v3501_v60, %v3133_v20  ;;  %v9710_v20 = vld [vmem:[#allocation95_spill] sm:$0xff]  ;;  %v9713_v60 = vld [vmem:[#allocation64_spill] sm:$0xff] }
 0x716   :  { %v8998_v36 = vunpack.c.l.b16 %v4017_v11  ;;  %v9711_v17 = vpack.c.b16 %v9709_v63, %v9710_v20  ;;  %v9712_v11 = vpack.c.b16 %v8630_v25, %v8628_v45  ;;  %v9715_v33 = vpack.c.b16 %v9713_v60, %v9714_v22  ;;  %v9722_v25 = vld [vmem:[#allocation47_spill] sm:$0xff] }
 0x718   :  { %v9006_v19 = vpop.f32.mrf.mxu1 }
 0x719   :  { %v3865_v34 = vpop.f32.mrf.mxu0 }
 0x71a   :  { %v3866_v24 = vadd.f32 %v3865_v34, %v3497_v50  ;;  %v3138_v34 = vadd.f32 %v8782_v58, %v8578_v35 }
 0x71b   :  { %v9004_v31 = vpop.f32.mrf.mxu2 }
 0x71c   :  { %v3503_v39 = vpop.f32.mrf.mxu3 }
 0x71d   :  { %v3504_v23 = vadd.f32 %v3503_v39, %v3135_v2  ;;  %v4018_v2 = vpack.c.bf16 %v3866_v24, %v3866_v24 }
 0x71f   :  { %v9024_v47 = vunpack.c.l.b16 %v4018_v2  ;;  %v9720_v2 = vld [vmem:[#allocation97_spill] sm:$0xff] }
 0x720   :  { %6670 = vmatmul.msk.bf16.gmra.mxu2 %vm4088_vm1, %v9711_v17  ;;  %6694 = vmatmul.msk.bf16.gmra.mxu1 %vm4088_vm1, %v9712_v11  ;;  %v9717_v11 = vld [vmem:[#allocation48_spill] sm:$0xff] }
 0x721   :  { %6646 = vmatmul.msk.bf16.gmra.mxu3 %vm4088_vm1, %v9715_v33  ;;  %v3867_v29 = vpop.f32.mrf.mxu0  ;;  %9716 = vst [vmem:[#allocation75_spill] sm:$0xff] %v9024_v47  ;;  %v3140_v24 = vadd.f32 %v8794_v62, %v9717_v11  ;;  %v9718_v33 = vpack.c.b16 %v8654_v55, %v8652_v61  ;;  %v4242_v62 = vadd.f32 %v8812_v13, %v9722_v25 }
 0x722   :  { %v3868_v50 = vadd.f32 %v3867_v29, %v3499_v12  ;;  %v9719_v29 = vld [vmem:[#allocation98_spill] sm:$0xff] }
 0x723   :  { %v9022_v39 = vpop.f32.mrf.mxu2 }
 0x724   :  { %v4019_v63 = vpack.c.bf16 %v3868_v50, %v3868_v50  ;;  %v3506_v20 = vpop.f32.mrf.mxu3  ;;  %v9721_v50 = vpack.c.b16 %v9719_v29, %v9720_v2 }
 0x725   :  { %v3507_v17 = vadd.f32 %v3506_v20, %v3138_v34 }
 0x726   :  { %v9026_v45 = vunpack.c.l.b16 %v4019_v63 }
 0x729   :  { %v3870_v22 = vpop.f32.mrf.mxu0 }
 0x72a   :  { %v3871_v58 = vadd.f32 %v3870_v22, %v3502_v9 }
 0x72b   :  { %v9032_v12 = vpop.f32.mrf.mxu2 }
 0x72c   :  { %v3508_v60 = vpop.f32.mrf.mxu3  ;;  %v4020_v63 = vpack.c.bf16 %v3871_v58, %v3871_v58 }
 0x72d   :  { %v3509_v35 = vadd.f32 %v3508_v60, %v3140_v24 }
 0x72e   :  { %v9044_v22 = vunpack.c.l.b16 %v4020_v63 }
 0x730   :  { %6699 = vmatmul.msk.bf16.vlgmr.msra.gmra.mxu2 %vm4088_vm1, %v9718_v33 }
 0x731   :  { %6675 = vmatmul.msk.bf16.vlgmr.msrb.gmra.mxu3 %vm4088_vm1, %v9721_v50  ;;  %v3872_v34 = vpop.f32.mrf.mxu0 }
 0x732   :  { %v3873_v20 = vadd.f32 %v3872_v34, %v3504_v23  ;;  %v9723_v23 = vld [vmem:[#allocation49_spill] sm:$0xff] }
 0x733   :  { %v4630_v11 = vpop.f32.mrf.mxu2  ;;  %v4244_v29 = vadd.f32 %v8822_v3, %v9723_v23 }
 0x734   :  { %v4021_v47 = vpack.c.bf16 %v3873_v20, %v3873_v20  ;;  %v4360_v24 = vpop.f32.mrf.mxu3  ;;  %v9726_v20 = vld [vmem:[#allocation100_spill] sm:$0xff] }
 0x735   :  { %v4400_v9 = vadd.f32 %v4360_v24, %v4242_v62  ;;  %v9727_v62 = vld [vmem:[#allocation99_spill] sm:$0xff] }
 0x736   :  { %v9046_v55 = vunpack.c.l.b16 %v4021_v47  ;;  %v9724_v47 = vld [vmem:[#allocation66_spill] sm:$0xff] }
 0x737   :  { %v4535_v61 = vadd.f32 %v8878_v57, %v4400_v9  ;;  %v9725_v63 = vpack.c.b16 %v8680_v4, %v9724_v47 }
 0x738   :  { %v5129_v60 = vpack.c.b16 %v9046_v55, %v9044_v22 }
 0x739   :  { %v9051_v33 = vadd.f32 %v4630_v11, %v4535_v61  ;;  %v3875_v58 = vpop.f32.mrf.mxu0  ;;  %v9728_v11 = vpack.c.b16 %v9726_v20, %v9727_v62  ;;  %v9729_v61 = vld [vmem:[#allocation15_spill] sm:$0xff]  ;;  %v9731_v62 = vld [vmem:[#allocation68_spill] sm:$0xff] }
 0x73a   :  { %v3876_v50 = vadd.f32 %v3875_v58, %v3507_v17  ;;  %v4247_v17 = vadd.f32 %v8840_v37, %v9729_v61 }
 0x73b   :  { %v4632_v13 = vpop.f32.mrf.mxu2 }
 0x73c   :  { %v4362_v25 = vpop.f32.mrf.mxu3  ;;  %v4022_v3 = vpack.c.bf16 %v3876_v50, %v3876_v50  ;;  %v9730_v50 = vld [vmem:[#allocation18_spill] sm:$0xff] }
 0x73d   :  { %v4401_v2 = vadd.f32 %v4362_v25, %v4244_v29 }
 0x73e   :  { %v9068_v4 = vunpack.c.l.b16 %v4022_v3 }
 0x73f   :  { %v4536_v34 = vadd.f32 %v8900_v43, %v4401_v2 }
 0x740   :  { %6700 = vmatmul.msk.bf16.gmra.mxu2 %vm4088_vm1, %v9725_v63 }
 0x741   :  { %v9060_v57 = vadd.f32 %v4632_v13, %v4536_v34  ;;  %6676 = vmatmul.msk.bf16.gmra.mxu3 %vm4088_vm1, %v9728_v11  ;;  %v3877_v24 = vpop.f32.mrf.mxu0  ;;  %v9732_v11 = vld [vmem:[#allocation19_spill] sm:$0xff] }
 0x742   :  { %v3878_v9 = vadd.f32 %v3877_v24, %v3509_v35  ;;  %v4249_v35 = vadd.f32 %v8852_v54, %v9730_v50  ;;  %v9733_v24 = vpack.c.b16 %v9731_v62, %v9732_v11  ;;  %v9738_v50 = vld [vmem:[#allocation65_spill] sm:$0xff] }
 0x743   :  { %v4635_v58 = vpop.f32.mrf.mxu2  ;;  %v9739_v11 = vld [vmem:[#allocation21_spill] sm:$0xff] }
 0x744   :  { %v4023_v43 = vpack.c.bf16 %v3878_v9, %v3878_v9  ;;  %v4365_v23 = vpop.f32.mrf.mxu3  ;;  %v9735_v9 = vld [vmem:[#allocation102_spill] sm:$0xff] }
 0x745   :  { %v4402_v29 = vadd.f32 %v4365_v23, %v4247_v17  ;;  %v9737_v17 = vld [vmem:[#allocation17_spill] sm:$0xff] }
 0x746   :  { %v9070_v25 = vunpack.c.l.b16 %v4023_v43  ;;  %v4252_v54 = vadd.f32 %v8870_v15, %v9737_v17  ;;  %v9745_v17 = vld [vmem:[#allocation20_spill] sm:$0xff] }
 0x747   :  { %v4537_v13 = vadd.f32 %v8912_v56, %v4402_v29  ;;  %v9734_v56 = vld [vmem:[#allocation103_spill] sm:$0xff]  ;;  %v4515_v29 = vpop.f32.mrf.mxu1 }
 0x748   :  { %v5130_v2 = vpack.c.b16 %v9070_v25, %v9068_v4  ;;  %v9736_v61 = vpack.c.b16 %v9734_v56, %v9735_v9  ;;  %v9742_v9 = vld [vmem:[#allocation106_spill] sm:$0xff] }
 0x749   :  { %v9075_v34 = vadd.f32 %v4635_v58, %v4537_v13 }
 0x74b   :  { %v4637_v47 = vpop.f32.mrf.mxu2 }
 0x74c   :  { %v4367_v37 = vpop.f32.mrf.mxu3 }
 0x74d   :  { %v4403_v63 = vadd.f32 %v4367_v37, %v4249_v35  ;;  %v4254_v35 = vadd.f32 %v8882_v0, %v9738_v50  ;;  %v4257_v0 = vadd.f32 %v8898_v32, %v9745_v17  ;;  %v9746_v50 = vld [vmem:[#allocation67_spill] sm:$0xff] }
 0x74f   :  { %v4538_v20 = vadd.f32 %v8934_v38, %v4403_v63  ;;  %v4517_v62 = vpop.f32.mrf.mxu1 }
 0x750   :  { %6701 = vmatmul.msk.bf16.gmra.mxu2 %vm4088_vm1, %v9733_v24  ;;  %v9740_v24 = vld [vmem:[#allocation22_spill] sm:$0xff] }
 0x751   :  { %v9084_v3 = vadd.f32 %v4637_v47, %v4538_v20  ;;  %6677 = vmatmul.msk.bf16.gmra.mxu3 %vm4088_vm1, %v9736_v61  ;;  %v9741_v15 = vpack.c.b16 %v9739_v11, %v9740_v24  ;;  %v9747_v11 = vld [vmem:[#allocation24_spill] sm:$0xff] }
 0x752   :  { %v9748_v24 = vpack.c.b16 %v8762_v26, %v9747_v11  ;;  %v9755_v11 = vld [vmem:[#allocation9_spill] sm:$0xff] }
 0x753   :  { %v4640_v58 = vpop.f32.mrf.mxu2 }
 0x754   :  { %v4370_v43 = vpop.f32.mrf.mxu3 }
 0x755   :  { %v4404_v23 = vadd.f32 %v4370_v43, %v4252_v54 }
 0x757   :  { %v4539_v38 = vadd.f32 %v8957_v1, %v4404_v23  ;;  %v9743_v1 = vld [vmem:[#allocation105_spill] sm:$0xff] }
 0x758   :  { %v9744_v61 = vpack.c.b16 %v9742_v9, %v9743_v1  ;;  %v9752_v1 = vld [vmem:[#allocation70_spill] sm:$0xff] }
 0x759   :  { %v9093_v13 = vadd.f32 %v4640_v58, %v4539_v38  ;;  %v4520_v38 = vpop.f32.mrf.mxu1 }
 0x75b   :  { %v4642_v47 = vpop.f32.mrf.mxu2 }
 0x75c   :  { %v4372_v37 = vpop.f32.mrf.mxu3 }
 0x75d   :  { %v4405_v63 = vadd.f32 %v4372_v37, %v4254_v35  ;;  %v4259_v35 = vadd.f32 %v8910_v10, %v9746_v50  ;;  %v7049_v10 = vld [vmem:[%s9276_s4 + $0x40] sm:$0xff] }
 0x75e   :  { %5168 = vmatpush.bf16.msra.mxu3 %v7049_v10 }
 0x75f   :  { %v4540_v20 = vadd.f32 %v8973_v28, %v4405_v63 }
 0x760   :  { %6702 = vmatmul.msk.bf16.gmra.mxu2 %vm4088_vm1, %v9741_v15  ;;  %v9749_v15 = vld [vmem:[#allocation108_spill] sm:$0xff] }
 0x761   :  { %v9102_v56 = vadd.f32 %v4642_v47, %v4540_v20  ;;  %6678 = vmatmul.msk.bf16.gmra.mxu3 %vm4088_vm1, %v9744_v61  ;;  %v4262_v61 = vadd.f32 %v8928_v42, %v9752_v1  ;;  %v4522_v17 = vpop.f32.mrf.mxu1 }
 0x763   :  { %v4645_v54 = vpop.f32.mrf.mxu2 }
 0x764   :  { %v4375_v58 = vpop.f32.mrf.mxu3 }
 0x765   :  { %v4406_v43 = vadd.f32 %v4375_v58, %v4257_v0 }
 0x767   :  { %v4541_v28 = vadd.f32 %v8994_v5, %v4406_v43  ;;  %v9750_v5 = vld [vmem:[#allocation107_spill] sm:$0xff]  ;;  %v9753_v43 = vld [vmem:[#allocation69_spill] sm:$0xff] }
 0x768   :  { %v9751_v9 = vpack.c.b16 %v9749_v15, %v9750_v5 }
 0x769   :  { %v9111_v23 = vadd.f32 %v4645_v54, %v4541_v28  ;;  %v4264_v28 = vadd.f32 %v8943_v14, %v9753_v43  ;;  %v4267_v14 = vadd.f32 %v8961_v27, %v8770_v59  ;;  %v9759_v27 = vld [vmem:[#allocation33_spill] sm:$0xff] }
 0x76b   :  { %v4647_v47 = vpop.f32.mrf.mxu2 }
 0x76c   :  { %v4377_v37 = vpop.f32.mrf.mxu3 }
 0x76d   :  { %v4407_v63 = vadd.f32 %v4377_v37, %v4259_v35  ;;  %v4525_v37 = vpop.f32.mrf.mxu1 }
 0x76f   :  { %v4542_v20 = vadd.f32 %v9006_v19, %v4407_v63 }
 0x770   :  { %6703 = vmatmul.msk.bf16.gmra.mxu2 %vm4088_vm1, %v9748_v24  ;;  %v9756_v24 = vld [vmem:[#allocation42_spill] sm:$0xff] }
 0x771   :  { %v9120_v32 = vadd.f32 %v4647_v47, %v4542_v20  ;;  %6679 = vmatmul.msk.bf16.gmra.mxu3 %vm4088_vm1, %v9751_v9  ;;  %v9754_v20 = vpack.c.b16 %v8786_v46, %v8784_v6  ;;  %v4269_v6 = vadd.f32 %v8971_v53, %v8788_v21  ;;  %v4272_v21 = vadd.f32 %v8992_v40, %v8808_v41  ;;  %v9763_v40 = vld [vmem:[#allocation35_spill] sm:$0xff] }
 0x773   :  { %v4650_v19 = vpop.f32.mrf.mxu2 }
 0x774   :  { %v4380_v26 = vpop.f32.mrf.mxu3 }
 0x775   :  { %v4408_v0 = vadd.f32 %v4380_v26, %v4262_v61 }
 0x777   :  { %v4543_v54 = vadd.f32 %v4515_v29, %v4408_v0  ;;  %v9757_v29 = vpack.c.b16 %v9755_v11, %v9756_v24  ;;  %v9758_v0 = vpack.c.b16 %v8816_v44, %v8814_v18  ;;  %v4274_v18 = vadd.f32 %v9004_v31, %v8824_v8 }
 0x778   :  { %v9762_v24 = vpack.c.b16 %v8846_v7, %v8844_v16  ;;  %v4277_v8 = vadd.f32 %v9022_v39, %v8842_v51  ;;  %v4279_v16 = vadd.f32 %v9032_v12, %v8854_v52  ;;  %v9766_v51 = vpack.c.b16 %v8874_v48, %v8872_v49 }
 0x779   :  { %v9131_v58 = vadd.f32 %v4650_v19, %v4543_v54  ;;  %v9760_v54 = vld [vmem:[#allocation34_spill] sm:$0xff] }
 0x77b   :  { %v4652_v50 = vpop.f32.mrf.mxu2 }
 0x77c   :  { %v4382_v35 = vpop.f32.mrf.mxu3 }
 0x77d   :  { %v4409_v47 = vadd.f32 %v4382_v35, %v4264_v28 }
 0x77f   :  { %v4544_v63 = vadd.f32 %v4517_v62, %v4409_v47  ;;  %v4527_v62 = vpop.f32.mrf.mxu1 }
 0x780   :  { %6704 = vmatmul.msk.bf16.gmra.mxu2 %vm4088_vm1, %v9754_v20 }
 0x781   :  { %v9139_v42 = vadd.f32 %v4652_v50, %v4544_v63  ;;  %6680 = vmatmul.msk.bf16.gmra.mxu3 %vm4088_vm1, %v9757_v29  ;;  %v9764_v29 = vld [vmem:[#allocation36_spill] sm:$0xff] }
 0x783   :  { %v4655_v15 = vpop.f32.mrf.mxu2 }
 0x784   :  { %v4385_v5 = vpop.f32.mrf.mxu3 }
 0x785   :  { %v4410_v9 = vadd.f32 %v4385_v5, %v4267_v14 }
 0x787   :  { %v4545_v10 = vadd.f32 %v4520_v38, %v4410_v9  ;;  %v9761_v38 = vpack.c.b16 %v9759_v27, %v9760_v54  ;;  %v4530_v43 = vpop.f32.mrf.mxu1 }
 0x789   :  { %v9147_v1 = vadd.f32 %v4655_v15, %v4545_v10 }
 0x78b   :  { %v4657_v46 = vpop.f32.mrf.mxu2 }
 0x78c   :  { %v4387_v61 = vpop.f32.mrf.mxu3 }
 0x78d   :  { %v4411_v19 = vadd.f32 %v4387_v61, %v4269_v6 }
 0x78f   :  { %v4546_v26 = vadd.f32 %v4522_v17, %v4411_v19  ;;  %v4532_v47 = vpop.f32.mrf.mxu1 }
 0x790   :  { %6705 = vmatmul.msk.bf16.gmra.mxu2 %vm4088_vm1, %v9758_v0 }
 0x791   :  { %v9155_v59 = vadd.f32 %v4657_v46, %v4546_v26  ;;  %6681 = vmatmul.msk.bf16.gmra.mxu3 %vm4088_vm1, %v9761_v38 }
 0x793   :  { %v4660_v53 = vpop.f32.mrf.mxu2 }
 0x794   :  { %v4390_v28 = vpop.f32.mrf.mxu3 }
 0x795   :  { %v4412_v50 = vadd.f32 %v4390_v28, %v4272_v21  ;;  %v9767_v28 = vld [vmem:[#allocation74_spill] sm:$0xff] }
 0x797   :  { %v4547_v17 = vadd.f32 %v4525_v37, %v4412_v50  ;;  %v9765_v37 = vpack.c.b16 %v9763_v40, %v9764_v29  ;;  %v4900_v5 = vpop.f32.mrf.mxu1  ;;  %v9768_v50 = vld [vmem:[#allocation23_spill] sm:$0xff]  ;;  %v9770_v29 = vld [vmem:[#allocation73_spill] sm:$0xff] }
 0x798   :  { %v9769_v49 = vpack.c.b16 %v9767_v28, %v9768_v50 }
 0x799   :  { %v9163_v35 = vadd.f32 %v4660_v53, %v4547_v17 }
 0x79b   :  { %v4662_v44 = vpop.f32.mrf.mxu2 }
 0x79c   :  { %v4392_v63 = vpop.f32.mrf.mxu3 }
 0x79d   :  { %v4413_v20 = vadd.f32 %v4392_v63, %v4274_v18 }
 0x79f   :  { %v4548_v11 = vadd.f32 %v4527_v62, %v4413_v20  ;;  %v4902_v61 = vpop.f32.mrf.mxu1 }
 0x7a0   :  { %6706 = vmatmul.msk.bf16.gmra.mxu2 %vm4088_vm1, %v9762_v24 }
 0x7a1   :  { %v9171_v41 = vadd.f32 %v4662_v44, %v4548_v11  ;;  %6682 = vmatmul.msk.bf16.gmra.mxu3 %vm4088_vm1, %v9765_v37  ;;  %v9771_v37 = vpack.c.b16 %v8932_v30, %v9770_v29 }
 0x7a3   :  { %v4665_v31 = vpop.f32.mrf.mxu2 }
 0x7a4   :  { %v4395_v14 = vpop.f32.mrf.mxu3 }
 0x7a5   :  { %v4414_v15 = vadd.f32 %v4395_v14, %v4277_v8 }
 0x7a7   :  { %v4549_v9 = vadd.f32 %v4530_v43, %v4414_v15  ;;  %v4905_v52 = vpop.f32.mrf.mxu1 }
 0x7a9   :  { %v9179_v10 = vadd.f32 %v4665_v31, %v4549_v9 }
 0x7ab   :  { %v4667_v7 = vpop.f32.mrf.mxu2 }
 0x7ac   :  { %v4397_v62 = vpop.f32.mrf.mxu3 }
 0x7ad   :  { %v4415_v6 = vadd.f32 %v4397_v62, %v4279_v16 }
 0x7af   :  { %v4550_v46 = vadd.f32 %v4532_v47, %v4415_v6  ;;  %v4907_v17 = vpop.f32.mrf.mxu1  ;;  %v9772_v6 = vld [vmem:[#allocation25_spill] sm:$0xff] }
 0x7b1   :  { %v9183_v19 = vadd.f32 %v4667_v7, %v4550_v46  ;;  %6711 = vmatmul.msk.bf16.vlgmr.msra.gmra.mxu3 %vm4088_vm1, %v9766_v51  ;;  %v9773_v46 = vld [vmem:[#allocation26_spill] sm:$0xff] }
 0x7b3   :  { %v5035_v39 = vpop.f32.mrf.mxu2 }
 0x7b4   :  { %v4765_v26 = vpop.f32.mrf.mxu3 }
 0x7b5   :  { %v4805_v0 = vadd.f32 %v4765_v26, %v9051_v33 }
 0x7b7   :  { %v4940_v27 = vadd.f32 %v4900_v5, %v4805_v0 }
 0x7b9   :  { %v9190_v54 = vadd.f32 %v5035_v39, %v4940_v27 }
 0x7bb   :  { %v5037_v12 = vpop.f32.mrf.mxu2 }
 0x7bc   :  { %v4767_v38 = vpop.f32.mrf.mxu3 }
 0x7bd   :  { %v4806_v43 = vadd.f32 %v4767_v38, %v9060_v57  ;;  %v4910_v57 = vpop.f32.mrf.mxu1 }
 0x7bf   :  { %v4941_v21 = vadd.f32 %v4902_v61, %v4806_v43  ;;  %v9774_v61 = vpack.c.b16 %v9772_v6, %v9773_v46 }
 0x7c1   :  { %v9193_v53 = vadd.f32 %v5037_v12, %v4941_v21  ;;  %6712 = vmatmul.msk.bf16.gmra.mxu3 %vm4088_vm1, %v9769_v49  ;;  %v9775_v21 = vld [vmem:[#allocation76_spill] sm:$0xff] }
 0x7c2   :  { %v9776_v28 = vpack.c.b16 %v8998_v36, %v9775_v21 }
 0x7c3   :  { %v5040_v48 = vpop.f32.mrf.mxu2 }
 0x7c4   :  { %v4770_v18 = vpop.f32.mrf.mxu3 }
 0x7c5   :  { %v4807_v33 = vadd.f32 %v4770_v18, %v9075_v34  ;;  %v4912_v34 = vpop.f32.mrf.mxu1 }
 0x7c7   :  { %v4942_v44 = vadd.f32 %v4905_v52, %v4807_v33 }
 0x7c9   :  { %v5077_v47 = vadd.f32 %v5040_v48, %v4942_v44 }
 0x7cb   :  { %v5042_v63 = vpop.f32.mrf.mxu2 }
 0x7cc   :  { %v4772_v20 = vpop.f32.mrf.mxu3 }
 0x7cd   :  { %v4808_v11 = vadd.f32 %v4772_v20, %v9084_v3  ;;  %v4915_v30 = vpop.f32.mrf.mxu1 }
 0x7cf   :  { %v4943_v24 = vadd.f32 %v4907_v17, %v4808_v11 }
 0x7d1   :  { %v5078_v40 = vadd.f32 %v5042_v63, %v4943_v24  ;;  %6713 = vmatmul.msk.bf16.gmra.mxu3 %vm4088_vm1, %v9771_v37 }
 0x7d3   :  { %v5045_v8 = vpop.f32.mrf.mxu2 }
 0x7d4   :  { %v4775_v31 = vpop.f32.mrf.mxu3 }
 0x7d5   :  { %v4809_v14 = vadd.f32 %v4775_v31, %v9093_v13  ;;  %v4917_v27 = vpop.f32.mrf.mxu1 }
 0x7d7   :  { %v4944_v15 = vadd.f32 %v4910_v57, %v4809_v14 }
 0x7d9   :  { %v5079_v5 = vadd.f32 %v5045_v8, %v4944_v15 }
 0x7db   :  { %v5047_v9 = vpop.f32.mrf.mxu2 }
 0x7dc   :  { %v4777_v16 = vpop.f32.mrf.mxu3 }
 0x7dd   :  { %v4810_v7 = vadd.f32 %v4777_v16, %v9102_v56  ;;  %v4920_v48 = vpop.f32.mrf.mxu1 }
 0x7df   :  { %v4945_v3 = vadd.f32 %v4912_v34, %v4810_v7 }
 0x7e1   :  { %v5080_v62 = vadd.f32 %v5047_v9, %v4945_v3  ;;  %6714 = vmatmul.msk.bf16.gmra.mxu3 %vm4088_vm1, %v9774_v61 }
 0x7e3   :  { %v5050_v39 = vpop.f32.mrf.mxu2 }
 0x7e4   :  { %v4780_v51 = vpop.f32.mrf.mxu3 }
 0x7e5   :  { %v4811_v26 = vadd.f32 %v4780_v51, %v9111_v23 }
 0x7e7   :  { %v4946_v13 = vadd.f32 %v4915_v30, %v4811_v26 }
 0x7e9   :  { %v5081_v0 = vadd.f32 %v5050_v39, %v4946_v13 }
 0x7eb   :  { %v5052_v38 = vpop.f32.mrf.mxu2 }
 0x7ec   :  { %v4782_v52 = vpop.f32.mrf.mxu3 }
 0x7ed   :  { %v4812_v12 = vadd.f32 %v4782_v52, %v9120_v32  ;;  %v9777_v32 = vld [vmem:[#allocation75_spill] sm:$0xff] }
 0x7ee   :  { %v9778_v63 = vpack.c.b16 %v9026_v45, %v9777_v32 }
 0x7ef   :  { %v4947_v56 = vadd.f32 %v4917_v27, %v4812_v12 }
 0x7f1   :  { %v5082_v43 = vadd.f32 %v5052_v38, %v4947_v56  ;;  %6715 = vmatmul.msk.bf16.gmra.mxu3 %vm4088_vm1, %v9776_v28 }
 0x7f3   :  { %v5055_v23 = vpop.f32.mrf.mxu2 }
 0x7f4   :  { %v4785_v50 = vpop.f32.mrf.mxu3 }
 0x7f5   :  { %v4813_v49 = vadd.f32 %v4785_v50, %v9131_v58 }
 0x7f7   :  { %v4948_v17 = vadd.f32 %v4920_v48, %v4813_v49 }
 0x7f9   :  { %v5083_v18 = vadd.f32 %v5055_v23, %v4948_v17 }
 0x7fc   :  { %v4787_v33 = vpop.f32.mrf.mxu3 }
 0x7fd   :  { %v9219_v44 = vadd.f32 %v4787_v33, %v9139_v42 }
 0x801   :  { %6716 = vmatmul.msk.bf16.gmra.mxu3 %vm4088_vm1, %v9778_v63  ;;  %v7060_v63 = vld [vmem:[%s9277_s5] ss:$0 sm:$0xff] }
 0x804   :  { %v4790_v20 = vpop.f32.mrf.mxu3 }
 0x805   :  { %v4815_v36 = vadd.f32 %v4790_v20, %v9147_v1 }
 0x80c   :  { %v4792_v11 = vpop.f32.mrf.mxu3 }
 0x80d   :  { %v4816_v57 = vadd.f32 %v4792_v11, %v9155_v59 }
 0x811   :  { %6717 = vmatmul.msk.bf16.gmra.mxu3 %vm4088_vm1, %v5129_v60 }
 0x814   :  { %v4795_v58 = vpop.f32.mrf.mxu3 }
 0x815   :  { %v4817_v42 = vadd.f32 %v4795_v58, %v9163_v35 }
 0x81c   :  { %v4797_v24 = vpop.f32.mrf.mxu3 }
 0x81d   :  { %v4818_v29 = vadd.f32 %v4797_v24, %v9171_v41 }
 0x821   :  { %6718 = vmatmul.msk.bf16.gmra.mxu3 %vm4088_vm1, %v5130_v2 }
 0x824   :  { %v4800_v45 = vpop.f32.mrf.mxu3 }
 0x825   :  { %v4819_v1 = vadd.f32 %v4800_v45, %v9179_v10 }
 0x82c   :  { %v4802_v59 = vpop.f32.mrf.mxu3 }
 0x82d   :  { %v4820_v37 = vadd.f32 %v4802_v59, %v9183_v19 }
 0x834   :  { %v5170_v22 = vpop.f32.mrf.mxu3 }
 0x835   :  { %v9240_v55 = vadd.f32 %v5170_v22, %v9190_v54  ;;  %v4922_v54 = vpop.f32.mrf.mxu1 }
 0x836   :  { %v4949_v58 = vadd.f32 %v4922_v54, %v9219_v44 }
 0x83c   :  { %v5172_v60 = vpop.f32.mrf.mxu3 }
 0x83d   :  { %v9243_v35 = vadd.f32 %v5172_v60, %v9193_v53  ;;  %v5057_v53 = vpop.f32.mrf.mxu2  ;;  %v4925_v16 = vpop.f32.mrf.mxu1 }
 0x83e   :  { %v4950_v33 = vadd.f32 %v4925_v16, %v4815_v36  ;;  %v5084_v22 = vadd.f32 %v5057_v53, %v4949_v58 }
 0x844   :  { %v5175_v41 = vpop.f32.mrf.mxu3 }
 0x845   :  { %v9245_v8 = vadd.f32 %v5175_v41, %v5077_v47  ;;  %v5060_v3 = vpop.f32.mrf.mxu2  ;;  %v4927_v6 = vpop.f32.mrf.mxu1 }
 0x846   :  { %v4951_v49 = vadd.f32 %v4927_v6, %v4816_v57 }
 0x84c   :  { %v5177_v4 = vpop.f32.mrf.mxu3 }
 0x84d   :  { %v9247_v25 = vadd.f32 %v5177_v4, %v5078_v40  ;;  %v5062_v46 = vpop.f32.mrf.mxu2  ;;  %v4930_v61 = vpop.f32.mrf.mxu1 }
 0x84e   :  { %v4952_v21 = vadd.f32 %v4930_v61, %v4817_v42  ;;  %v5086_v24 = vadd.f32 %v5062_v46, %v4951_v49 }
 0x854   :  { %v5180_v2 = vpop.f32.mrf.mxu3 }
 0x855   :  { %v9249_v31 = vadd.f32 %v5180_v2, %v5079_v5  ;;  %v5065_v30 = vpop.f32.mrf.mxu2  ;;  %v4932_v51 = vpop.f32.mrf.mxu1 }
 0x856   :  { %v4953_v56 = vadd.f32 %v4932_v51, %v4818_v29  ;;  %v5087_v32 = vadd.f32 %v5065_v30, %v4952_v21 }
 0x857   :  { %v5234_v61 = vadd.f32 %v7060_v63, %v9249_v31 }
 0x859   :  { %v5250_v51 = vmax.f32 %v5234_v61, 0.0 }
 0x85c   :  { %v5182_v10 = vpop.f32.mrf.mxu3 }
 0x85d   :  { %v9251_v14 = vadd.f32 %v5182_v10, %v5080_v62  ;;  %v5067_v26 = vpop.f32.mrf.mxu2  ;;  %v4935_v13 = vpop.f32.mrf.mxu1 }
 0x85e   :  { %v4954_v12 = vadd.f32 %v4935_v13, %v4819_v1  ;;  %v5088_v48 = vadd.f32 %v5067_v26, %v4953_v56  ;;  %v5085_v1 = vadd.f32 %v5060_v3, %v4950_v33 }
 0x864   :  { %v5185_v19 = vpop.f32.mrf.mxu3 }
 0x865   :  { %v9253_v15 = vadd.f32 %v5185_v19, %v5081_v0  ;;  %v5070_v27 = vpop.f32.mrf.mxu2  ;;  %v4937_v38 = vpop.f32.mrf.mxu1 }
 0x866   :  { %v5089_v28 = vadd.f32 %v5070_v27, %v4954_v12 }
 0x867   :  { %v5236_v6 = vadd.f32 %v7060_v63, %v9253_v15  ;;  %v5231_v15 = vadd.f32 %v7060_v63, %v9243_v35 }
 0x869   :  { %v5252_v30 = vmax.f32 %v5236_v6, 0.0  ;;  %v5247_v13 = vmax.f32 %v5231_v15, 0.0 }
 0x86c   :  { %v5187_v34 = vpop.f32.mrf.mxu3 }
 0x86d   :  { %v9255_v9 = vadd.f32 %v5187_v34, %v5082_v43  ;;  %v4955_v43 = vadd.f32 %v4937_v38, %v4820_v37  ;;  %v5072_v50 = vpop.f32.mrf.mxu2 }
 0x86f   :  { %v5090_v17 = vadd.f32 %v5072_v50, %v4955_v43  ;;  %v5237_v3 = vadd.f32 %v7060_v63, %v9255_v9  ;;  %v5232_v9 = vadd.f32 %v7060_v63, %v9245_v8 }
 0x871   :  { %v5248_v26 = vmax.f32 %v5232_v9, 0.0 }
 0x874   :  { %v5190_v47 = vpop.f32.mrf.mxu3 }
 0x875   :  { %v5218_v7 = vadd.f32 %v5190_v47, %v5083_v18 }
 0x877   :  { %v5238_v16 = vadd.f32 %v7060_v63, %v5218_v7  ;;  %v5233_v7 = vadd.f32 %v7060_v63, %v9247_v25 }
 0x879   :  { %v5254_v46 = vmax.f32 %v5238_v16, 0.0 }
 0x87c   :  { %v5192_v40 = vpop.f32.mrf.mxu3 }
 0x87d   :  { %v5219_v4 = vadd.f32 %v5192_v40, %v5084_v22  ;;  %v5235_v40 = vadd.f32 %v7060_v63, %v9251_v14  ;;  %v5230_v14 = vadd.f32 %v7060_v63, %v9240_v55 }
 0x87f   :  { %v5239_v44 = vadd.f32 %v7060_v63, %v5219_v4  ;;  %v5246_v31 = vmax.f32 %v5230_v14, 0.0 }
 0x881   :  { %v5255_v53 = vmax.f32 %v5239_v44, 0.0 }
 0x884   :  { %v5195_v5 = vpop.f32.mrf.mxu3 }
 0x885   :  { %v5220_v60 = vadd.f32 %v5195_v5, %v5085_v1  ;;  %v5253_v5 = vmax.f32 %v5237_v3, 0.0 }
 0x887   :  { %v5240_v19 = vadd.f32 %v7060_v63, %v5220_v60 }
 0x889   :  { %v5256_v47 = vmax.f32 %v5240_v19, 0.0 }
 0x88c   :  { %v5197_v62 = vpop.f32.mrf.mxu3 }
 0x88d   :  { %v5221_v57 = vadd.f32 %v5197_v62, %v5086_v24  ;;  %v5251_v62 = vmax.f32 %v5235_v40, 0.0 }
 0x88f   :  { %v5241_v2 = vadd.f32 %v7060_v63, %v5221_v57 }
 0x891   :  { %v5257_v54 = vmax.f32 %v5241_v2, 0.0 }
 0x894   :  { %v5200_v39 = vpop.f32.mrf.mxu3 }
 0x895   :  { %v5222_v29 = vadd.f32 %v5200_v39, %v5087_v32  ;;  %v5249_v39 = vmax.f32 %v5233_v7, 0.0 }
 0x897   :  { %v5242_v36 = vadd.f32 %v7060_v63, %v5222_v29 }
 0x899   :  { %v5258_v34 = vmax.f32 %v5242_v36, 0.0 }
 0x89c   :  { %v5202_v0 = vpop.f32.mrf.mxu3 }
 0x89d   :  { %v5223_v20 = vadd.f32 %v5202_v0, %v5088_v48  ;;  %v5262_v0 = vld [vmem:[#allocation6] sm:$0xff] }
 0x89f   :  { %v5243_v59 = vadd.f32 %v7060_v63, %v5223_v20 }
 0x8a1   :  { %v5259_v10 = vmax.f32 %v5243_v59, 0.0 }
 0x8a4   :  { %v5205_v52 = vpop.f32.mrf.mxu3 }
 0x8a5   :  { %v5224_v23 = vadd.f32 %v5205_v52, %v5089_v28 }
 0x8a7   :  { %v5244_v42 = vadd.f32 %v7060_v63, %v5224_v23 }
 0x8a9   :  { %v5260_v41 = vmax.f32 %v5244_v42, 0.0 }
 0x8ac   :  { %v5207_v18 = vpop.f32.mrf.mxu3 }
 0x8ad   :  { %v5225_v11 = vadd.f32 %v5207_v18, %v5090_v17 }
 0x8af   :  { %v5245_v45 = vadd.f32 %v7060_v63, %v5225_v11 }
 0x8b1   :  { %v5261_v37 = vmax.f32 %v5245_v45, 0.0 }
 0x8b3   :  { %5263 = vmatpush.msra.mxu1 %v5261_v37 }
 0x8b5   :  { %5264 = vmatpush.msra.mxu1 %v5260_v41 }
 0x8b7   :  { %5265 = vmatpush.msra.mxu1 %v5259_v10 }
 0x8b9   :  { %5266 = vmatpush.msra.mxu1 %v5258_v34 }
 0x8bb   :  { %5267 = vmatpush.msra.mxu1 %v5257_v54 }
 0x8bd   :  { %5268 = vmatpush.msra.mxu1 %v5256_v47 }
 0x8bf   :  { %5269 = vmatpush.msra.mxu1 %v5255_v53 }
 0x8c1   :  { %5270 = vmatpush.msra.mxu1 %v5254_v46 }
 0x8c3   :  { %5271 = vmatpush.msra.mxu1 %v5253_v5 }
 0x8c5   :  { %5272 = vmatpush.msra.mxu1 %v5252_v30 }
 0x8c7   :  { %5273 = vmatpush.msra.mxu1 %v5251_v62 }
 0x8c9   :  { %5274 = vmatpush.msra.mxu1 %v5250_v51 }
 0x8cb   :  { %5275 = vmatpush.msra.mxu1 %v5249_v39 }
 0x8cd   :  { %5276 = vmatpush.msra.mxu1 %v5248_v26 }
 0x8cf   :  { %5277 = vmatpush.msra.mxu1 %v5247_v13 }
 0x8d1   :  { %5278 = vmatpush.msra.mxu1 %v5246_v31 }
 0x8d2   :  { %5279 = vmatmul.f32.vlgmr.msra.gmra.mxu1 %v5262_v0 }
 0x94f   :  { %v5280_v25 = vpop.f32.mrf.mxu1 }
 0x950   :  { %v5283_v27 = vmul.f32 0.0625, %v5280_v25 }
 0x952   :  { %5284 = vst [vmem:[%s9279_s7] sm:$0xff] %v5283_v27 }
 0x953   :  { %5289 = vsyncpa [#allocation3], 1 }
 0x954   :  { %5290 = vsyncpa [#allocation5], 1 }

</bundles_post_ra>
